<compile_context>
chip_gen: v7x
topology: tpu7x:2x2x1
jax: 0.10.0
libtpu: 0.0.40
codegen_flags: <defaults>
</compile_context>

<pallas_src>
import functools
import math

import jax
import jax.numpy as jnp
from jax import lax
from jax.experimental import pallas as pl
from jax.experimental.pallas import tpu as pltpu


DN_XT = (((1,), (1,)), ((), ()))   # a @ b.T  (contract last dim of both)
DN_STD = (((1,), (0,)), ((), ()))  # a @ b


# ----------------------------------------------------------------------------
# Fused forward kernel (one grid step == one batch element)
# ----------------------------------------------------------------------------
def _mha_kernel(xq_ref, xk_ref, xv_ref, w_in_ref, b_in_ref, w_out_ref,
                b_out_ref, out_ref, attnw_ref,
                q_s, k_s, v_s, ctx_s, w_s,
                *, num_heads, matmul_dtype):
    L, E = out_ref.shape
    S = attnw_ref.shape[-1]
    H = num_heads
    Dh = E // H
    scale = 1.0 / math.sqrt(Dh)

    def mm(a, b, dn):
        # MXU matmul; operands optionally cast to bf16 (v6e/v7x), f32 accum.
        return lax.dot_general(a.astype(matmul_dtype), b.astype(matmul_dtype),
                               dn, preferred_element_type=jnp.float32)

    # ---- Input projections: one MXU pass per q/k/v covering all heads
    # (contraction dim E).  1/sqrt(Dh) folded into q once; results staged in
    # VMEM scratch so the head loop reads cheap 32-wide slices.
    q_s[...] = (mm(xq_ref[...], w_in_ref[0:E, :], DN_XT)
                + b_in_ref[:, 0:E]) * scale
    k_s[...] = mm(xk_ref[...], w_in_ref[E:2 * E, :], DN_XT) + b_in_ref[:, E:2 * E]
    v_s[...] = mm(xv_ref[...], w_in_ref[2 * E:3 * E, :], DN_XT) + b_in_ref[:, 2 * E:3 * E]

    w_s[...] = jnp.zeros_like(w_s)

    # ---- Per-head attention (short static loop; see TODO about full batching)
    for h in range(H):
        lo, hi = h * Dh, (h + 1) * Dh
        q_h = q_s[:, lo:hi]                       # (L, Dh)
        k_h = k_s[:, lo:hi]                       # (S, Dh)
        v_h = v_s[:, lo:hi]                       # (S, Dh)

        s = mm(q_h, k_h, DN_XT)                   # (L, S), f32
        m = jnp.max(s, axis=-1, keepdims=True)
        p = jnp.exp(s - m)                        # unnormalized probs, f32
        inv_l = 1.0 / jnp.sum(p, axis=-1, keepdims=True)   # exact reciprocal

        # Flash-style: PV on unnormalized p, normalize the (L, Dh) context.
        ctx_s[:, lo:hi] = mm(p, v_h, DN_STD) * inv_l
        # Exact normalization for the returned weights (head-sum accumulator).
        w_s[...] += p * inv_l

    # ---- Single fused output projection (contraction dim E), bias, store.
    out = mm(ctx_s[...], w_out_ref[...], DN_XT) + b_out_ref[...]
    out_ref[...] = out.astype(out_ref.dtype)                       # (L, E)
    attnw_ref[...] = (w_s[...] * (1.0 / H)).reshape(1, L, S).astype(
        attnw_ref.dtype)                                           # (1, L, S)


def fused_mha_pallas(xq, xk, xv, w_in, b_in, w_out, b_out, *, num_heads,
                     batch, q_len, kv_len, out_dtype, matmul_dtype):
    E = w_out.shape[0]
    L, S, N = q_len, kv_len, batch
    f32 = jnp.float32
    kernel = functools.partial(_mha_kernel, num_heads=num_heads,
                               matmul_dtype=matmul_dtype)
    return pl.pallas_call(
        kernel,
        grid=(N,),
        in_specs=[
            pl.BlockSpec((L, E), lambda n: (0, n)),        # xq  (L, N*E)
            pl.BlockSpec((S, E), lambda n: (0, n)),        # xk  (S, N*E)
            pl.BlockSpec((S, E), lambda n: (0, n)),        # xv  (S, N*E)
            pl.BlockSpec((3 * E, E), lambda n: (0, 0)),    # in_proj_weight
            pl.BlockSpec((1, 3 * E), lambda n: (0, 0)),    # in_proj_bias
            pl.BlockSpec((E, E), lambda n: (0, 0)),        # out_proj_weight
            pl.BlockSpec((1, E), lambda n: (0, 0)),        # out_proj_bias
        ],
        out_specs=(
            pl.BlockSpec((L, E), lambda n: (0, n)),        # out (L, N*E)
            pl.BlockSpec((1, L, S), lambda n: (n, 0, 0)),  # weights (N, L, S)
        ),
        out_shape=(
            jax.ShapeDtypeStruct((L, N * E), out_dtype),
            jax.ShapeDtypeStruct((N, L, S), jnp.float32),
        ),
        scratch_shapes=[
            pltpu.VMEM((L, E), f32),   # q (scaled)
            pltpu.VMEM((S, E), f32),   # k
            pltpu.VMEM((S, E), f32),   # v
            pltpu.VMEM((L, E), f32),   # assembled context
            pltpu.VMEM((L, S), f32),   # head-summed normalized weights
        ],
        compiler_params=pltpu.CompilerParams(
            dimension_semantics=("parallel",)),
    )(xq, xk, xv, w_in, b_in, w_out, b_out)


# ----------------------------------------------------------------------------
# Module forward (single Pallas launch; only free reshapes in the wrapper)
# ----------------------------------------------------------------------------
def multihead_attention_forward(params, query, key, value, num_heads,
                                matmul_dtype=jnp.float32):
    """Mirrors torch.nn.MultiheadAttention.forward (no masks, dropout=0,
    need_weights=True, average_attn_weights=True, batch_first=False)."""
    L, N, E = query.shape
    S = key.shape[0]
    assert E % num_heads == 0
    assert E % 128 == 0, "lane-dense per-batch blocking assumes E % 128 == 0"

    # Row-major flattens are free (no data movement, no XLA transpose).
    xq = query.reshape(L, N * E)
    xk = key.reshape(S, N * E)
    xv = value.reshape(S, N * E)

    out_flat, attn_weights = fused_mha_pallas(
        xq, xk, xv,
        params["in_proj_weight"],
        params["in_proj_bias"].reshape(1, 3 * E),
        params["out_proj_weight"],
        params["out_proj_bias"].reshape(1, E),
        num_heads=num_heads, batch=N, q_len=L, kv_len=S,
        out_dtype=query.dtype, matmul_dtype=matmul_dtype)

    return out_flat.reshape(L, N, E), attn_weights


# ----------------------------------------------------------------------------
# Deterministic parameter init (shapes from MultiheadAttention.__init__)
# ----------------------------------------------------------------------------
def xavier_uniform(rng, shape):
    fan_out, fan_in = shape
    bound = math.sqrt(6.0 / (fan_in + fan_out))
    return jax.random.uniform(rng, shape, jnp.float32, -bound, bound)


def init_params(rng, embed_dim):
    k1, k2 = jax.random.split(rng)
    return {
        "in_proj_weight": xavier_uniform(k1, (3 * embed_dim, embed_dim)),
        "in_proj_bias": jnp.zeros((3 * embed_dim,), jnp.float32),  # constant_(0.)
        "out_proj_weight": xavier_uniform(k2, (embed_dim, embed_dim)),
        "out_proj_bias": jnp.zeros((embed_dim,), jnp.float32),     # constant_(0.)
    }
    # TODO(synk): torch's out_proj uses kaiming_uniform default init; values
    # differ but shapes/semantics match and init is deterministic here.


# ----------------------------------------------------------------------------
# Pure-JAX reference for validation
# ----------------------------------------------------------------------------
def reference_mha(params, query, key, value, num_heads):
    L, N, E = query.shape
    S = key.shape[0]
    H, Dh = num_heads, E // num_heads
    w_in, b_in = params["in_proj_weight"], params["in_proj_bias"]
    q = query @ w_in[:E].T + b_in[:E]
    k = key @ w_in[E:2 * E].T + b_in[E:2 * E]
    v = value @ w_in[2 * E:].T + b_in[2 * E:]
    q = q.reshape(L, N, H, Dh).transpose(1, 2, 0, 3)
    k = k.reshape(S, N, H, Dh).transpose(1, 2, 0, 3)
    v = v.reshape(S, N, H, Dh).transpose(1, 2, 0, 3)
    s = jnp.einsum("nhld,nhsd->nhls", q, k) / math.sqrt(Dh)
    p = jax.nn.softmax(s, axis=-1)
    ctx = jnp.einsum("nhls,nhsd->nhld", p, v)
    ctx = ctx.transpose(2, 0, 1, 3).reshape(L, N, E)
    out = ctx @ params["out_proj_weight"].T + params["out_proj_bias"]
    return out, p.mean(axis=1)


if __name__ == "__main__":
    # TPU-native small shapes: E = L = S = 128 so all matmul operands,
    # reduction rows and both output stores are exactly 128 lanes wide.
    embed_dim, num_heads = 128, 4
    L, S, N = 128, 128, 2

    root = jax.random.PRNGKey(0)
    kp, kq, kk, kv = jax.random.split(root, 4)
    params = init_params(kp, embed_dim)

    query = jax.random.normal(kq, (L, N, embed_dim), jnp.float32)
    key = jax.random.normal(kk, (S, N, embed_dim), jnp.float32)
    value = jax.random.normal(kv, (S, N, embed_dim), jnp.float32)

    with jax.default_matmul_precision("highest"):
        ref_out, ref_w = reference_mha(params, query, key, value, num_heads)

    # f32 MXU operands: exact-parity gate (no approx-reciprocal anymore).
    fwd_f32 = jax.jit(functools.partial(multihead_attention_forward,
                                        num_heads=num_heads,
                                        matmul_dtype=jnp.float32))
    attn_out, attn_w = fwd_f32(params, query, key, value)
    jax.block_until_ready((attn_out, attn_w))

    assert attn_out.shape == (L, N, embed_dim)
    assert attn_w.shape == (N, L, S)
    assert jnp.allclose(attn_out, ref_out, atol=2e-3, rtol=2e-3)
    assert jnp.allclose(attn_w, ref_w, atol=2e-3, rtol=2e-3)

    # bf16 MXU operands with f32 accumulation (v6e/v7x production path).
    fwd_bf16 = jax.jit(functools.partial(multihead_attention_forward,
                                         num_heads=num_heads,
                                         matmul_dtype=jnp.bfloat16))
    attn_out_b, attn_w_b = fwd_bf16(params, query, key, value)
    jax.block_until_ready((attn_out_b, attn_w_b))

    assert jnp.allclose(attn_out_b, ref_out, atol=1e-2, rtol=5e-2)
    assert jnp.allclose(attn_w_b, ref_w, atol=1e-2, rtol=5e-2)

    print("KERNEL_OK")
</pallas_src>

<mosaic_0001>
module attributes {stable_mosaic.version = 11 : i64} {
  func.func @_mha_kernel(%arg0: i32, %arg1: memref<128x128xf32, #tpu.memory_space<vmem>>, %arg2: memref<128x128xf32, #tpu.memory_space<vmem>>, %arg3: memref<128x128xf32, #tpu.memory_space<vmem>>, %arg4: memref<384x128xf32, #tpu.memory_space<vmem>>, %arg5: memref<1x384xf32, #tpu.memory_space<vmem>>, %arg6: memref<128x128xf32, #tpu.memory_space<vmem>>, %arg7: memref<1x128xf32, #tpu.memory_space<vmem>>, %arg8: memref<128x128xf32, #tpu.memory_space<vmem>>, %arg9: memref<1x128x128xf32, #tpu.memory_space<vmem>>, %arg10: memref<128x128xf32, #tpu.memory_space<vmem>>, %arg11: memref<128x128xf32, #tpu.memory_space<vmem>>, %arg12: memref<128x128xf32, #tpu.memory_space<vmem>>, %arg13: memref<128x128xf32, #tpu.memory_space<vmem>>, %arg14: memref<128x128xf32, #tpu.memory_space<vmem>>) attributes {dimension_semantics = [#tpu.dimension_semantics<parallel>], iteration_bounds = array<i64: 2>, scalar_prefetch = 0 : i64, scratch_operands = 5 : i64, tpu.core_type = #tpu.core_type<tc>, window_params = [{transform_indices = @transform_0, window_bounds = array<i64: 128, 128>}, {transform_indices = @transform_1, window_bounds = array<i64: 128, 128>}, {transform_indices = @transform_2, window_bounds = array<i64: 128, 128>}, {pipeline_mode = #tpu.pipeline_mode<synchronous>, transform_indices = @transform_3, window_bounds = array<i64: 384, 128>}, {pipeline_mode = #tpu.pipeline_mode<synchronous>, transform_indices = @transform_4, window_bounds = array<i64: 1, 384>}, {pipeline_mode = #tpu.pipeline_mode<synchronous>, transform_indices = @transform_5, window_bounds = array<i64: 128, 128>}, {pipeline_mode = #tpu.pipeline_mode<synchronous>, transform_indices = @transform_6, window_bounds = array<i64: 1, 128>}, {transform_indices = @transform_7, window_bounds = array<i64: 128, 128>}, {transform_indices = @transform_8, window_bounds = array<i64: 1, 128, 128>}]} {
    %c0 = arith.constant 0 : index
    %c0_0 = arith.constant 0 : index
    %0 = vector.load %arg1[%c0, %c0_0] : memref<128x128xf32, #tpu.memory_space<vmem>>, vector<128x128xf32>
    %c0_1 = arith.constant 0 : index
    %c0_2 = arith.constant 0 : index
    %1 = vector.load %arg4[%c0_1, %c0_2] : memref<384x128xf32, #tpu.memory_space<vmem>>, vector<128x128xf32>
    %cst = arith.constant dense<0.000000e+00> : vector<128x128xf32>
    %2 = tpu.matmul %0, %1, %cst {dimension_numbers = #tpu.dot_dimension_numbers<[1], [1], [0], [0], [0, 0, 1, 0], [], []>} : vector<128x128xf32>, vector<128x128xf32>, vector<128x128xf32> -> vector<128x128xf32>
    %c0_3 = arith.constant 0 : index
    %c0_4 = arith.constant 0 : index
    %3 = vector.load %arg5[%c0_3, %c0_4] : memref<1x384xf32, #tpu.memory_space<vmem>>, vector<1x128xf32>
    %4 = vector.broadcast %3 : vector<1x128xf32> to vector<128x128xf32>
    %5 = arith.addf %2, %4 : vector<128x128xf32>
    %cst_5 = arith.constant 0.176776692 : f32
    %6 = vector.broadcast %cst_5 : f32 to vector<128x128xf32>
    %7 = arith.mulf %5, %6 : vector<128x128xf32>
    %c0_6 = arith.constant 0 : index
    %c0_7 = arith.constant 0 : index
    %8 = vector.load %arg10[%c0_6, %c0_7] : memref<128x128xf32, #tpu.memory_space<vmem>>, vector<128x128xf32>
    tpu.vector_store %arg10[%c0_6, %c0_7], %7 {strides = array<i32>} : memref<128x128xf32, #tpu.memory_space<vmem>>, vector<128x128xf32>,
    %c0_8 = arith.constant 0 : index
    %c0_9 = arith.constant 0 : index
    %9 = vector.load %arg2[%c0_8, %c0_9] : memref<128x128xf32, #tpu.memory_space<vmem>>, vector<128x128xf32>
    %c128 = arith.constant 128 : index
    %c0_10 = arith.constant 0 : index
    %10 = vector.load %arg4[%c128, %c0_10] : memref<384x128xf32, #tpu.memory_space<vmem>>, vector<128x128xf32>
    %cst_11 = arith.constant dense<0.000000e+00> : vector<128x128xf32>
    %11 = tpu.matmul %9, %10, %cst_11 {dimension_numbers = #tpu.dot_dimension_numbers<[1], [1], [0], [0], [0, 0, 1, 0], [], []>} : vector<128x128xf32>, vector<128x128xf32>, vector<128x128xf32> -> vector<128x128xf32>
    %c0_12 = arith.constant 0 : index
    %c128_13 = arith.constant 128 : index
    %12 = vector.load %arg5[%c0_12, %c128_13] : memref<1x384xf32, #tpu.memory_space<vmem>>, vector<1x128xf32>
    %13 = vector.broadcast %12 : vector<1x128xf32> to vector<128x128xf32>
    %14 = arith.addf %11, %13 : vector<128x128xf32>
    %c0_14 = arith.constant 0 : index
    %c0_15 = arith.constant 0 : index
    %15 = vector.load %arg11[%c0_14, %c0_15] : memref<128x128xf32, #tpu.memory_space<vmem>>, vector<128x128xf32>
    tpu.vector_store %arg11[%c0_14, %c0_15], %14 {strides = array<i32>} : memref<128x128xf32, #tpu.memory_space<vmem>>, vector<128x128xf32>,
    %c0_16 = arith.constant 0 : index
    %c0_17 = arith.constant 0 : index
    %16 = vector.load %arg3[%c0_16, %c0_17] : memref<128x128xf32, #tpu.memory_space<vmem>>, vector<128x128xf32>
    %c256 = arith.constant 256 : index
    %c0_18 = arith.constant 0 : index
    %17 = vector.load %arg4[%c256, %c0_18] : memref<384x128xf32, #tpu.memory_space<vmem>>, vector<128x128xf32>
    %cst_19 = arith.constant dense<0.000000e+00> : vector<128x128xf32>
    %18 = tpu.matmul %16, %17, %cst_19 {dimension_numbers = #tpu.dot_dimension_numbers<[1], [1], [0], [0], [0, 0, 1, 0], [], []>} : vector<128x128xf32>, vector<128x128xf32>, vector<128x128xf32> -> vector<128x128xf32>
    %c0_20 = arith.constant 0 : index
    %c256_21 = arith.constant 256 : index
    %19 = vector.load %arg5[%c0_20, %c256_21] : memref<1x384xf32, #tpu.memory_space<vmem>>, vector<1x128xf32>
    %20 = vector.broadcast %19 : vector<1x128xf32> to vector<128x128xf32>
    %21 = arith.addf %18, %20 : vector<128x128xf32>
    %c0_22 = arith.constant 0 : index
    %c0_23 = arith.constant 0 : index
    %22 = vector.load %arg12[%c0_22, %c0_23] : memref<128x128xf32, #tpu.memory_space<vmem>>, vector<128x128xf32>
    tpu.vector_store %arg12[%c0_22, %c0_23], %21 {strides = array<i32>} : memref<128x128xf32, #tpu.memory_space<vmem>>, vector<128x128xf32>,
    %cst_24 = arith.constant 0.000000e+00 : f32
    %23 = vector.broadcast %cst_24 : f32 to vector<128x128xf32>
    %c0_25 = arith.constant 0 : index
    %c0_26 = arith.constant 0 : index
    %24 = vector.load %arg14[%c0_25, %c0_26] : memref<128x128xf32, #tpu.memory_space<vmem>>, vector<128x128xf32>
    tpu.vector_store %arg14[%c0_25, %c0_26], %23 {strides = array<i32>} : memref<128x128xf32, #tpu.memory_space<vmem>>, vector<128x128xf32>,
    %c0_27 = arith.constant 0 : index
    %c0_28 = arith.constant 0 : index
    %25 = vector.load %arg10[%c0_27, %c0_28] : memref<128x128xf32, #tpu.memory_space<vmem>>, vector<128x32xf32>
    %c0_29 = arith.constant 0 : index
    %c0_30 = arith.constant 0 : index
    %26 = vector.load %arg11[%c0_29, %c0_30] : memref<128x128xf32, #tpu.memory_space<vmem>>, vector<128x32xf32>
    %c0_31 = arith.constant 0 : index
    %c0_32 = arith.constant 0 : index
    %27 = vector.load %arg12[%c0_31, %c0_32] : memref<128x128xf32, #tpu.memory_space<vmem>>, vector<128x32xf32>
    %cst_33 = arith.constant dense<0.000000e+00> : vector<128x128xf32>
    %28 = tpu.matmul %25, %26, %cst_33 {dimension_numbers = #tpu.dot_dimension_numbers<[1], [1], [0], [0], [0, 0, 1, 0], [], []>} : vector<128x32xf32>, vector<128x32xf32>, vector<128x128xf32> -> vector<128x128xf32>
    %cst_34 = arith.constant dense<0xFF800000> : vector<128xf32>
    %29 = vector.multi_reduction <maximumf>, %28, %cst_34 [1] : vector<128x128xf32> to vector<128xf32>
    %30 = vector.shape_cast %29 : vector<128xf32> to vector<128x1xf32>
    %31 = vector.broadcast %30 : vector<128x1xf32> to vector<128x128xf32>
    %32 = arith.subf %28, %31 : vector<128x128xf32>
    %33 = math.exp %32 : vector<128x128xf32>
    %cst_35 = arith.constant dense<0.000000e+00> : vector<128xf32>
    %34 = vector.multi_reduction <add>, %33, %cst_35 [1] : vector<128x128xf32> to vector<128xf32>
    %35 = vector.shape_cast %34 : vector<128xf32> to vector<128x1xf32>
    %cst_36 = arith.constant 1.000000e+00 : f32
    %36 = vector.broadcast %cst_36 : f32 to vector<128x1xf32>
    %37 = arith.divf %36, %35 : vector<128x1xf32>
    %cst_37 = arith.constant dense<0.000000e+00> : vector<128x32xf32>
    %38 = tpu.matmul %33, %27, %cst_37 {dimension_numbers = #tpu.dot_dimension_numbers<[1], [0], [0], [1], [0, 0, 1, 1], [], []>} : vector<128x128xf32>, vector<128x32xf32>, vector<128x32xf32> -> vector<128x32xf32>
    %39 = vector.broadcast %37 : vector<128x1xf32> to vector<128x32xf32>
    %40 = arith.mulf %38, %39 : vector<128x32xf32>
    %c0_38 = arith.constant 0 : index
    %c0_39 = arith.constant 0 : index
    %41 = vector.load %arg13[%c0_38, %c0_39] : memref<128x128xf32, #tpu.memory_space<vmem>>, vector<128x32xf32>
    tpu.vector_store %arg13[%c0_38, %c0_39], %40 {strides = array<i32>} : memref<128x128xf32, #tpu.memory_space<vmem>>, vector<128x32xf32>,
    %c0_40 = arith.constant 0 : index
    %c0_41 = arith.constant 0 : index
    %42 = vector.load %arg14[%c0_40, %c0_41] : memref<128x128xf32, #tpu.memory_space<vmem>>, vector<128x128xf32>
    %43 = vector.broadcast %37 : vector<128x1xf32> to vector<128x128xf32>
    %44 = arith.mulf %33, %43 : vector<128x128xf32>
    %45 = arith.addf %42, %44 : vector<128x128xf32>
    %c0_42 = arith.constant 0 : index
    %c0_43 = arith.constant 0 : index
    %46 = vector.load %arg14[%c0_42, %c0_43] : memref<128x128xf32, #tpu.memory_space<vmem>>, vector<128x128xf32>
    tpu.vector_store %arg14[%c0_42, %c0_43], %45 {strides = array<i32>} : memref<128x128xf32, #tpu.memory_space<vmem>>, vector<128x128xf32>,
    %c0_44 = arith.constant 0 : index
    %c32 = arith.constant 32 : index
    %47 = vector.load %arg10[%c0_44, %c32] : memref<128x128xf32, #tpu.memory_space<vmem>>, vector<128x32xf32>
    %c0_45 = arith.constant 0 : index
    %c32_46 = arith.constant 32 : index
    %48 = vector.load %arg11[%c0_45, %c32_46] : memref<128x128xf32, #tpu.memory_space<vmem>>, vector<128x32xf32>
    %c0_47 = arith.constant 0 : index
    %c32_48 = arith.constant 32 : index
    %49 = vector.load %arg12[%c0_47, %c32_48] : memref<128x128xf32, #tpu.memory_space<vmem>>, vector<128x32xf32>
    %cst_49 = arith.constant dense<0.000000e+00> : vector<128x128xf32>
    %50 = tpu.matmul %47, %48, %cst_49 {dimension_numbers = #tpu.dot_dimension_numbers<[1], [1], [0], [0], [0, 0, 1, 0], [], []>} : vector<128x32xf32>, vector<128x32xf32>, vector<128x128xf32> -> vector<128x128xf32>
    %cst_50 = arith.constant dense<0xFF800000> : vector<128xf32>
    %51 = vector.multi_reduction <maximumf>, %50, %cst_50 [1] : vector<128x128xf32> to vector<128xf32>
    %52 = vector.shape_cast %51 : vector<128xf32> to vector<128x1xf32>
    %53 = vector.broadcast %52 : vector<128x1xf32> to vector<128x128xf32>
    %54 = arith.subf %50, %53 : vector<128x128xf32>
    %55 = math.exp %54 : vector<128x128xf32>
    %cst_51 = arith.constant dense<0.000000e+00> : vector<128xf32>
    %56 = vector.multi_reduction <add>, %55, %cst_51 [1] : vector<128x128xf32> to vector<128xf32>
    %57 = vector.shape_cast %56 : vector<128xf32> to vector<128x1xf32>
    %cst_52 = arith.constant 1.000000e+00 : f32
    %58 = vector.broadcast %cst_52 : f32 to vector<128x1xf32>
    %59 = arith.divf %58, %57 : vector<128x1xf32>
    %cst_53 = arith.constant dense<0.000000e+00> : vector<128x32xf32>
    %60 = tpu.matmul %55, %49, %cst_53 {dimension_numbers = #tpu.dot_dimension_numbers<[1], [0], [0], [1], [0, 0, 1, 1], [], []>} : vector<128x128xf32>, vector<128x32xf32>, vector<128x32xf32> -> vector<128x32xf32>
    %61 = vector.broadcast %59 : vector<128x1xf32> to vector<128x32xf32>
    %62 = arith.mulf %60, %61 : vector<128x32xf32>
    %c0_54 = arith.constant 0 : index
    %c32_55 = arith.constant 32 : index
    %63 = vector.load %arg13[%c0_54, %c32_55] : memref<128x128xf32, #tpu.memory_space<vmem>>, vector<128x32xf32>
    tpu.vector_store %arg13[%c0_54, %c32_55], %62 {strides = array<i32>} : memref<128x128xf32, #tpu.memory_space<vmem>>, vector<128x32xf32>,
    %c0_56 = arith.constant 0 : index
    %c0_57 = arith.constant 0 : index
    %64 = vector.load %arg14[%c0_56, %c0_57] : memref<128x128xf32, #tpu.memory_space<vmem>>, vector<128x128xf32>
    %65 = vector.broadcast %59 : vector<128x1xf32> to vector<128x128xf32>
    %66 = arith.mulf %55, %65 : vector<128x128xf32>
    %67 = arith.addf %64, %66 : vector<128x128xf32>
    %c0_58 = arith.constant 0 : index
    %c0_59 = arith.constant 0 : index
    %68 = vector.load %arg14[%c0_58, %c0_59] : memref<128x128xf32, #tpu.memory_space<vmem>>, vector<128x128xf32>
    tpu.vector_store %arg14[%c0_58, %c0_59], %67 {strides = array<i32>} : memref<128x128xf32, #tpu.memory_space<vmem>>, vector<128x128xf32>,
    %c0_60 = arith.constant 0 : index
    %c64 = arith.constant 64 : index
    %69 = vector.load %arg10[%c0_60, %c64] : memref<128x128xf32, #tpu.memory_space<vmem>>, vector<128x32xf32>
    %c0_61 = arith.constant 0 : index
    %c64_62 = arith.constant 64 : index
    %70 = vector.load %arg11[%c0_61, %c64_62] : memref<128x128xf32, #tpu.memory_space<vmem>>, vector<128x32xf32>
    %c0_63 = arith.constant 0 : index
    %c64_64 = arith.constant 64 : index
    %71 = vector.load %arg12[%c0_63, %c64_64] : memref<128x128xf32, #tpu.memory_space<vmem>>, vector<128x32xf32>
    %cst_65 = arith.constant dense<0.000000e+00> : vector<128x128xf32>
    %72 = tpu.matmul %69, %70, %cst_65 {dimension_numbers = #tpu.dot_dimension_numbers<[1], [1], [0], [0], [0, 0, 1, 0], [], []>} : vector<128x32xf32>, vector<128x32xf32>, vector<128x128xf32> -> vector<128x128xf32>
    %cst_66 = arith.constant dense<0xFF800000> : vector<128xf32>
    %73 = vector.multi_reduction <maximumf>, %72, %cst_66 [1] : vector<128x128xf32> to vector<128xf32>
    %74 = vector.shape_cast %73 : vector<128xf32> to vector<128x1xf32>
    %75 = vector.broadcast %74 : vector<128x1xf32> to vector<128x128xf32>
    %76 = arith.subf %72, %75 : vector<128x128xf32>
    %77 = math.exp %76 : vector<128x128xf32>
    %cst_67 = arith.constant dense<0.000000e+00> : vector<128xf32>
    %78 = vector.multi_reduction <add>, %77, %cst_67 [1] : vector<128x128xf32> to vector<128xf32>
    %79 = vector.shape_cast %78 : vector<128xf32> to vector<128x1xf32>
    %cst_68 = arith.constant 1.000000e+00 : f32
    %80 = vector.broadcast %cst_68 : f32 to vector<128x1xf32>
    %81 = arith.divf %80, %79 : vector<128x1xf32>
    %cst_69 = arith.constant dense<0.000000e+00> : vector<128x32xf32>
    %82 = tpu.matmul %77, %71, %cst_69 {dimension_numbers = #tpu.dot_dimension_numbers<[1], [0], [0], [1], [0, 0, 1, 1], [], []>} : vector<128x128xf32>, vector<128x32xf32>, vector<128x32xf32> -> vector<128x32xf32>
    %83 = vector.broadcast %81 : vector<128x1xf32> to vector<128x32xf32>
    %84 = arith.mulf %82, %83 : vector<128x32xf32>
    %c0_70 = arith.constant 0 : index
    %c64_71 = arith.constant 64 : index
    %85 = vector.load %arg13[%c0_70, %c64_71] : memref<128x128xf32, #tpu.memory_space<vmem>>, vector<128x32xf32>
    tpu.vector_store %arg13[%c0_70, %c64_71], %84 {strides = array<i32>} : memref<128x128xf32, #tpu.memory_space<vmem>>, vector<128x32xf32>,
    %c0_72 = arith.constant 0 : index
    %c0_73 = arith.constant 0 : index
    %86 = vector.load %arg14[%c0_72, %c0_73] : memref<128x128xf32, #tpu.memory_space<vmem>>, vector<128x128xf32>
    %87 = vector.broadcast %81 : vector<128x1xf32> to vector<128x128xf32>
    %88 = arith.mulf %77, %87 : vector<128x128xf32>
    %89 = arith.addf %86, %88 : vector<128x128xf32>
    %c0_74 = arith.constant 0 : index
    %c0_75 = arith.constant 0 : index
    %90 = vector.load %arg14[%c0_74, %c0_75] : memref<128x128xf32, #tpu.memory_space<vmem>>, vector<128x128xf32>
    tpu.vector_store %arg14[%c0_74, %c0_75], %89 {strides = array<i32>} : memref<128x128xf32, #tpu.memory_space<vmem>>, vector<128x128xf32>,
    %c0_76 = arith.constant 0 : index
    %c96 = arith.constant 96 : index
    %91 = vector.load %arg10[%c0_76, %c96] : memref<128x128xf32, #tpu.memory_space<vmem>>, vector<128x32xf32>
    %c0_77 = arith.constant 0 : index
    %c96_78 = arith.constant 96 : index
    %92 = vector.load %arg11[%c0_77, %c96_78] : memref<128x128xf32, #tpu.memory_space<vmem>>, vector<128x32xf32>
    %c0_79 = arith.constant 0 : index
    %c96_80 = arith.constant 96 : index
    %93 = vector.load %arg12[%c0_79, %c96_80] : memref<128x128xf32, #tpu.memory_space<vmem>>, vector<128x32xf32>
    %cst_81 = arith.constant dense<0.000000e+00> : vector<128x128xf32>
    %94 = tpu.matmul %91, %92, %cst_81 {dimension_numbers = #tpu.dot_dimension_numbers<[1], [1], [0], [0], [0, 0, 1, 0], [], []>} : vector<128x32xf32>, vector<128x32xf32>, vector<128x128xf32> -> vector<128x128xf32>
    %cst_82 = arith.constant dense<0xFF800000> : vector<128xf32>
    %95 = vector.multi_reduction <maximumf>, %94, %cst_82 [1] : vector<128x128xf32> to vector<128xf32>
    %96 = vector.shape_cast %95 : vector<128xf32> to vector<128x1xf32>
    %97 = vector.broadcast %96 : vector<128x1xf32> to vector<128x128xf32>
    %98 = arith.subf %94, %97 : vector<128x128xf32>
    %99 = math.exp %98 : vector<128x128xf32>
    %cst_83 = arith.constant dense<0.000000e+00> : vector<128xf32>
    %100 = vector.multi_reduction <add>, %99, %cst_83 [1] : vector<128x128xf32> to vector<128xf32>
    %101 = vector.shape_cast %100 : vector<128xf32> to vector<128x1xf32>
    %cst_84 = arith.constant 1.000000e+00 : f32
    %102 = vector.broadcast %cst_84 : f32 to vector<128x1xf32>
    %103 = arith.divf %102, %101 : vector<128x1xf32>
    %cst_85 = arith.constant dense<0.000000e+00> : vector<128x32xf32>
    %104 = tpu.matmul %99, %93, %cst_85 {dimension_numbers = #tpu.dot_dimension_numbers<[1], [0], [0], [1], [0, 0, 1, 1], [], []>} : vector<128x128xf32>, vector<128x32xf32>, vector<128x32xf32> -> vector<128x32xf32>
    %105 = vector.broadcast %103 : vector<128x1xf32> to vector<128x32xf32>
    %106 = arith.mulf %104, %105 : vector<128x32xf32>
    %c0_86 = arith.constant 0 : index
    %c96_87 = arith.constant 96 : index
    %107 = vector.load %arg13[%c0_86, %c96_87] : memref<128x128xf32, #tpu.memory_space<vmem>>, vector<128x32xf32>
    tpu.vector_store %arg13[%c0_86, %c96_87], %106 {strides = array<i32>} : memref<128x128xf32, #tpu.memory_space<vmem>>, vector<128x32xf32>,
    %c0_88 = arith.constant 0 : index
    %c0_89 = arith.constant 0 : index
    %108 = vector.load %arg14[%c0_88, %c0_89] : memref<128x128xf32, #tpu.memory_space<vmem>>, vector<128x128xf32>
    %109 = vector.broadcast %103 : vector<128x1xf32> to vector<128x128xf32>
    %110 = arith.mulf %99, %109 : vector<128x128xf32>
    %111 = arith.addf %108, %110 : vector<128x128xf32>
    %c0_90 = arith.constant 0 : index
    %c0_91 = arith.constant 0 : index
    %112 = vector.load %arg14[%c0_90, %c0_91] : memref<128x128xf32, #tpu.memory_space<vmem>>, vector<128x128xf32>
    tpu.vector_store %arg14[%c0_90, %c0_91], %111 {strides = array<i32>} : memref<128x128xf32, #tpu.memory_space<vmem>>, vector<128x128xf32>,
    %c0_92 = arith.constant 0 : index
    %c0_93 = arith.constant 0 : index
    %113 = vector.load %arg13[%c0_92, %c0_93] : memref<128x128xf32, #tpu.memory_space<vmem>>, vector<128x128xf32>
    %c0_94 = arith.constant 0 : index
    %c0_95 = arith.constant 0 : index
    %114 = vector.load %arg6[%c0_94, %c0_95] : memref<128x128xf32, #tpu.memory_space<vmem>>, vector<128x128xf32>
    %cst_96 = arith.constant dense<0.000000e+00> : vector<128x128xf32>
    %115 = tpu.matmul %113, %114, %cst_96 {dimension_numbers = #tpu.dot_dimension_numbers<[1], [1], [0], [0], [0, 0, 1, 0], [], []>} : vector<128x128xf32>, vector<128x128xf32>, vector<128x128xf32> -> vector<128x128xf32>
    %c0_97 = arith.constant 0 : index
    %c0_98 = arith.constant 0 : index
    %116 = vector.load %arg7[%c0_97, %c0_98] : memref<1x128xf32, #tpu.memory_space<vmem>>, vector<1x128xf32>
    %117 = vector.broadcast %116 : vector<1x128xf32> to vector<128x128xf32>
    %118 = arith.addf %115, %117 : vector<128x128xf32>
    %c0_99 = arith.constant 0 : index
    %c0_100 = arith.constant 0 : index
    %119 = vector.load %arg8[%c0_99, %c0_100] : memref<128x128xf32, #tpu.memory_space<vmem>>, vector<128x128xf32>
    tpu.vector_store %arg8[%c0_99, %c0_100], %118 {strides = array<i32>} : memref<128x128xf32, #tpu.memory_space<vmem>>, vector<128x128xf32>,
    %c0_101 = arith.constant 0 : index
    %c0_102 = arith.constant 0 : index
    %120 = vector.load %arg14[%c0_101, %c0_102] : memref<128x128xf32, #tpu.memory_space<vmem>>, vector<128x128xf32>
    %cst_103 = arith.constant 2.500000e-01 : f32
    %121 = vector.broadcast %cst_103 : f32 to vector<128x128xf32>
    %122 = arith.mulf %120, %121 : vector<128x128xf32>
    %123 = vector.shape_cast %122 : vector<128x128xf32> to vector<1x128x128xf32>
    %c0_104 = arith.constant 0 : index
    %c0_105 = arith.constant 0 : index
    %c0_106 = arith.constant 0 : index
    %124 = vector.load %arg9[%c0_104, %c0_105, %c0_106] : memref<1x128x128xf32, #tpu.memory_space<vmem>>, vector<1x128x128xf32>
    tpu.vector_store %arg9[%c0_104, %c0_105, %c0_106], %123 {strides = array<i32>} : memref<1x128x128xf32, #tpu.memory_space<vmem>>, vector<1x128x128xf32>,
    return
  }
  func.func @transform_0(%arg0: i32) -> (i32, i32) {
    %c0_i32 = arith.constant 0 : i32
    %c0_i32_0 = arith.constant 0 : i32
    return %c0_i32, %arg0 : i32, i32
  }
  func.func @transform_1(%arg0: i32) -> (i32, i32) {
    %c0_i32 = arith.constant 0 : i32
    %c0_i32_0 = arith.constant 0 : i32
    return %c0_i32, %arg0 : i32, i32
  }
  func.func @transform_2(%arg0: i32) -> (i32, i32) {
    %c0_i32 = arith.constant 0 : i32
    %c0_i32_0 = arith.constant 0 : i32
    return %c0_i32, %arg0 : i32, i32
  }
  func.func @transform_3(%arg0: i32) -> (i32, i32) {
    %c0_i32 = arith.constant 0 : i32
    %c0_i32_0 = arith.constant 0 : i32
    %c0_i32_1 = arith.constant 0 : i32
    return %c0_i32, %c0_i32_0 : i32, i32
  }
  func.func @transform_4(%arg0: i32) -> (i32, i32) {
    %c0_i32 = arith.constant 0 : i32
    %c0_i32_0 = arith.constant 0 : i32
    %c0_i32_1 = arith.constant 0 : i32
    return %c0_i32, %c0_i32_0 : i32, i32
  }
  func.func @transform_5(%arg0: i32) -> (i32, i32) {
    %c0_i32 = arith.constant 0 : i32
    %c0_i32_0 = arith.constant 0 : i32
    %c0_i32_1 = arith.constant 0 : i32
    return %c0_i32, %c0_i32_0 : i32, i32
  }
  func.func @transform_6(%arg0: i32) -> (i32, i32) {
    %c0_i32 = arith.constant 0 : i32
    %c0_i32_0 = arith.constant 0 : i32
    %c0_i32_1 = arith.constant 0 : i32
    return %c0_i32, %c0_i32_0 : i32, i32
  }
  func.func @transform_7(%arg0: i32) -> (i32, i32) {
    %c0_i32 = arith.constant 0 : i32
    %c0_i32_0 = arith.constant 0 : i32
    return %c0_i32, %arg0 : i32, i32
  }
  func.func @transform_8(%arg0: i32) -> (i32, i32, i32) {
    %c0_i32 = arith.constant 0 : i32
    %c0_i32_0 = arith.constant 0 : i32
    %c0_i32_1 = arith.constant 0 : i32
    return %arg0, %c0_i32, %c0_i32_0 : i32, i32, i32
  }
}

</mosaic_0001>

<bundles_post_ra>
// kernel: multihead_attention_forward.1
= control target key start
LH: loop header
LB: loop body
LE: loop exit
PB: predicated region body
PF: predicated region fallthrough
CT: control target
= control target key end

     0   :  { %14 = vsyncpa [#allocation12], 0  ;;  %s9647_s0 = inlined_call_operand.vmem [shape: f32[128,256], index: 0, kind: input, shape index: {}]   ;;  %s9648_s1 = inlined_call_operand.vmem [shape: f32[128,256], index: 1, kind: input, shape index: {}]   ;;  %s9649_s2 = inlined_call_operand.vmem [shape: f32[128,256], index: 2, kind: input, shape index: {}]   ;;  %s9650_s3 = inlined_call_operand.vmem [shape: f32[384,128], index: 3, kind: input, shape index: {}]   ;;  %s9651_s4 = inlined_call_operand.vmem [shape: f32[1,384], index: 4, kind: input, shape index: {}]   ;;  %s9652_s5 = inlined_call_operand.vmem [shape: f32[128,128], index: 5, kind: input, shape index: {}]   ;;  %s9653_s6 = inlined_call_operand.vmem [shape: f32[1,128], index: 6, kind: input, shape index: {}]   ;;  %s9654_s7 = inlined_call_operand.vmem [shape: f32[128,256], index: 7, kind: output, shape index: {0}]   ;;  %s9655_s8 = inlined_call_operand.hbm [shape: f32[2,128,128], index: 8, kind: output, shape index: {1}]  }
   0x1   :  { %16 = vsyncpa [#allocation12 + $0x1], 0  ;;  %s7350_s27 = smov 0   ;;  %s7352_s28 = smov 0  }
   0x2   :  { %s7354_s29 = smov 0   ;;  %s7356_s30 = smov 0  }
   0x3 LB: > { %s7371_s9 = sadd.s32 4294967295, %s7297_s30   ;;  %s5036_s10 = sadd.s32 4294967294, %s7297_s30   ;;  %s7297_s30 = sphi %s7356_s30, %s9925_s30   ;;  %s7293_s29 = sphi %s7354_s29, %s9924_s29   ;;  %s7289_s28 = sphi %s7352_s28, %s9923_s28   ;;  %s7285_s27 = sphi %s7350_s27, %s9922_s27  }
   0x4   : > { %s7375_s11 = sadd.s32 1, %s7297_s30   ;;  %s29_s12 = sadd.s32 1, %s7293_s29 }
   0x5   : > { %s26_s13 = ssub.s32 %s7297_s30, %s7375_s11  ;;  %p36_p0 = scmp.ne.s32.totalorder %s7293_s29, %s7289_s28 }
   0x6   : > { %p27_p1 = scmp.eq.s32.totalorder %s26_s13, 0  ;;  %p37_p2 = scmp.eq.s32.totalorder %s7297_s30, 0 }
   0x7   : > { %p202_p3 = scmp.eq.s32.totalorder %s7371_s9, 1  ;;  %p233_p4 = scmp.ne.s32.totalorder %s7289_s28, %s7285_s27 }
   0x8   : > { %s7387_s14 = scalar_select %p27_p1, %s7293_s29, %s29_s12  }
   0x9   : > { %p7389_p5 = por %p37_p2, %p36_p0  ;;  %p7393_p6 = por %p202_p3, %p36_p0 }
   0xa   : > { %p234_p7 = scmp.eq.s32.totalorder %s5036_s10, 1  ;;  %p5038_p9 = scmp.ge.s32.totalorder %s7297_s30, 2 }
   0xc   : > { %p7397_p8 = por %p234_p7, %p233_p4  ;;  %262 = sbr.rel (%p5038_p9) target bundleno = 55 (0x37), region = 32 }
  0x13   : > { %265 = sbr.rel (!%p7389_p5) target bundleno = 31 (0x1f), region = 36  ;;  %s267_s18 = sand.u32 (%p7389_p5), 1, %s7293_s29  }
  0x14   : > { %s5040_s19 = sshll.u32 (%p7389_p5), %s7297_s30, 3  ;;  %s5039_s20 = sshll.u32 (%p7389_p5), %s267_s18, 7 }
  0x15   : > { %s7411_s23 = scalar_lea.vmem (%p7389_p5), %s9647_s0, %s5040_s19  ;;  %s269_s24 = scalar_lea.vmem (%p7389_p5), [#allocation7], %s5039_s20 }
  0x16   : > { %v329_v0 = vld [vmem:[%s7411_s23] sm:$0xff] (%p7389_p5)  ;;  %v331_v1 = vld [vmem:[%s7411_s23 + $0x10] sm:$0xff] (%p7389_p5) }
  0x17   : > { %v333_v2 = vld [vmem:[%s7411_s23 + $0x20] sm:$0xff] (%p7389_p5)  ;;  %330 = vst [vmem:[%s269_s24] sm:$0xff] (%p7389_p5), %v329_v0  ;;  %332 = vst [vmem:[%s269_s24 + $0x8] sm:$0xff] (%p7389_p5), %v331_v1  ;;  %v335_v3 = vld [vmem:[%s7411_s23 + $0x30] sm:$0xff] (%p7389_p5) }
  0x18   : > { %334 = vst [vmem:[%s269_s24 + $0x10] sm:$0xff] (%p7389_p5), %v333_v2  ;;  %v337_v4 = vld [vmem:[%s7411_s23 + $0x40] sm:$0xff] (%p7389_p5)  ;;  %v339_v5 = vld [vmem:[%s7411_s23 + $0x50] sm:$0xff] (%p7389_p5)  ;;  %336 = vst [vmem:[%s269_s24 + $0x18] sm:$0xff] (%p7389_p5), %v335_v3 }
  0x19   : > { %338 = vst [vmem:[%s269_s24 + $0x20] sm:$0xff] (%p7389_p5), %v337_v4  ;;  %340 = vst [vmem:[%s269_s24 + $0x28] sm:$0xff] (%p7389_p5), %v339_v5  ;;  %v341_v6 = vld [vmem:[%s7411_s23 + $0x60] sm:$0xff] (%p7389_p5)  ;;  %v343_v7 = vld [vmem:[%s7411_s23 + $0x70] sm:$0xff] (%p7389_p5) }
  0x1a   : > { %v345_v8 = vld [vmem:[%s7411_s23 + $0x80] sm:$0xff]  ;;  %342 = vst [vmem:[%s269_s24 + $0x30] sm:$0xff] %v341_v6  ;;  %344 = vst [vmem:[%s269_s24 + $0x38] sm:$0xff] %v343_v7  ;;  %v347_v9 = vld [vmem:[%s7411_s23 + $0x90] sm:$0xff] }
  0x1b   : > { %346 = vst [vmem:[%s269_s24 + $0x40] sm:$0xff] %v345_v8  ;;  %v349_v10 = vld [vmem:[%s7411_s23 + $0xa0] sm:$0xff]  ;;  %v351_v11 = vld [vmem:[%s7411_s23 + $0xb0] sm:$0xff]  ;;  %348 = vst [vmem:[%s269_s24 + $0x48] sm:$0xff] %v347_v9 }
  0x1c   : > { %350 = vst [vmem:[%s269_s24 + $0x50] sm:$0xff] %v349_v10  ;;  %352 = vst [vmem:[%s269_s24 + $0x58] sm:$0xff] %v351_v11  ;;  %v353_v12 = vld [vmem:[%s7411_s23 + $0xc0] sm:$0xff]  ;;  %v355_v13 = vld [vmem:[%s7411_s23 + $0xd0] sm:$0xff] }
  0x1d   : > { %v357_v14 = vld [vmem:[%s7411_s23 + $0xe0] sm:$0xff]  ;;  %354 = vst [vmem:[%s269_s24 + $0x60] sm:$0xff] %v353_v12  ;;  %356 = vst [vmem:[%s269_s24 + $0x68] sm:$0xff] %v355_v13  ;;  %v359_v15 = vld [vmem:[%s7411_s23 + $0xf0] sm:$0xff] }
  0x1e   : > { %358 = vst [vmem:[%s269_s24 + $0x70] sm:$0xff] %v357_v14  ;;  %360 = vst [vmem:[%s269_s24 + $0x78] sm:$0xff] %v359_v15 }
  0x1f PF: > { %366 = sbr.rel (!%p7389_p5) target bundleno = 43 (0x2b), region = 74  ;;  %s368_s25 = sand.u32 (%p7389_p5), 1, %s7293_s29  }
  0x20   : > { %s5042_s26 = sshll.u32 (%p7389_p5), %s7297_s30, 3  ;;  %s5041_s10 = sshll.u32 (%p7389_p5), %s368_s25, 7 }
  0x21   : > { %s7436_s18 = scalar_lea.vmem (%p7389_p5), %s9648_s1, %s5042_s26  ;;  %s370_s19 = scalar_lea.vmem (%p7389_p5), [#allocation8], %s5041_s10 }
  0x22   : > { %v430_v16 = vld [vmem:[%s7436_s18] sm:$0xff] (%p7389_p5)  ;;  %v432_v17 = vld [vmem:[%s7436_s18 + $0x10] sm:$0xff] (%p7389_p5) }
  0x23   : > { %v434_v18 = vld [vmem:[%s7436_s18 + $0x20] sm:$0xff] (%p7389_p5)  ;;  %431 = vst [vmem:[%s370_s19] sm:$0xff] (%p7389_p5), %v430_v16  ;;  %433 = vst [vmem:[%s370_s19 + $0x8] sm:$0xff] (%p7389_p5), %v432_v17  ;;  %v436_v19 = vld [vmem:[%s7436_s18 + $0x30] sm:$0xff] (%p7389_p5) }
  0x24   : > { %435 = vst [vmem:[%s370_s19 + $0x10] sm:$0xff] (%p7389_p5), %v434_v18  ;;  %v438_v20 = vld [vmem:[%s7436_s18 + $0x40] sm:$0xff] (%p7389_p5)  ;;  %v440_v21 = vld [vmem:[%s7436_s18 + $0x50] sm:$0xff] (%p7389_p5)  ;;  %437 = vst [vmem:[%s370_s19 + $0x18] sm:$0xff] (%p7389_p5), %v436_v19 }
  0x25   : > { %439 = vst [vmem:[%s370_s19 + $0x20] sm:$0xff] (%p7389_p5), %v438_v20  ;;  %441 = vst [vmem:[%s370_s19 + $0x28] sm:$0xff] (%p7389_p5), %v440_v21  ;;  %v442_v22 = vld [vmem:[%s7436_s18 + $0x60] sm:$0xff] (%p7389_p5)  ;;  %v444_v23 = vld [vmem:[%s7436_s18 + $0x70] sm:$0xff] (%p7389_p5) }
  0x26   : > { %v446_v24 = vld [vmem:[%s7436_s18 + $0x80] sm:$0xff]  ;;  %443 = vst [vmem:[%s370_s19 + $0x30] sm:$0xff] %v442_v22  ;;  %445 = vst [vmem:[%s370_s19 + $0x38] sm:$0xff] %v444_v23  ;;  %v448_v25 = vld [vmem:[%s7436_s18 + $0x90] sm:$0xff] }
  0x27   : > { %447 = vst [vmem:[%s370_s19 + $0x40] sm:$0xff] %v446_v24  ;;  %v450_v26 = vld [vmem:[%s7436_s18 + $0xa0] sm:$0xff]  ;;  %v452_v27 = vld [vmem:[%s7436_s18 + $0xb0] sm:$0xff]  ;;  %449 = vst [vmem:[%s370_s19 + $0x48] sm:$0xff] %v448_v25 }
  0x28   : > { %451 = vst [vmem:[%s370_s19 + $0x50] sm:$0xff] %v450_v26  ;;  %453 = vst [vmem:[%s370_s19 + $0x58] sm:$0xff] %v452_v27  ;;  %v454_v28 = vld [vmem:[%s7436_s18 + $0xc0] sm:$0xff]  ;;  %v456_v29 = vld [vmem:[%s7436_s18 + $0xd0] sm:$0xff] }
  0x29   : > { %v458_v30 = vld [vmem:[%s7436_s18 + $0xe0] sm:$0xff]  ;;  %455 = vst [vmem:[%s370_s19 + $0x60] sm:$0xff] %v454_v28  ;;  %457 = vst [vmem:[%s370_s19 + $0x68] sm:$0xff] %v456_v29  ;;  %v460_v31 = vld [vmem:[%s7436_s18 + $0xf0] sm:$0xff] }
  0x2a   : > { %459 = vst [vmem:[%s370_s19 + $0x70] sm:$0xff] %v458_v30  ;;  %461 = vst [vmem:[%s370_s19 + $0x78] sm:$0xff] %v460_v31 }
  0x2b PF: > { %467 = sbr.rel (!%p7389_p5) target bundleno = 55 (0x37), region = 112  ;;  %s469_s20 = sand.u32 (%p7389_p5), 1, %s7293_s29  }
  0x2c   : > { %s5044_s21 = sshll.u32 (%p7389_p5), %s7297_s30, 3  ;;  %s5043_s22 = sshll.u32 (%p7389_p5), %s469_s20, 7 }
  0x2d   : > { %s7461_s25 = scalar_lea.vmem (%p7389_p5), %s9649_s2, %s5044_s21  ;;  %s471_s15 = scalar_lea.vmem (%p7389_p5), [#allocation9], %s5043_s22 }
  0x2e   : > { %v531_v32 = vld [vmem:[%s7461_s25] sm:$0xff] (%p7389_p5)  ;;  %v533_v33 = vld [vmem:[%s7461_s25 + $0x10] sm:$0xff] (%p7389_p5) }
  0x2f   : > { %v535_v34 = vld [vmem:[%s7461_s25 + $0x20] sm:$0xff] (%p7389_p5)  ;;  %532 = vst [vmem:[%s471_s15] sm:$0xff] (%p7389_p5), %v531_v32  ;;  %534 = vst [vmem:[%s471_s15 + $0x8] sm:$0xff] (%p7389_p5), %v533_v33  ;;  %v537_v35 = vld [vmem:[%s7461_s25 + $0x30] sm:$0xff] (%p7389_p5) }
  0x30   : > { %536 = vst [vmem:[%s471_s15 + $0x10] sm:$0xff] (%p7389_p5), %v535_v34  ;;  %v539_v36 = vld [vmem:[%s7461_s25 + $0x40] sm:$0xff] (%p7389_p5)  ;;  %v541_v37 = vld [vmem:[%s7461_s25 + $0x50] sm:$0xff] (%p7389_p5)  ;;  %538 = vst [vmem:[%s471_s15 + $0x18] sm:$0xff] (%p7389_p5), %v537_v35 }
  0x31   : > { %540 = vst [vmem:[%s471_s15 + $0x20] sm:$0xff] (%p7389_p5), %v539_v36  ;;  %542 = vst [vmem:[%s471_s15 + $0x28] sm:$0xff] (%p7389_p5), %v541_v37  ;;  %v543_v38 = vld [vmem:[%s7461_s25 + $0x60] sm:$0xff] (%p7389_p5)  ;;  %v545_v39 = vld [vmem:[%s7461_s25 + $0x70] sm:$0xff] (%p7389_p5) }
  0x32   : > { %v547_v40 = vld [vmem:[%s7461_s25 + $0x80] sm:$0xff]  ;;  %544 = vst [vmem:[%s471_s15 + $0x30] sm:$0xff] %v543_v38  ;;  %546 = vst [vmem:[%s471_s15 + $0x38] sm:$0xff] %v545_v39  ;;  %v549_v41 = vld [vmem:[%s7461_s25 + $0x90] sm:$0xff] }
  0x33   : > { %548 = vst [vmem:[%s471_s15 + $0x40] sm:$0xff] %v547_v40  ;;  %v551_v42 = vld [vmem:[%s7461_s25 + $0xa0] sm:$0xff]  ;;  %v553_v43 = vld [vmem:[%s7461_s25 + $0xb0] sm:$0xff]  ;;  %550 = vst [vmem:[%s471_s15 + $0x48] sm:$0xff] %v549_v41 }
  0x34   : > { %552 = vst [vmem:[%s471_s15 + $0x50] sm:$0xff] %v551_v42  ;;  %554 = vst [vmem:[%s471_s15 + $0x58] sm:$0xff] %v553_v43  ;;  %v555_v44 = vld [vmem:[%s7461_s25 + $0xc0] sm:$0xff]  ;;  %v557_v45 = vld [vmem:[%s7461_s25 + $0xd0] sm:$0xff] }
  0x35   : > { %v559_v46 = vld [vmem:[%s7461_s25 + $0xe0] sm:$0xff]  ;;  %556 = vst [vmem:[%s471_s15 + $0x60] sm:$0xff] %v555_v44  ;;  %558 = vst [vmem:[%s471_s15 + $0x68] sm:$0xff] %v557_v45  ;;  %v561_v47 = vld [vmem:[%s7461_s25 + $0xf0] sm:$0xff] }
  0x36   : > { %560 = vst [vmem:[%s471_s15 + $0x70] sm:$0xff] %v559_v46  ;;  %562 = vst [vmem:[%s471_s15 + $0x78] sm:$0xff] %v561_v47 }
  0x37 PF: > { %p5045_p10 = scmp.ge.s32.totalorder %s7297_s30, 1  ;;  %p567_p11 = scmp.lt.s32.totalorder %s7297_s30, 3 }
  0x39   : > { %p568_p12 = pnand %p5045_p10, %p567_p11 }
  0x3b   : > { %571 = sbr.rel (%p568_p12) target bundleno = 2907 (0xb5b), region = 150 }
  0x42   : > { %v865_v48 = vld [vmem:[%s9650_s3 + $0x80] sm:$0xff]  ;;  %v866_v49 = vld [vmem:[%s9650_s3 + $0x88] sm:$0xff]  ;;  %v867_v50 = vld [vmem:[%s9650_s3 + $0x90] sm:$0xff]  ;;  %s574_s20 = sand.u32 1, %s7289_s28   ;;  %vm1313_vm0 = vcmask 261120   ;;  %s7300_s23 = smov 64  }
  0x43   : > { %v6279_v51 = vpack.c.bf16 %v866_v49, %v865_v48  ;;  %v868_v52 = vld [vmem:[%s9650_s3 + $0x98] sm:$0xff]  ;;  %v649_v54 = vld [vmem:[%s9650_s3] sm:$0xff]  ;;  %s7499_s25 = sshll.u32 %s574_s20, 7  ;;  %v650_v55 = vld [vmem:[%s9650_s3 + $0x8] sm:$0xff]  ;;  %s7301_s15 = smov 32   ;;  %vm2726_vm2 = vcmask 523520  }
  0x44   : > { %v6283_v53 = vpack.c.bf16 %v868_v52, %v867_v50  ;;  %v6247_v56 = vpack.c.bf16 %v650_v55, %v649_v54  ;;  %v651_v57 = vld [vmem:[%s9650_s3 + $0x10] sm:$0xff]  ;;  %v652_v58 = vld [vmem:[%s9650_s3 + $0x18] sm:$0xff]  ;;  %v869_v60 = vld [vmem:[%s9650_s3 + $0xa0] sm:$0xff]  ;;  %s7517_s24 = scalar_lea.vmem [#allocation8], %s7499_s25  ;;  %s7527_s13 = scalar_lea.vmem [#allocation7], %s7499_s25  ;;  %vm3593_vm3 = vcmask 785920  }
  0x45   : > { %6280 = vmatprep.subr.bf16.mxu1 %v6279_v51  ;;  %v6251_v59 = vpack.c.bf16 %v652_v58, %v651_v57  ;;  %v870_v61 = vld [vmem:[%s9650_s3 + $0xa8] sm:$0xff]  ;;  %v849_v62 = vld [vmem:[%s7517_s24] sm:$0xff]  ;;  %v871_v4 = vld [vmem:[%s9650_s3 + $0xb0] sm:$0xff]  ;;  %s7651_s26 = scalar_lea.vmem [#allocation9], %s7499_s25  ;;  %s9401_s18 = scalar_lea.vmem [#allocation11], %s7499_s25  ;;  %vm4460_vm4 = vcmask 1048320  }
  0x46   : > { %6282 = vmatpush3.bf16.xpose.msra.mxu1 %v6279_v51  ;;  %6248 = vmatprep.subr.bf16.mxu0 %v6247_v56  ;;  %v6287_v63 = vpack.c.bf16 %v870_v61, %v869_v60  ;;  %v653_v0 = vld [vmem:[%s9650_s3 + $0x20] sm:$0xff]  ;;  %v654_v1 = vld [vmem:[%s9650_s3 + $0x28] sm:$0xff]  ;;  %v872_v5 = vld [vmem:[%s9650_s3 + $0xb8] sm:$0xff]  ;;  %s5185_s22 = sshll.u32 (%p7393_p6), %s7371_s9, 3 }
  0x47   : > { %6284 = vmatprep.subr.bf16.mxu1 %v6283_v53  ;;  %6250 = vmatpush3.bf16.xpose.msra.mxu0 %v6247_v56  ;;  %v6255_v2 = vpack.c.bf16 %v654_v1, %v653_v0  ;;  %v633_v3 = vld [vmem:[%s7527_s13] sm:$0xff]  ;;  %v6291_v6 = vpack.c.bf16 %v872_v5, %v871_v4  ;;  %v655_v7 = vld [vmem:[%s9650_s3 + $0x30] sm:$0xff]  ;;  %v656_v8 = vld [vmem:[%s9650_s3 + $0x38] sm:$0xff]  ;;  %s4802_s12 = scalar_lea.vmem (%p7393_p6), %s9654_s7, %s5185_s22 }
  0x48   : > { %6252 = vmatprep.subr.bf16.mxu0 %v6251_v59  ;;  %5663 = vmatprep.mubr.f32.mxu1 %v849_v62  ;;  %v6259_v9 = vpack.c.bf16 %v656_v8, %v655_v7  ;;  %v873_v10 = vld [vmem:[%s9650_s3 + $0xc0] sm:$0xff]  ;;  %v874_v11 = vld [vmem:[%s9650_s3 + $0xc8] sm:$0xff]  ;;  %v875_v16 = vld [vmem:[%s9650_s3 + $0xd0] sm:$0xff] }
  0x49   : > { %5607 = vmatprep.mubr.f32.mxu0 %v633_v3  ;;  %v6295_v12 = vpack.c.bf16 %v874_v11, %v873_v10  ;;  %v657_v13 = vld [vmem:[%s9650_s3 + $0x40] sm:$0xff]  ;;  %v658_v14 = vld [vmem:[%s9650_s3 + $0x48] sm:$0xff]  ;;  %v876_v17 = vld [vmem:[%s9650_s3 + $0xd8] sm:$0xff] }
  0x4a   : > { %v6263_v15 = vpack.c.bf16 %v658_v14, %v657_v13  ;;  %v6299_v18 = vpack.c.bf16 %v876_v17, %v875_v16  ;;  %v659_v19 = vld [vmem:[%s9650_s3 + $0x50] sm:$0xff]  ;;  %v660_v20 = vld [vmem:[%s9650_s3 + $0x58] sm:$0xff]  ;;  %v877_v22 = vld [vmem:[%s9650_s3 + $0xe0] sm:$0xff] }
  0x4b   : > { %v6267_v21 = vpack.c.bf16 %v660_v20, %v659_v19  ;;  %v878_v23 = vld [vmem:[%s9650_s3 + $0xe8] sm:$0xff]  ;;  %v661_v25 = vld [vmem:[%s9650_s3 + $0x60] sm:$0xff]  ;;  %v879_v28 = vld [vmem:[%s9650_s3 + $0xf0] sm:$0xff] }
  0x4c   : > { %v6303_v24 = vpack.c.bf16 %v878_v23, %v877_v22  ;;  %v662_v26 = vld [vmem:[%s9650_s3 + $0x68] sm:$0xff]  ;;  %v880_v29 = vld [vmem:[%s9650_s3 + $0xf8] sm:$0xff]  ;;  %v663_v31 = vld [vmem:[%s9650_s3 + $0x70] sm:$0xff] }
  0x4d   : > { %v6271_v27 = vpack.c.bf16 %v662_v26, %v661_v25  ;;  %v6307_v30 = vpack.c.bf16 %v880_v29, %v879_v28  ;;  %v664_v32 = vld [vmem:[%s9650_s3 + $0x78] sm:$0xff]  ;;  %v1065_v34 = vld [vmem:[%s9650_s3 + $0x100] sm:$0xff]  ;;  %v1066_v35 = vld [vmem:[%s9650_s3 + $0x108] sm:$0xff] }
  0x4e   : > { %6286 = vmatpush3.bf16.xpose.msra.mxu1 %v6283_v53  ;;  %v6275_v33 = vpack.c.bf16 %v664_v32, %v663_v31  ;;  %v6311_v36 = vpack.c.bf16 %v1066_v35, %v1065_v34  ;;  %v850_v37 = vld [vmem:[%s7517_s24 + $0x8] sm:$0xff]  ;;  %v851_v38 = vld [vmem:[%s7517_s24 + $0x10] sm:$0xff]  ;;  %v1068_v40 = vld [vmem:[%s9650_s3 + $0x118] sm:$0xff] }
  0x4f   : > { %6288 = vmatprep.subr.bf16.mxu1 %v6287_v63  ;;  %6254 = vmatpush3.bf16.xpose.msra.mxu0 %v6251_v59  ;;  %v1067_v39 = vld [vmem:[%s9650_s3 + $0x110] sm:$0xff]  ;;  %v634_v41 = vld [vmem:[%s7527_s13 + $0x8] sm:$0xff]  ;;  %v852_v42 = vld [vmem:[%s7517_s24 + $0x18] sm:$0xff] }
  0x50   : > { %6256 = vmatprep.subr.bf16.mxu0 %v6255_v2  ;;  %v6315_v43 = vpack.c.bf16 %v1068_v40, %v1067_v39  ;;  %v853_v44 = vld [vmem:[%s7517_s24 + $0x20] sm:$0xff]  ;;  %v635_v45 = vld [vmem:[%s7527_s13 + $0x10] sm:$0xff]  ;;  %v636_v46 = vld [vmem:[%s7527_s13 + $0x18] sm:$0xff] }
  0x51   : > { %v854_v47 = vld [vmem:[%s7517_s24 + $0x28] sm:$0xff]  ;;  %v637_v48 = vld [vmem:[%s7527_s13 + $0x20] sm:$0xff]  ;;  %v855_v49 = vld [vmem:[%s7517_s24 + $0x30] sm:$0xff] }
  0x52   : > { %v1069_v50 = vld [vmem:[%s9650_s3 + $0x120] sm:$0xff]  ;;  %v1070_v51 = vld [vmem:[%s9650_s3 + $0x128] sm:$0xff]  ;;  %v856_v53 = vld [vmem:[%s7517_s24 + $0x38] sm:$0xff] }
  0x53   : > { %v638_v52 = vld [vmem:[%s7527_s13 + $0x28] sm:$0xff]  ;;  %v6319_v54 = vpack.c.bf16 %v1070_v51, %v1069_v50  ;;  %v857_v55 = vld [vmem:[%s7517_s24 + $0x40] sm:$0xff]  ;;  %v639_v56 = vld [vmem:[%s7527_s13 + $0x30] sm:$0xff] }
  0x54   : > { %v640_v57 = vld [vmem:[%s7527_s13 + $0x38] sm:$0xff]  ;;  %v858_v58 = vld [vmem:[%s7517_s24 + $0x48] sm:$0xff]  ;;  %v641_v59 = vld [vmem:[%s7527_s13 + $0x40] sm:$0xff] }
  0x55   : > { %v859_v60 = vld [vmem:[%s7517_s24 + $0x50] sm:$0xff]  ;;  %v1072_v62 = vld [vmem:[%s9650_s3 + $0x138] sm:$0xff]  ;;  %v862_v5 = vld [vmem:[%s7517_s24 + $0x68] sm:$0xff] }
  0x56   : > { %6290 = vmatpush3.bf16.xpose.msra.mxu1 %v6287_v63  ;;  %v1071_v61 = vld [vmem:[%s9650_s3 + $0x130] sm:$0xff]  ;;  %v642_v63 = vld [vmem:[%s7527_s13 + $0x48] sm:$0xff]  ;;  %v860_v0 = vld [vmem:[%s7517_s24 + $0x58] sm:$0xff] }
  0x57   : > { %6292 = vmatprep.subr.bf16.mxu1 %v6291_v6  ;;  %6258 = vmatpush3.bf16.xpose.msra.mxu0 %v6255_v2  ;;  %v6323_v1 = vpack.c.bf16 %v1072_v62, %v1071_v61  ;;  %v861_v2 = vld [vmem:[%s7517_s24 + $0x60] sm:$0xff]  ;;  %v643_v3 = vld [vmem:[%s7527_s13 + $0x50] sm:$0xff]  ;;  %v644_v4 = vld [vmem:[%s7527_s13 + $0x58] sm:$0xff] }
  0x58   : > { %6260 = vmatprep.subr.bf16.mxu0 %v6259_v9  ;;  %v863_v7 = vld [vmem:[%s7517_s24 + $0x70] sm:$0xff]  ;;  %v1073_v8 = vld [vmem:[%s9650_s3 + $0x140] sm:$0xff]  ;;  %v646_v10 = vld [vmem:[%s7527_s13 + $0x68] sm:$0xff] }
  0x59   : > { %v864_v11 = vld [vmem:[%s7517_s24 + $0x78] sm:$0xff]  ;;  %v647_v13 = vld [vmem:[%s7527_s13 + $0x70] sm:$0xff]  ;;  %v1077_v19 = vld [vmem:[%s9650_s3 + $0x160] sm:$0xff] }
  0x5a   : > { %v648_v14 = vld [vmem:[%s7527_s13 + $0x78] sm:$0xff]  ;;  %v1075_v16 = vld [vmem:[%s9650_s3 + $0x150] sm:$0xff]  ;;  %v1078_v20 = vld [vmem:[%s9650_s3 + $0x168] sm:$0xff] }
  0x5b   : > { %v1076_v17 = vld [vmem:[%s9650_s3 + $0x158] sm:$0xff]  ;;  %v1079_v22 = vld [vmem:[%s9650_s3 + $0x170] sm:$0xff]  ;;  %v1050_v25 = vld [vmem:[%s7651_s26 + $0x8] sm:$0xff] }
  0x5c   : > { %v1080_v23 = vld [vmem:[%s9650_s3 + $0x178] sm:$0xff]  ;;  %v1051_v26 = vld [vmem:[%s7651_s26 + $0x10] sm:$0xff]  ;;  %v1053_v28 = vld [vmem:[%s7651_s26 + $0x20] sm:$0xff] }
  0x5d   : > { %v1054_v29 = vld [vmem:[%s7651_s26 + $0x28] sm:$0xff]  ;;  %v1056_v31 = vld [vmem:[%s7651_s26 + $0x38] sm:$0xff]  ;;  %v1057_v32 = vld [vmem:[%s7651_s26 + $0x40] sm:$0xff] }
  0x5e   : > { %6294 = vmatpush3.bf16.xpose.msra.mxu1 %v6291_v6  ;;  %v645_v6 = vld [vmem:[%s7527_s13 + $0x60] sm:$0xff]  ;;  %v1059_v34 = vld [vmem:[%s7651_s26 + $0x50] sm:$0xff]  ;;  %v1060_v35 = vld [vmem:[%s7651_s26 + $0x58] sm:$0xff] }
  0x5f   : > { %6296 = vmatprep.subr.bf16.mxu1 %v6295_v12  ;;  %6262 = vmatpush3.bf16.xpose.msra.mxu0 %v6259_v9  ;;  %v1074_v9 = vld [vmem:[%s9650_s3 + $0x148] sm:$0xff]  ;;  %v1064_v39 = vld [vmem:[%s7651_s26 + $0x78] sm:$0xff]  ;;  %v7690_v40 = vld [vmem:[%s9651_s4 + $0x1] ss:$0 sm:$0xff] }
  0x60   : > { %6264 = vmatprep.subr.bf16.mxu0 %v6263_v15  ;;  %vm7701_vm1 = vmpackc.low %vm1313_vm0, %vm1313_vm0 }
  0x66   : > { %6298 = vmatpush3.bf16.xpose.msra.mxu1 %v6295_v12  ;;  %v6327_v12 = vpack.c.bf16 %v1074_v9, %v1073_v8 }
  0x67   : > { %6300 = vmatprep.subr.bf16.mxu1 %v6299_v18  ;;  %6266 = vmatpush3.bf16.xpose.msra.mxu0 %v6263_v15  ;;  %v1049_v15 = vld [vmem:[%s7651_s26] sm:$0xff] }
  0x68   : > { %6268 = vmatprep.subr.bf16.mxu0 %v6267_v21 }
  0x6e   : > { %6302 = vmatpush3.bf16.xpose.msra.mxu1 %v6299_v18  ;;  %v6331_v18 = vpack.c.bf16 %v1076_v17, %v1075_v16 }
  0x6f   : > { %6304 = vmatprep.subr.bf16.mxu1 %v6303_v24  ;;  %6270 = vmatpush3.bf16.xpose.msra.mxu0 %v6267_v21  ;;  %v6335_v21 = vpack.c.bf16 %v1078_v20, %v1077_v19 }
  0x70   : > { %6272 = vmatprep.subr.bf16.mxu0 %v6271_v27 }
  0x76   : > { %6306 = vmatpush3.bf16.xpose.msra.mxu1 %v6303_v24  ;;  %v6339_v24 = vpack.c.bf16 %v1080_v23, %v1079_v22 }
  0x77   : > { %6308 = vmatprep.subr.bf16.mxu1 %v6307_v30  ;;  %6274 = vmatpush3.bf16.xpose.msra.mxu0 %v6271_v27  ;;  %v1052_v27 = vld [vmem:[%s7651_s26 + $0x18] sm:$0xff] }
  0x78   : > { %6276 = vmatprep.subr.bf16.mxu0 %v6275_v33 }
  0x7e   : > { %6310 = vmatpush3.bf16.xpose.msra.mxu1 %v6307_v30  ;;  %v1055_v30 = vld [vmem:[%s7651_s26 + $0x30] sm:$0xff] }
  0x7f   : > { %6278 = vmatpush3.bf16.xpose.msra.mxu0 %v6275_v33  ;;  %v1058_v33 = vld [vmem:[%s7651_s26 + $0x48] sm:$0xff] }
  0x80   : > { %6312 = vmatprep.subr.bf16.mxu0 %v6311_v36 }
  0x85   : > { %5664 = vmatmul.mubr.f32.vlgmr.msra.gmra.mrb[0].mxu1 %v850_v37  ;;  %v1062_v37 = vld [vmem:[%s7651_s26 + $0x68] sm:$0xff] }
  0x86   : > { %5666 = vmatprep.mubr.f32.mxu1 %v851_v38  ;;  %5608 = vmatmul.mubr.f32.vlgmr.msra.gmra.mrb[0].mxu0 %v634_v41  ;;  %v1063_v38 = vld [vmem:[%s7651_s26 + $0x70] sm:$0xff] }
  0x87   : > { %6314 = vmatpush3.bf16.xpose.msra.mxu0 %v6311_v36  ;;  %5610 = vmatprep.mubr.f32.mxu0 %v635_v45  ;;  %v1061_v36 = vld [vmem:[%s7651_s26 + $0x60] sm:$0xff]  ;;  %s7299_s26 = smov 96  }
  0x88   : > { %6316 = vmatprep.subr.bf16.mxu0 %v6315_v43  ;;  %v7697_v45 = vld [vmem:[%s9651_s4] ss:$0 sm:$0xff] }
  0x89   : > { %5667 = vmatmul.mubr.f32.gmra.mrb[2].mxu1 %v852_v42 }
  0x8a   : > { %5669 = vmatprep.mubr.f32.mxu1 %v853_v44  ;;  %5611 = vmatmul.mubr.f32.gmra.mrb[2].mxu0 %v636_v46 }
  0x8b   : > { %5613 = vmatprep.mubr.f32.mxu0 %v637_v48 }
  0x8d   : > { %5670 = vmatmul.mubr.f32.gmra.mrb[4].mxu1 %v854_v47 }
  0x8e   : > { %5672 = vmatprep.mubr.f32.mxu1 %v855_v49  ;;  %5614 = vmatmul.mubr.f32.gmra.mrb[4].mxu0 %v638_v52 }
  0x8f   : > { %6318 = vmatpush3.bf16.xpose.msra.mxu0 %v6315_v43  ;;  %5616 = vmatprep.mubr.f32.mxu0 %v639_v56 }
  0x90   : > { %6320 = vmatprep.subr.bf16.mxu0 %v6319_v54 }
  0x91   : > { %5673 = vmatmul.mubr.f32.gmra.mrb[6].mxu1 %v856_v53 }
  0x92   : > { %5675 = vmatprep.mubr.f32.mxu1 %v857_v55  ;;  %5617 = vmatmul.mubr.f32.gmra.mrb[6].mxu0 %v640_v57 }
  0x93   : > { %5619 = vmatprep.mubr.f32.mxu0 %v641_v59 }
  0x95   : > { %5676 = vmatmul.mubr.f32.gmra.mrb[8].mxu1 %v858_v58 }
  0x96   : > { %5678 = vmatprep.mubr.f32.mxu1 %v859_v60  ;;  %5620 = vmatmul.mubr.f32.gmra.mrb[8].mxu0 %v642_v63 }
  0x97   : > { %6322 = vmatpush3.bf16.xpose.msra.mxu0 %v6319_v54  ;;  %5622 = vmatprep.mubr.f32.mxu0 %v643_v3 }
  0x98   : > { %6324 = vmatprep.subr.bf16.mxu0 %v6323_v1 }
  0x99   : > { %5679 = vmatmul.mubr.f32.gmra.mrb[10].mxu1 %v860_v0 }
  0x9a   : > { %5681 = vmatprep.mubr.f32.mxu1 %v861_v2  ;;  %5623 = vmatmul.mubr.f32.gmra.mrb[10].mxu0 %v644_v4 }
  0x9b   : > { %5625 = vmatprep.mubr.f32.mxu0 %v645_v6 }
  0x9d   : > { %5682 = vmatmul.mubr.f32.gmra.mrb[12].mxu1 %v862_v5 }
  0x9e   : > { %5684 = vmatprep.mubr.f32.mxu1 %v863_v7  ;;  %5626 = vmatmul.mubr.f32.gmra.mrb[12].mxu0 %v646_v10 }
  0x9f   : > { %6326 = vmatpush3.bf16.xpose.msra.mxu0 %v6323_v1  ;;  %5628 = vmatprep.mubr.f32.mxu0 %v647_v13 }
  0xa0   : > { %6328 = vmatprep.subr.bf16.mxu0 %v6327_v12 }
  0xa1   : > { %5685 = vmatmul.mubr.f32.gmra.mrb[14].mxu1 %v864_v11 }
  0xa2   : > { %5629 = vmatmul.mubr.f32.gmra.mrb[14].mxu0 %v648_v14 }
  0xa3   : > { %5719 = vmatprep.mubr.f32.mxu0 %v1049_v15 }
  0xa7   : > { %6330 = vmatpush3.bf16.xpose.msra.mxu0 %v6327_v12 }
  0xa8   : > { %6332 = vmatprep.subr.bf16.mxu0 %v6331_v18 }
  0xaf   : > { %6334 = vmatpush3.bf16.xpose.msra.mxu0 %v6331_v18 }
  0xb0   : > { %6336 = vmatprep.subr.bf16.mxu0 %v6335_v21 }
  0xb7   : > { %6338 = vmatpush3.bf16.xpose.msra.mxu0 %v6335_v21 }
  0xb8   : > { %6340 = vmatprep.subr.bf16.mxu0 %v6339_v24 }
  0xbf   : > { %6342 = vmatpush3.bf16.xpose.msra.mxu0 %v6339_v24 }
  0xc6   : > { %5720 = vmatmul.mubr.f32.vlgmr.msra.gmra.mrb[16].mxu0 %v1050_v25 }
  0xc7   : > { %5722 = vmatprep.mubr.f32.mxu0 %v1051_v26 }
  0xca   : > { %5723 = vmatmul.mubr.f32.gmra.mrb[18].mxu0 %v1052_v27 }
  0xcb   : > { %5725 = vmatprep.mubr.f32.mxu0 %v1053_v28 }
  0xce   : > { %5726 = vmatmul.mubr.f32.gmra.mrb[20].mxu0 %v1054_v29 }
  0xcf   : > { %5728 = vmatprep.mubr.f32.mxu0 %v1055_v30 }
  0xd2   : > { %5729 = vmatmul.mubr.f32.gmra.mrb[22].mxu0 %v1056_v31 }
  0xd3   : > { %5731 = vmatprep.mubr.f32.mxu0 %v1057_v32 }
  0xd6   : > { %5732 = vmatmul.mubr.f32.gmra.mrb[24].mxu0 %v1058_v33 }
  0xd7   : > { %5734 = vmatprep.mubr.f32.mxu0 %v1059_v34 }
  0xda   : > { %5735 = vmatmul.mubr.f32.gmra.mrb[26].mxu0 %v1060_v35 }
  0xdb   : > { %5737 = vmatprep.mubr.f32.mxu0 %v1061_v36 }
  0xde   : > { %5738 = vmatmul.mubr.f32.gmra.mrb[28].mxu0 %v1062_v37 }
  0xdf   : > { %5740 = vmatprep.mubr.f32.mxu0 %v1063_v38 }
  0xe2   : > { %5741 = vmatmul.mubr.f32.gmra.mrb[30].mxu0 %v1064_v39 }
 0x158   : > { %v5665_v41 = vpop.f32.mrb[0].mxu1 }
 0x159   : > { %v960_v42 = vadd.f32 %v5665_v41, %v7690_v40  ;;  %v954_v43 = vpop.f32.mrb[1].mxu1  ;;  %v7705_v47 = vpop.f32.mrb[0].mxu0 }
 0x15a   : > { %v955_v44 = vadd.f32 %v7690_v40, %v954_v43  ;;  %v738_v51 = vpop.f32.mrb[1].mxu0 }
 0x15b   : > { %v739_v54 = vadd.f32 %v7697_v45, %v738_v51 }
 0x15c   : > { %v7707_v48 = vpack.i.bf16 %v960_v42, %v955_v44  ;;  %v6343_v49 = vpack.c.bf16 %v960_v42, %v955_v44  ;;  %v5668_v50 = vpop.f32.mrb[2].mxu1 }
 0x15d   : > { %v970_v52 = vadd.f32 %v5668_v50, %v7690_v40  ;;  %v964_v53 = vpop.f32.mrb[3].mxu1  ;;  %v7718_v56 = vmul.f32 0.17677669, %v739_v54  ;;  %v5612_v57 = vpop.f32.mrb[2].mxu0 }
 0x15e   : > { %6740 = vrot.lane.b32.xlu1 %v7707_v48, %s7299_s26  ;;  %6345 = vmatprep.subr.msk.bf16.mxu1 %vm7701_vm1, %v6343_v49  ;;  %v965_v55 = vadd.f32 %v7690_v40, %v964_v53  ;;  %v7723_v61 = vadd.f32 %v5612_v57, %v7697_v45  ;;  %v7725_v62 = vpop.f32.mrb[3].mxu0 }
 0x15f   : > { %6348 = vmatpush3.bf16.xpose.msk.msra.mxu1 %vm7701_vm1, %v6343_v49  ;;  %5775 = vmatprep.mubr.msk.f32.mxu1 %vm1313_vm0, %v7718_v56 }
 0x160   : > { %v7720_v58 = vpack.i.bf16 %v970_v52, %v965_v55  ;;  %v6349_v59 = vpack.c.bf16 %v970_v52, %v965_v55  ;;  %v5671_v60 = vpop.f32.mrb[4].mxu1 }
 0x161   : > { %v980_v63 = vadd.f32 %v5671_v60, %v7690_v40  ;;  %v974_v0 = vpop.f32.mrb[5].mxu1  ;;  %v5615_v2 = vpop.f32.mrb[4].mxu0 }
 0x162   : > { %6745 = vrot.lane.b32.xlu0 %v7720_v58, %s7299_s26  ;;  %6351 = vmatprep.subr.msk.bf16.mxu1 %vm7701_vm1, %v6349_v59  ;;  %v975_v1 = vadd.f32 %v7690_v40, %v974_v0  ;;  %v7738_v6 = vadd.f32 %v5615_v2, %v7697_v45  ;;  %v758_v7 = vpop.f32.mrb[5].mxu0 }
 0x163   : > { %v7742_v10 = vadd.f32 %v7697_v45, %v758_v7 }
 0x164   : > { %v7735_v3 = vpack.i.bf16 %v980_v63, %v975_v1  ;;  %v6355_v4 = vpack.c.bf16 %v980_v63, %v975_v1  ;;  %v5674_v5 = vpop.f32.mrb[6].mxu1 }
 0x165   : > { %v990_v8 = vadd.f32 %v5674_v5, %v7690_v40  ;;  %v984_v9 = vpop.f32.mrb[7].mxu1  ;;  %v5618_v12 = vpop.f32.mrb[6].mxu0  ;;  %v7830_v5 = vld [vmem:[%s9651_s4 + $0x2] ss:$0 sm:$0xff] }
 0x166   : > { %6750 = vrot.lane.b32.xlu1 %v7735_v3, %s7299_s26  ;;  %v985_v11 = vadd.f32 %v7690_v40, %v984_v9  ;;  %v7752_v15 = vadd.f32 %v5618_v12, %v7697_v45  ;;  %v768_v16 = vpop.f32.mrb[7].mxu0 }
 0x167   : > { %6354 = vmatpush3.bf16.xpose.msk.msra.mxu1 %vm7701_vm1, %v6349_v59  ;;  %v7758_v20 = vadd.f32 %v7697_v45, %v768_v16 }
 0x168   : > { %6357 = vmatprep.subr.msk.bf16.mxu1 %vm7701_vm1, %v6355_v4  ;;  %v6361_v13 = vpack.c.bf16 %v990_v8, %v985_v11  ;;  %v5677_v14 = vpop.f32.mrb[8].mxu1  ;;  %v7754_v17 = vpack.i.bf16 %v990_v8, %v985_v11 }
 0x169   : > { %v1000_v18 = vadd.f32 %v5677_v14, %v7690_v40  ;;  %v994_v19 = vpop.f32.mrb[9].mxu1  ;;  %v5621_v22 = vpop.f32.mrb[8].mxu0  ;;  %v7852_v14 = vmul.f32 0.17677669, %v7723_v61 }
 0x16a   : > { %v995_v21 = vadd.f32 %v7690_v40, %v994_v19  ;;  %v7764_v26 = vadd.f32 %v5621_v22, %v7697_v45  ;;  %v778_v27 = vpop.f32.mrb[9].mxu0  ;;  %v7870_v22 = vmul.f32 0.17677669, %v7738_v6 }
 0x16b   : > { %v7768_v30 = vadd.f32 %v7697_v45, %v778_v27 }
 0x16c   : > { %v7761_v23 = vpack.i.bf16 %v1000_v18, %v995_v21  ;;  %v6367_v24 = vpack.c.bf16 %v1000_v18, %v995_v21  ;;  %v5680_v25 = vpop.f32.mrb[10].mxu1 }
 0x16d   : > { %v1010_v28 = vadd.f32 %v5680_v25, %v7690_v40  ;;  %v1004_v29 = vpop.f32.mrb[11].mxu1  ;;  %v5624_v32 = vpop.f32.mrb[10].mxu0 }
 0x16e   : > { %6760 = vrot.lane.b32.xlu1 %v7761_v23, %s7299_s26  ;;  %v1005_v31 = vadd.f32 %v7690_v40, %v1004_v29  ;;  %v7778_v35 = vadd.f32 %v5624_v32, %v7697_v45  ;;  %v788_v36 = vpop.f32.mrb[11].mxu0  ;;  %v7888_v29 = vmul.f32 0.17677669, %v7752_v15 }
 0x16f   : > { %6360 = vmatpush3.bf16.xpose.msk.msra.mxu1 %vm7701_vm1, %v6355_v4  ;;  %v7784_v41 = vadd.f32 %v7697_v45, %v788_v36  ;;  %v744_v4 = vadd.f32 %v7705_v47, %v7697_v45  ;;  %v7906_v36 = vmul.f32 0.17677669, %v7764_v26 }
 0x170   : > { %6363 = vmatprep.subr.msk.bf16.mxu1 %vm7701_vm1, %v6361_v13  ;;  %v6373_v33 = vpack.c.bf16 %v1010_v28, %v1005_v31  ;;  %v5683_v34 = vpop.f32.mrb[12].mxu1  ;;  %v7780_v37 = vpack.i.bf16 %v1010_v28, %v1005_v31 }
 0x171   : > { %v1020_v38 = vadd.f32 %v5683_v34, %v7690_v40  ;;  %v1014_v39 = vpop.f32.mrb[13].mxu1  ;;  %v5627_v43 = vpop.f32.mrb[12].mxu0  ;;  %v7834_v9 = vmul.f32 0.17677669, %v744_v4 }
 0x172   : > { %v1015_v42 = vadd.f32 %v7690_v40, %v1014_v39  ;;  %v7788_v50 = vadd.f32 %v5627_v43, %v7697_v45  ;;  %v798_v51 = vpop.f32.mrb[13].mxu0 }
 0x173   : > { %v7794_v55 = vadd.f32 %v7697_v45, %v798_v51 }
 0x174   : > { %v6379_v44 = vpack.c.bf16 %v1020_v38, %v1015_v42  ;;  %v5686_v49 = vpop.f32.mrb[14].mxu1  ;;  %v7790_v52 = vpack.i.bf16 %v1020_v38, %v1015_v42 }
 0x175   : > { %v1030_v53 = vadd.f32 %v5686_v49, %v7690_v40  ;;  %v1024_v54 = vpop.f32.mrb[15].mxu1  ;;  %v5630_v59 = vpop.f32.mrb[14].mxu0 }
 0x176   : > { %v1025_v57 = vadd.f32 %v7690_v40, %v1024_v54  ;;  %v7802_v63 = vadd.f32 %v5630_v59, %v7697_v45  ;;  %v808_v0 = vpop.f32.mrb[15].mxu0  ;;  %v749_v40 = vadd.f32 %v7697_v45, %v7725_v62  ;;  %v7933_v54 = vmul.f32 0.17677669, %v7788_v50 }
 0x177   : > { %6366 = vmatpush3.bf16.xpose.msk.msra.mxu1 %vm7701_vm1, %v6361_v13  ;;  %v7807_v2 = vadd.f32 %v7697_v45, %v808_v0  ;;  %v7845_v45 = vmul.f32 0.17677669, %v7742_v10  ;;  %v7863_v10 = vmul.f32 0.17677669, %v7758_v20  ;;  %v7881_v20 = vmul.f32 0.17677669, %v7768_v30 }
 0x178   : > { %6369 = vmatprep.subr.msk.bf16.mxu1 %vm7701_vm1, %v6367_v24  ;;  %v6385_v60 = vpack.c.bf16 %v1030_v53, %v1025_v57  ;;  %v7804_v1 = vpack.i.bf16 %v1030_v53, %v1025_v57  ;;  %v7832_v7 = vmul.f32 0.17677669, %v749_v40  ;;  %v7899_v30 = vmul.f32 0.17677669, %v7784_v41 }
 0x179   : > { %v7917_v41 = vmul.f32 0.17677669, %v7794_v55  ;;  %v7938_v55 = vmul.f32 0.17677669, %v7807_v2  ;;  %v7951_v0 = vmul.f32 0.17677669, %v7802_v63 }
 0x17f   : > { %6372 = vmatpush3.bf16.xpose.msk.msra.mxu1 %vm7701_vm1, %v6367_v24 }
 0x180   : > { %6375 = vmatprep.subr.msk.bf16.mxu1 %vm7701_vm1, %v6373_v33 }
 0x187   : > { %6378 = vmatpush3.bf16.xpose.msk.msra.mxu1 %vm7701_vm1, %v6373_v33 }
 0x188   : > { %6381 = vmatprep.subr.msk.bf16.mxu1 %vm7701_vm1, %v6379_v44 }
 0x18f   : > { %6384 = vmatpush3.bf16.xpose.msk.msra.mxu1 %vm7701_vm1, %v6379_v44  ;;  %v7924_v44 = vmul.f32 0.17677669, %v7778_v35 }
 0x190   : > { %6387 = vmatprep.subr.msk.bf16.mxu1 %vm7701_vm1, %v6385_v60 }
 0x197   : > { %6390 = vmatpush3.bf16.xpose.msk.msra.mxu1 %vm7701_vm1, %v6385_v60 }
 0x199   : > { %v5721_v8 = vpop.f32.mrb[16].mxu0 }
 0x19a   : > { %v7837_v11 = vadd.f32 %v5721_v8, %v7830_v5  ;;  %v1154_v12 = vpop.f32.mrb[17].mxu0 }
 0x19b   : > { %v7840_v13 = vadd.f32 %v7830_v5, %v1154_v12 }
 0x19d   : > { %v5724_v47 = vpop.f32.mrb[18].mxu0  ;;  %v6391_v62 = vpack.c.bf16 %v7837_v11, %v7840_v13 }
 0x19e   : > { %5776 = vmatmul.mubr.msk.f32.vlgmr.msra.gmra.mrb[16].mxu1 %vm1313_vm0, %v7834_v9  ;;  %v7855_v16 = vadd.f32 %v5724_v47, %v7830_v5  ;;  %v1164_v18 = vpop.f32.mrb[19].mxu0 }
 0x19f   : > { %5778 = vmatprep.mubr.msk.f32.mxu1 %vm1313_vm0, %v7832_v7  ;;  %v7858_v19 = vadd.f32 %v7830_v5, %v1164_v18  ;;  %6392 = vmatprep.subr.bf16.mxu1 %v6391_v62 }
 0x1a0   : > { %6394 = vmatpush3.bf16.msra.mxu1 %v6391_v62 }
 0x1a1   : > { %v5727_v61 = vpop.f32.mrb[20].mxu0  ;;  %v6395_v21 = vpack.c.bf16 %v7855_v16, %v7858_v19 }
 0x1a2   : > { %5779 = vmatmul.mubr.msk.f32.gmra.mrb[18].mxu1 %vm1313_vm0, %v7852_v14  ;;  %v7873_v24 = vadd.f32 %v5727_v61, %v7830_v5  ;;  %v1174_v25 = vpop.f32.mrb[21].mxu0 }
 0x1a3   : > { %5781 = vmatprep.mubr.msk.f32.mxu1 %vm1313_vm0, %v7845_v45  ;;  %v7876_v27 = vadd.f32 %v7830_v5, %v1174_v25  ;;  %6396 = vmatprep.subr.bf16.mxu1 %v6395_v21 }
 0x1a4   : > { %6398 = vmatpush3.bf16.msra.mxu1 %v6395_v21 }
 0x1a5   : > { %v5730_v6 = vpop.f32.mrb[22].mxu0  ;;  %v6399_v28 = vpack.c.bf16 %v7873_v24, %v7876_v27 }
 0x1a6   : > { %5782 = vmatmul.mubr.msk.f32.gmra.mrb[20].mxu1 %vm1313_vm0, %v7870_v22  ;;  %v7891_v31 = vadd.f32 %v5730_v6, %v7830_v5  ;;  %v1184_v32 = vpop.f32.mrb[23].mxu0 }
 0x1a7   : > { %5784 = vmatprep.mubr.msk.f32.mxu1 %vm1313_vm0, %v7863_v10  ;;  %v7894_v33 = vadd.f32 %v7830_v5, %v1184_v32  ;;  %6400 = vmatprep.subr.bf16.mxu1 %v6399_v28 }
 0x1a8   : > { %6402 = vmatpush3.bf16.msra.mxu1 %v6399_v28 }
 0x1a9   : > { %v5733_v15 = vpop.f32.mrb[24].mxu0  ;;  %v6403_v34 = vpack.c.bf16 %v7891_v31, %v7894_v33 }
 0x1aa   : > { %5785 = vmatmul.mubr.msk.f32.gmra.mrb[22].mxu1 %vm1313_vm0, %v7888_v29  ;;  %v7909_v38 = vadd.f32 %v5733_v15, %v7830_v5  ;;  %v1194_v39 = vpop.f32.mrb[25].mxu0 }
 0x1ab   : > { %5787 = vmatprep.mubr.msk.f32.mxu1 %vm1313_vm0, %v7881_v20  ;;  %v7912_v42 = vadd.f32 %v7830_v5, %v1194_v39  ;;  %6404 = vmatprep.subr.bf16.mxu1 %v6403_v34 }
 0x1ac   : > { %6406 = vmatpush3.bf16.msra.mxu1 %v6403_v34 }
 0x1ad   : > { %v5736_v26 = vpop.f32.mrb[26].mxu0  ;;  %v6407_v43 = vpack.c.bf16 %v7909_v38, %v7912_v42 }
 0x1ae   : > { %5788 = vmatmul.mubr.msk.f32.gmra.mrb[24].mxu1 %vm1313_vm0, %v7906_v36  ;;  %v7927_v49 = vadd.f32 %v5736_v26, %v7830_v5  ;;  %v1204_v51 = vpop.f32.mrb[27].mxu0 }
 0x1af   : > { %5790 = vmatprep.mubr.msk.f32.mxu1 %vm1313_vm0, %v7899_v30  ;;  %v7930_v53 = vadd.f32 %v7830_v5, %v1204_v51  ;;  %6408 = vmatprep.subr.bf16.mxu1 %v6407_v43 }
 0x1b0   : > { %6410 = vmatpush3.bf16.msra.mxu1 %v6407_v43 }
 0x1b1   : > { %v5739_v35 = vpop.f32.mrb[28].mxu0  ;;  %v6411_v57 = vpack.c.bf16 %v7927_v49, %v7930_v53 }
 0x1b2   : > { %5791 = vmatmul.mubr.msk.f32.gmra.mrb[26].mxu1 %vm1313_vm0, %v7924_v44  ;;  %v7945_v59 = vadd.f32 %v5739_v35, %v7830_v5  ;;  %v1214_v60 = vpop.f32.mrb[29].mxu0 }
 0x1b3   : > { %5793 = vmatprep.mubr.msk.f32.mxu1 %vm1313_vm0, %v7917_v41  ;;  %v7948_v50 = vadd.f32 %v7830_v5, %v1214_v60  ;;  %6412 = vmatprep.subr.bf16.mxu1 %v6411_v57 }
 0x1b4   : > { %6414 = vmatpush3.bf16.msra.mxu1 %v6411_v57 }
 0x1b5   : > { %v5742_v2 = vpop.f32.mrb[30].mxu0  ;;  %v6415_v40 = vpack.c.bf16 %v7945_v59, %v7948_v50 }
 0x1b6   : > { %5794 = vmatmul.mubr.msk.f32.gmra.mrb[28].mxu1 %vm1313_vm0, %v7933_v54  ;;  %v7960_v4 = vadd.f32 %v5742_v2, %v7830_v5  ;;  %v1224_v8 = vpop.f32.mrb[31].mxu0 }
 0x1b7   : > { %5796 = vmatprep.mubr.msk.f32.mxu1 %vm1313_vm0, %v7938_v55  ;;  %v7963_v12 = vadd.f32 %v7830_v5, %v1224_v8  ;;  %6416 = vmatprep.subr.bf16.mxu1 %v6415_v40  ;;  %v8068_v8 = vpack.i.bf16 %v7891_v31, %v7894_v33  ;;  %v8092_v33 = vpack.i.bf16 %v7873_v24, %v7876_v27 }
 0x1b8   : > { %6418 = vmatpush3.bf16.msra.mxu1 %v6415_v40  ;;  %v8060_v40 = vpack.i.bf16 %v7855_v16, %v7858_v19  ;;  %v8076_v16 = vpack.i.bf16 %v7927_v49, %v7930_v53  ;;  %v8080_v19 = vpack.i.bf16 %v7837_v11, %v7840_v13  ;;  %v8101_v13 = vpack.i.bf16 %v7909_v38, %v7912_v42 }
 0x1b9   : > { %v6419_v63 = vpack.c.bf16 %v7960_v4, %v7963_v12  ;;  %v8088_v31 = vpack.i.bf16 %v7960_v4, %v7963_v12 }
 0x1ba   : > { %5797 = vmatmul.mubr.msk.f32.gmra.mrb[30].mxu1 %vm1313_vm0, %v7951_v0 }
 0x1bb   : > { %6420 = vmatprep.subr.bf16.mxu1 %v6419_v63 }
 0x1bc   : > { %6422 = vmatpush3.bf16.msra.mxu1 %v6419_v63 }
 0x1d0   : > { %v6741_v47 = vpop.permute.xlu1 %6740 }
 0x1d1   : > { %v6743_v62 = vunpack.i.h.bf16 %v6741_v47  ;;  %v6742_v18 = vunpack.i.l.bf16 %v6741_v47 }
 0x1d3   : > { %v7969_v61 = vpack.c.bf16 %v6743_v62, %v6742_v18  ;;  %v8111_v18 = vpack.i.bf16 %v7945_v59, %v7948_v50 }
 0x1d4   : > { %v6746_v63 = vpop.permute.xlu0 %6745 }
 0x1d5   : > { %6425 = vmatprep.subr.msk.bf16.mxu1 %vm7701_vm1, %v7969_v61 }
 0x1d8   : > { %v6751_v47 = vpop.permute.xlu1 %6750 }
 0x1e0   : > { %v6761_v53 = vpop.permute.xlu1 %6760 }
 0x271   : > { %v7974_v5 = vpop.f32.mrb[16].mxu1 }
 0x272   : > { %1557 = vmax.xlane.f32.xlu0 %v7974_v5  ;;  %v7977_v21 = vpop.f32.mrb[17].mxu1 }
 0x275   : > { %v7979_v25 = vpop.f32.mrb[18].mxu1 }
 0x276   : > { %1555 = vmax.xlane.f32.xlu0 %v7977_v21  ;;  %v7982_v6 = vpop.f32.mrb[19].mxu1 }
 0x277   : > { %1559 = vmax.xlane.f32.xlu1 %v7982_v6 }
 0x279   : > { %v7985_v28 = vpop.f32.mrb[20].mxu1 }
 0x27a   : > { %v7987_v32 = vpop.f32.mrb[21].mxu1 }
 0x27b   : > { %1565 = vmax.xlane.f32.xlu1 %v7985_v28 }
 0x27d   : > { %v7990_v15 = vpop.f32.mrb[22].mxu1 }
 0x27e   : > { %v7992_v34 = vpop.f32.mrb[23].mxu1 }
 0x27f   : > { %1563 = vmax.xlane.f32.xlu1 %v7987_v32 }
 0x281   : > { %v7995_v39 = vpop.f32.mrb[24].mxu1 }
 0x282   : > { %v7997_v26 = vpop.f32.mrb[25].mxu1 }
 0x283   : > { %1567 = vmax.xlane.f32.xlu1 %v7992_v34 }
 0x285   : > { %v8000_v43 = vpop.f32.mrb[26].mxu1 }
 0x286   : > { %v8002_v51 = vpop.f32.mrb[27].mxu1 }
 0x287   : > { %1575 = vmax.xlane.f32.xlu1 %v8002_v51 }
 0x289   : > { %v8005_v35 = vpop.f32.mrb[28].mxu1 }
 0x28a   : > { %v8007_v57 = vpop.f32.mrb[29].mxu1 }
 0x28b   : > { %1581 = vmax.xlane.f32.xlu1 %v8005_v35 }
 0x28c   : > { %6755 = vrot.lane.b32.xlu0 %v7754_v17, %s7299_s26 }
 0x28d   : > { %v8012_v60 = vpop.f32.mrb[30].mxu1 }
 0x28e   : > { %v8014_v2 = vpop.f32.mrb[31].mxu1 }
 0x28f   : > { %1579 = vmax.xlane.f32.xlu1 %v8007_v57 }
 0x2a0   : > { %6770 = vrot.lane.b32.xlu1 %v7790_v52, %s7299_s26 }
 0x2a4   : > { %6775 = vrot.lane.b32.xlu1 %v7804_v1, %s7299_s26 }
 0x2a8   : > { %2004 = vrot.lane.b32.xlu1 %v7718_v56, %s7299_s26 }
 0x2ab   : > { %1561 = vmax.xlane.f32.xlu0 %v7979_v25 }
 0x2af   : > { %1569 = vmax.xlane.f32.xlu0 %v7990_v15 }
 0x2b3   : > { %1573 = vmax.xlane.f32.xlu0 %v7995_v39 }
 0x2b7   : > { %1571 = vmax.xlane.f32.xlu0 %v7997_v26 }
 0x2bb   : > { %1577 = vmax.xlane.f32.xlu0 %v8000_v43 }
 0x2bf   : > { %1585 = vmax.xlane.f32.xlu0 %v8012_v60 }
 0x2cc   : > { %1583 = vmax.xlane.f32.xlu1 %v8014_v2 }
 0x2d5   : > { %6765 = vrot.lane.b32.xlu0 %v7780_v37, %s7299_s26 }
 0x2d9   : > { %2010 = vrot.lane.b32.xlu0 %v7852_v14, %s7299_s26 }
 0x2dd   : > { %2014 = vrot.lane.b32.xlu0 %v7870_v22, %s7299_s26  ;;  %2006 = vrot.lane.b32.xlu1 %v7834_v9, %s7299_s26 }
 0x2e1   : > { %2018 = vrot.lane.b32.xlu0 %v7888_v29, %s7299_s26  ;;  %2008 = vrot.lane.b32.xlu1 %v7832_v7, %s7299_s26 }
 0x2e5   : > { %2022 = vrot.lane.b32.xlu0 %v7906_v36, %s7299_s26  ;;  %2012 = vrot.lane.b32.xlu1 %v7845_v45, %s7299_s26 }
 0x2e9   : > { %2026 = vrot.lane.b32.xlu0 %v7924_v44, %s7299_s26  ;;  %2016 = vrot.lane.b32.xlu1 %v7863_v10, %s7299_s26 }
 0x2ed   : > { %2030 = vrot.lane.b32.xlu0 %v7933_v54, %s7299_s26  ;;  %2020 = vrot.lane.b32.xlu1 %v7881_v20, %s7299_s26 }
 0x2f1   : > { %2034 = vrot.lane.b32.xlu0 %v7951_v0, %s7299_s26  ;;  %2024 = vrot.lane.b32.xlu1 %v7899_v30, %s7299_s26 }
 0x2f5   : > { %6785 = vrot.lane.b32.xlu0 %v8060_v40, %s7299_s26  ;;  %2028 = vrot.lane.b32.xlu1 %v7917_v41, %s7299_s26 }
 0x2f9   : > { %6795 = vrot.lane.b32.xlu0 %v8068_v8, %s7299_s26  ;;  %2032 = vrot.lane.b32.xlu1 %v7938_v55, %s7299_s26 }
 0x2fd   : > { %6805 = vrot.lane.b32.xlu0 %v8076_v16, %s7299_s26  ;;  %6780 = vrot.lane.b32.xlu1 %v8080_v19, %s7299_s26 }
 0x2ff   : > { %v1558_v49 = vpop.xlane.xlu0 %1557 }
 0x300   : > { %v1588_v11 = vsub.f32 %v7974_v5, %v1558_v49  ;;  %v6748_v5 = vunpack.i.h.bf16 %v6746_v63 }
 0x301   : > { %6815 = vrot.lane.b32.xlu0 %v8088_v31, %s7299_s26  ;;  %6790 = vrot.lane.b32.xlu1 %v8092_v33, %s7299_s26 }
 0x302   : > { %v1605_v4 = vmul.f32 1.442695, %v1588_v11  ;;  %v6752_v11 = vunpack.i.l.bf16 %v6751_v47 }
 0x303   : > { %v1556_v12 = vpop.xlane.xlu0 %1555 }
 0x304   : > { %v1587_v62 = vsub.f32 %v7977_v21, %v1556_v12  ;;  %v1560_v24 = vpop.xlane.xlu1 %1559  ;;  %6979 = vpow2.f32 %v1605_v4  ;;  %v6747_v21 = vunpack.i.l.bf16 %v6746_v63  ;;  %v6753_v63 = vunpack.i.h.bf16 %v6751_v47 }
 0x305   : > { %v1589_v27 = vsub.f32 %v7982_v6, %v1560_v24  ;;  %6835 = vrot.lane.b32.xlu0 %v7754_v17, %s7300_s23  ;;  %6800 = vrot.lane.b32.xlu1 %v8101_v13, %s7299_s26  ;;  %v6763_v47 = vunpack.i.h.bf16 %v6761_v53 }
 0x306   : > { %v1603_v38 = vmul.f32 1.442695, %v1587_v62  ;;  %v6429_v49 = vpack.c.bf16 %v6748_v5, %v6747_v21  ;;  %v6435_v4 = vpack.c.bf16 %v6753_v63, %v6752_v11 }
 0x307   : > { %v1607_v42 = vmul.f32 1.442695, %v1589_v27  ;;  %v6756_v12 = vpop.permute.xlu0 %6755 }
 0x308   : > { %6981 = vpow2.f32 %v1603_v38  ;;  %v6757_v62 = vunpack.i.l.bf16 %v6756_v12  ;;  %v1566_v27 = vpop.xlane.xlu1 %1565  ;;  %v6762_v38 = vunpack.i.l.bf16 %v6761_v53 }
 0x309   : > { %6983 = vpow2.f32 %v1607_v42  ;;  %6810 = vrot.lane.b32.xlu1 %v8111_v18, %s7299_s26 }
 0x30a   : > { %v6447_v5 = vpack.c.bf16 %v6763_v47, %v6762_v38 }
 0x30c   : > { %v1564_v42 = vpop.xlane.xlu1 %1563 }
 0x30d   : > { %6820 = vrot.lane.b32.xlu1 %v7707_v48, %s7300_s23 }
 0x30e   : > { %v8117_v6 = vpop.eup %6979 }
 0x30f   : > { %9732 = vst [vmem:[#allocation14_spill] sm:$0xff] %v8117_v6 }
 0x310   : > { %v1568_v21 = vpop.xlane.xlu1 %1567 }
 0x311   : > { %6825 = vrot.lane.b32.xlu1 %v7720_v58, %s7300_s23 }
 0x312   : > { %v8121_v59 = vpop.eup %6981 }
 0x313   : > { %9733 = vst [vmem:[#allocation15_spill] sm:$0xff] %v8121_v59  ;;  %v8123_v50 = vpop.eup %6983  ;;  %5831 = vmatprep.mubr.f32.mxu1 %v8121_v59 }
 0x314   : > { %9734 = vst [vmem:[#allocation16_spill] sm:$0xff] %v8123_v50  ;;  %5832 = vmatmul.mubr.f32.vlgmr.msra.gmra.mrb[32].mxu1 %v8117_v6  ;;  %v1576_v63 = vpop.xlane.xlu1 %1575 }
 0x315   : > { %6428 = vmatpush3.bf16.xpose.msk.msra.mxu1 %vm7701_vm1, %v7969_v61  ;;  %5834 = vmatprep.mubr.f32.mxu1 %v8123_v50  ;;  %v6758_v61 = vunpack.i.h.bf16 %v6756_v12 }
 0x316   : > { %6431 = vmatprep.subr.msk.bf16.mxu1 %vm7701_vm1, %v6429_v49  ;;  %6830 = vrot.lane.b32.xlu1 %v7735_v3, %s7300_s23 }
 0x317   : > { %v6441_v24 = vpack.c.bf16 %v6758_v61, %v6757_v62  ;;  %v1593_v61 = vsub.f32 %v7992_v34, %v1568_v21 }
 0x318   : > { %v1582_v38 = vpop.xlane.xlu1 %1581 }
 0x31a   : > { %6840 = vrot.lane.b32.xlu1 %v7761_v23, %s7300_s23 }
 0x31d   : > { %6434 = vmatpush3.bf16.xpose.msk.msra.mxu1 %vm7701_vm1, %v6429_v49  ;;  %v1591_v49 = vsub.f32 %v7987_v32, %v1564_v42 }
 0x31e   : > { %6437 = vmatprep.subr.msk.bf16.mxu1 %vm7701_vm1, %v6435_v4 }
 0x31f   : > { %v1611_v12 = vmul.f32 1.442695, %v1591_v49 }
 0x325   : > { %6440 = vmatpush3.bf16.xpose.msk.msra.mxu1 %vm7701_vm1, %v6435_v4  ;;  %v1592_v4 = vsub.f32 %v7985_v28, %v1566_v27  ;;  %v1580_v27 = vpop.xlane.xlu1 %1579 }
 0x326   : > { %6443 = vmatprep.subr.msk.bf16.mxu1 %vm7701_vm1, %v6441_v24 }
 0x327   : > { %v1613_v47 = vmul.f32 1.442695, %v1592_v4 }
 0x32d   : > { %6446 = vmatpush3.bf16.xpose.msk.msra.mxu1 %vm7701_vm1, %v6441_v24 }
 0x32e   : > { %6449 = vmatprep.subr.msk.bf16.mxu1 %vm7701_vm1, %v6447_v5 }
 0x335   : > { %6452 = vmatpush3.bf16.xpose.msk.msra.mxu1 %vm7701_vm1, %v6447_v5  ;;  %v1615_v5 = vmul.f32 1.442695, %v1593_v61 }
 0x338   : > { %v1562_v11 = vpop.xlane.xlu0 %1561 }
 0x339   : > { %v1590_v53 = vsub.f32 %v7979_v25, %v1562_v11  ;;  %v1597_v25 = vsub.f32 %v8002_v51, %v1576_v63 }
 0x33b   : > { %v1609_v62 = vmul.f32 1.442695, %v1590_v53  ;;  %v1623_v11 = vmul.f32 1.442695, %v1597_v25 }
 0x33c   : > { %v1570_v24 = vpop.xlane.xlu0 %1569 }
 0x33d   : > { %6985 = vpow2.f32 %v1609_v62  ;;  %v1594_v6 = vsub.f32 %v7990_v15, %v1570_v24  ;;  %v1599_v15 = vsub.f32 %v8007_v57, %v1580_v27 }
 0x33e   : > { %6987 = vpow2.f32 %v1611_v12 }
 0x33f   : > { %6989 = vpow2.f32 %v1613_v47  ;;  %v1617_v32 = vmul.f32 1.442695, %v1594_v6  ;;  %v1627_v63 = vmul.f32 1.442695, %v1599_v15 }
 0x340   : > { %v1574_v50 = vpop.xlane.xlu0 %1573  ;;  %6991 = vpow2.f32 %v1615_v5 }
 0x341   : > { %v1596_v28 = vsub.f32 %v7995_v39, %v1574_v50  ;;  %6993 = vpow2.f32 %v1617_v32  ;;  %v6771_v39 = vpop.permute.xlu1 %6770 }
 0x342   : > { %v6773_v47 = vunpack.i.h.bf16 %v6771_v39 }
 0x343   : > { %v1621_v21 = vmul.f32 1.442695, %v1596_v28 }
 0x344   : > { %v1572_v42 = vpop.xlane.xlu0 %1571 }
 0x345   : > { %v1595_v34 = vsub.f32 %v7997_v26, %v1572_v42  ;;  %v1600_v26 = vsub.f32 %v8005_v35, %v1582_v38  ;;  %v6776_v24 = vpop.permute.xlu1 %6775  ;;  %v6772_v38 = vunpack.i.l.bf16 %v6771_v39 }
 0x347   : > { %v8159_v49 = vpop.eup %6985  ;;  %v1619_v4 = vmul.f32 1.442695, %v1595_v34  ;;  %v1629_v62 = vmul.f32 1.442695, %v1600_v26  ;;  %v6777_v26 = vunpack.i.l.bf16 %v6776_v24 }
 0x348   : > { %9735 = vst [vmem:[#allocation17_spill] sm:$0xff] %v8159_v49  ;;  %v8162_v53 = vpop.eup %6987  ;;  %5835 = vmatmul.mubr.f32.gmra.mrb[34].mxu1 %v8159_v49  ;;  %v1578_v6 = vpop.xlane.xlu0 %1577 }
 0x349   : > { %9736 = vst [vmem:[#allocation18_spill] sm:$0xff] %v8162_v53  ;;  %6995 = vpow2.f32 %v1619_v4  ;;  %v1598_v51 = vsub.f32 %v8000_v43, %v1578_v6  ;;  %5837 = vmatprep.mubr.f32.mxu1 %v8162_v53  ;;  %v8168_v50 = vpop.eup %6989 }
 0x34a   : > { %6997 = vpow2.f32 %v1621_v21  ;;  %9737 = vst [vmem:[#allocation19_spill] sm:$0xff] %v8168_v50  ;;  %v8170_v12 = vpop.eup %6991  ;;  %v6459_v21 = vpack.c.bf16 %v6773_v47, %v6772_v38 }
 0x34b   : > { %6999 = vpow2.f32 %v1623_v11  ;;  %v1625_v57 = vmul.f32 1.442695, %v1598_v51  ;;  %9738 = vst [vmem:[#allocation20_spill] sm:$0xff] %v8170_v12  ;;  %v8174_v43 = vpop.eup %6993  ;;  %v2005_v11 = vpop.permute.xlu1 %2004  ;;  %v6778_v51 = vunpack.i.h.bf16 %v6776_v24 }
 0x34c   : > { %5838 = vmatmul.mubr.f32.gmra.mrb[36].mxu1 %v8168_v50  ;;  %v1586_v61 = vpop.xlane.xlu0 %1585  ;;  %9739 = vst [vmem:[#allocation21_spill] sm:$0xff] %v8174_v43 }
 0x34d   : > { %7001 = vpow2.f32 %v1625_v57  ;;  %5840 = vmatprep.mubr.f32.mxu1 %v8170_v12  ;;  %v1602_v4 = vsub.f32 %v8012_v60, %v1586_v61  ;;  %v6465_v60 = vpack.c.bf16 %v6778_v51, %v6777_v26 }
 0x34e   : > { %7003 = vpow2.f32 %v1627_v63 }
 0x34f   : > { %7005 = vpow2.f32 %v1629_v62  ;;  %v1633_v62 = vmul.f32 1.442695, %v1602_v4 }
 0x350   : > { %5841 = vmatmul.mubr.f32.gmra.mrb[38].mxu1 %v8174_v43  ;;  %v6766_v35 = vpop.permute.xlu0 %6765 }
 0x351   : > { %v6768_v5 = vunpack.i.h.bf16 %v6766_v35  ;;  %v6767_v32 = vunpack.i.l.bf16 %v6766_v35 }
 0x353   : > { %v8177_v28 = vpop.eup %6995  ;;  %v6453_v25 = vpack.c.bf16 %v6768_v5, %v6767_v32 }
 0x354   : > { %9740 = vst [vmem:[#allocation22_spill] sm:$0xff] %v8177_v28  ;;  %v8179_v27 = vpop.eup %6997  ;;  %5843 = vmatprep.mubr.f32.mxu1 %v8177_v28  ;;  %v2011_v42 = vpop.permute.xlu0 %2010 }
 0x355   : > { %9741 = vst [vmem:[#allocation23_spill] sm:$0xff] %v8179_v27  ;;  %v8182_v34 = vpop.eup %6999  ;;  %5844 = vmatmul.mubr.f32.gmra.mrb[40].mxu1 %v8179_v27  ;;  %6455 = vmatprep.subr.msk.bf16.mxu1 %vm7701_vm1, %v6453_v25 }
 0x356   : > { %9742 = vst [vmem:[#allocation24_spill] sm:$0xff] %v8182_v34  ;;  %5846 = vmatprep.mubr.f32.mxu1 %v8182_v34  ;;  %6458 = vmatpush3.bf16.xpose.msk.msra.mxu1 %vm7701_vm1, %v6453_v25 }
 0x357   : > { %v8190_v15 = vpop.eup %7001  ;;  %6461 = vmatprep.subr.msk.bf16.mxu1 %vm7701_vm1, %v6459_v21 }
 0x358   : > { %9743 = vst [vmem:[#allocation25_spill] sm:$0xff] %v8190_v15  ;;  %v2015_v6 = vpop.permute.xlu0 %2014  ;;  %v8195_v39 = vpop.eup %7003 }
 0x359   : > { %9744 = vst [vmem:[#allocation26_spill] sm:$0xff] %v8195_v39  ;;  %5847 = vmatmul.mubr.f32.gmra.mrb[42].mxu1 %v8190_v15  ;;  %v1584_v63 = vpop.xlane.xlu1 %1583  ;;  %v8200_v35 = vpop.eup %7005 }
 0x35a   : > { %v1601_v57 = vsub.f32 %v8014_v2, %v1584_v63  ;;  %5849 = vmatprep.mubr.f32.mxu1 %v8195_v39  ;;  %9745 = vst [vmem:[#allocation27_spill] sm:$0xff] %v8200_v35 }
 0x35c   : > { %v1631_v47 = vmul.f32 1.442695, %v1601_v57  ;;  %v2019_v61 = vpop.permute.xlu0 %2018 }
 0x35d   : > { %5850 = vmatmul.mubr.f32.gmra.mrb[44].mxu1 %v8200_v35  ;;  %v2007_v38 = vpop.permute.xlu1 %2006 }
 0x35e   : > { %7007 = vpow2.f32 %v1631_v47  ;;  %6464 = vmatpush3.bf16.xpose.msk.msra.mxu1 %vm7701_vm1, %v6459_v21 }
 0x35f   : > { %7009 = vpow2.f32 %v1633_v62  ;;  %6467 = vmatprep.subr.msk.bf16.mxu1 %vm7701_vm1, %v6465_v60 }
 0x360   : > { %v2023_v24 = vpop.permute.xlu0 %2022 }
 0x361   : > { %v2009_v2 = vpop.permute.xlu1 %2008 }
 0x364   : > { %v2027_v4 = vpop.permute.xlu0 %2026 }
 0x365   : > { %v2013_v5 = vpop.permute.xlu1 %2012 }
 0x366   : > { %6470 = vmatpush3.bf16.xpose.msk.msra.mxu1 %vm7701_vm1, %v6465_v60 }
 0x368   : > { %v8209_v32 = vpop.eup %7007  ;;  %v2031_v26 = vpop.permute.xlu0 %2030 }
 0x369   : > { %9746 = vst [vmem:[#allocation28_spill] sm:$0xff] %v8209_v32  ;;  %v8211_v25 = vpop.eup %7009  ;;  %5852 = vmatprep.mubr.f32.mxu1 %v8209_v32  ;;  %v2017_v51 = vpop.permute.xlu1 %2016 }
 0x36a   : > { %9747 = vst [vmem:[#allocation29_spill] sm:$0xff] %v8211_v25  ;;  %5853 = vmatmul.mubr.f32.gmra.mrb[46].mxu1 %v8211_v25 }
 0x36b   : > { %5887 = vmatprep.mubr.msk.f32.mxu1 %vm1313_vm0, %v2005_v11 }
 0x36c   : > { %v2035_v57 = vpop.permute.xlu0 %2034 }
 0x36d   : > { %v2021_v21 = vpop.permute.xlu1 %2020 }
 0x36e   : > { %5888 = vmatmul.mubr.msk.f32.vlgmr.msra.gmra.mrb[48].mxu1 %vm1313_vm0, %v2007_v38 }
 0x36f   : > { %5890 = vmatprep.mubr.msk.f32.mxu1 %vm1313_vm0, %v2009_v2 }
 0x370   : > { %v6786_v11 = vpop.permute.xlu0 %6785 }
 0x371   : > { %v2025_v63 = vpop.permute.xlu1 %2024  ;;  %v6788_v60 = vunpack.i.h.bf16 %v6786_v11  ;;  %v6787_v38 = vunpack.i.l.bf16 %v6786_v11 }
 0x372   : > { %5891 = vmatmul.mubr.msk.f32.gmra.mrb[50].mxu1 %vm1313_vm0, %v2011_v42 }
 0x373   : > { %5893 = vmatprep.mubr.msk.f32.mxu1 %vm1313_vm0, %v2013_v5  ;;  %v6475_v5 = vpack.c.bf16 %v6788_v60, %v6787_v38 }
 0x375   : > { %v2029_v62 = vpop.permute.xlu1 %2028 }
 0x376   : > { %5894 = vmatmul.mubr.msk.f32.gmra.mrb[52].mxu1 %vm1313_vm0, %v2015_v6 }
 0x377   : > { %5896 = vmatprep.mubr.msk.f32.mxu1 %vm1313_vm0, %v2017_v51 }
 0x379   : > { %v2033_v47 = vpop.permute.xlu1 %2032 }
 0x37a   : > { %5897 = vmatmul.mubr.msk.f32.gmra.mrb[54].mxu1 %vm1313_vm0, %v2019_v61  ;;  %v6796_v61 = vpop.permute.xlu0 %6795 }
 0x37b   : > { %5899 = vmatprep.mubr.msk.f32.mxu1 %vm1313_vm0, %v2021_v21  ;;  %v6798_v21 = vunpack.i.h.bf16 %v6796_v61  ;;  %v6797_v11 = vunpack.i.l.bf16 %v6796_v61 }
 0x37d   : > { %v6781_v2 = vpop.permute.xlu1 %6780 }
 0x37e   : > { %v6783_v35 = vunpack.i.h.bf16 %v6781_v2  ;;  %v6782_v15 = vunpack.i.l.bf16 %v6781_v2  ;;  %5900 = vmatmul.mubr.msk.f32.gmra.mrb[56].mxu1 %vm1313_vm0, %v2023_v24 }
 0x37f   : > { %5902 = vmatprep.mubr.msk.f32.mxu1 %vm1313_vm0, %v2025_v63  ;;  %v6483_v63 = vpack.c.bf16 %v6798_v21, %v6797_v11 }
 0x380   : > { %v6471_v42 = vpack.c.bf16 %v6783_v35, %v6782_v15 }
 0x381   : > { %v6791_v6 = vpop.permute.xlu1 %6790 }
 0x382   : > { %v6793_v27 = vunpack.i.h.bf16 %v6791_v6  ;;  %v6792_v51 = vunpack.i.l.bf16 %v6791_v6  ;;  %5903 = vmatmul.mubr.msk.f32.gmra.mrb[58].mxu1 %vm1313_vm0, %v2027_v4  ;;  %6472 = vmatprep.subr.bf16.mxu0 %v6471_v42  ;;  %v6806_v4 = vpop.permute.xlu0 %6805 }
 0x383   : > { %5905 = vmatprep.mubr.msk.f32.mxu1 %vm1313_vm0, %v2029_v62  ;;  %6474 = vmatpush3.bf16.msra.mxu0 %v6471_v42  ;;  %v6808_v62 = vunpack.i.h.bf16 %v6806_v4  ;;  %v6807_v60 = vunpack.i.l.bf16 %v6806_v4 }
 0x384   : > { %6476 = vmatprep.subr.bf16.mxu0 %v6475_v5  ;;  %v6479_v2 = vpack.c.bf16 %v6793_v27, %v6792_v51 }
 0x385   : > { %v6801_v24 = vpop.permute.xlu1 %6800  ;;  %v6491_v6 = vpack.c.bf16 %v6808_v62, %v6807_v60 }
 0x386   : > { %5906 = vmatmul.mubr.msk.f32.gmra.mrb[60].mxu1 %vm1313_vm0, %v2031_v26  ;;  %v6803_v15 = vunpack.i.h.bf16 %v6801_v24  ;;  %v6802_v35 = vunpack.i.l.bf16 %v6801_v24 }
 0x387   : > { %5908 = vmatprep.mubr.msk.f32.mxu1 %vm1313_vm0, %v2033_v47  ;;  %6478 = vmatpush3.bf16.msra.mxu0 %v6475_v5  ;;  %v6816_v47 = vpop.permute.xlu0 %6815 }
 0x388   : > { %6480 = vmatprep.subr.bf16.mxu0 %v6479_v2  ;;  %v6487_v38 = vpack.c.bf16 %v6803_v15, %v6802_v35  ;;  %v6818_v5 = vunpack.i.h.bf16 %v6816_v47  ;;  %v6817_v51 = vunpack.i.l.bf16 %v6816_v47 }
 0x389   : > { %v6811_v42 = vpop.permute.xlu1 %6810 }
 0x38a   : > { %5909 = vmatmul.mubr.msk.f32.gmra.mrb[62].mxu1 %vm1313_vm0, %v2035_v57  ;;  %v6813_v27 = vunpack.i.h.bf16 %v6811_v42  ;;  %v6812_v26 = vunpack.i.l.bf16 %v6811_v42  ;;  %v6499_v57 = vpack.c.bf16 %v6818_v5, %v6817_v51 }
 0x38b   : > { %6482 = vmatpush3.bf16.msra.mxu0 %v6479_v2 }
 0x38c   : > { %6484 = vmatprep.subr.bf16.mxu0 %v6483_v63  ;;  %v6495_v61 = vpack.c.bf16 %v6813_v27, %v6812_v26 }
 0x38d   : > { %v6821_v21 = vpop.permute.xlu1 %6820 }
 0x38e   : > { %v6823_v11 = vunpack.i.h.bf16 %v6821_v21  ;;  %v6822_v2 = vunpack.i.l.bf16 %v6821_v21 }
 0x38f   : > { %6486 = vmatpush3.bf16.msra.mxu0 %v6483_v63 }
 0x390   : > { %6488 = vmatprep.subr.bf16.mxu0 %v6487_v38  ;;  %v8231_v24 = vpack.c.bf16 %v6823_v11, %v6822_v2 }
 0x393   : > { %6490 = vmatpush3.bf16.msra.mxu0 %v6487_v38 }
 0x394   : > { %6492 = vmatprep.subr.bf16.mxu0 %v6491_v6 }
 0x397   : > { %6494 = vmatpush3.bf16.msra.mxu0 %v6491_v6 }
 0x398   : > { %6496 = vmatprep.subr.bf16.mxu0 %v6495_v61 }
 0x39b   : > { %6498 = vmatpush3.bf16.msra.mxu0 %v6495_v61 }
 0x39c   : > { %6500 = vmatprep.subr.bf16.mxu0 %v6499_v57 }
 0x39f   : > { %6502 = vmatpush3.bf16.msra.mxu0 %v6499_v57 }
 0x3a0   : > { %6505 = vmatprep.subr.msk.bf16.mxu0 %vm7701_vm1, %v8231_v24 }
 0x3e7   : > { %v8236_v15 = vpop.f32.mrb[32].mxu1 }
 0x3e8   : > { %9748 = vst [vmem:[#allocation30_spill] sm:$0xff] %v8236_v15  ;;  %v8238_v35 = vpop.f32.mrb[33].mxu1 }
 0x3e9   : > { %9749 = vst [vmem:[#allocation31_spill] sm:$0xff] %v8238_v35  ;;  %v8368_v35 = vpop.permute.xlu0 %6835 }
 0x41b   : > { %v8240_v63 = vpop.f32.mrb[34].mxu1 }
 0x41c   : > { %9750 = vst [vmem:[#allocation32_spill] sm:$0xff] %v8240_v63  ;;  %v8242_v4 = vpop.f32.mrb[35].mxu1 }
 0x41d   : > { %9751 = vst [vmem:[#allocation33_spill] sm:$0xff] %v8242_v4 }
 0x41f   : > { %v8244_v62 = vpop.f32.mrb[36].mxu1 }
 0x420   : > { %9752 = vst [vmem:[#allocation34_spill] sm:$0xff] %v8244_v62  ;;  %v8246_v60 = vpop.f32.mrb[37].mxu1 }
 0x421   : > { %9753 = vst [vmem:[#allocation35_spill] sm:$0xff] %v8246_v60  ;;  %v6826_v60 = vpop.permute.xlu1 %6825 }
 0x423   : > { %v8248_v38 = vpop.f32.mrb[38].mxu1 }
 0x424   : > { %9754 = vst [vmem:[#allocation36_spill] sm:$0xff] %v8248_v38  ;;  %v8250_v42 = vpop.f32.mrb[39].mxu1 }
 0x425   : > { %9755 = vst [vmem:[#allocation37_spill] sm:$0xff] %v8250_v42  ;;  %v6831_v4 = vpop.permute.xlu1 %6830 }
 0x428   : > { %v8252_v27 = vpop.f32.mrb[40].mxu1 }
 0x429   : > { %9756 = vst [vmem:[#allocation38_spill] sm:$0xff] %v8252_v27  ;;  %v8254_v26 = vpop.f32.mrb[41].mxu1 }
 0x42a   : > { %9757 = vst [vmem:[#allocation39_spill] sm:$0xff] %v8254_v26 }
 0x42c   : > { %v8256_v6 = vpop.f32.mrb[42].mxu1 }
 0x42d   : > { %9758 = vst [vmem:[#allocation40_spill] sm:$0xff] %v8256_v6  ;;  %v8258_v47 = vpop.f32.mrb[43].mxu1 }
 0x42e   : > { %9759 = vst [vmem:[#allocation41_spill] sm:$0xff] %v8258_v47 }
 0x430   : > { %v8260_v5 = vpop.f32.mrb[44].mxu1 }
 0x431   : > { %9760 = vst [vmem:[#allocation42_spill] sm:$0xff] %v8260_v5  ;;  %v8262_v51 = vpop.f32.mrb[45].mxu1 }
 0x432   : > { %9761 = vst [vmem:[#allocation43_spill] sm:$0xff] %v8262_v51 }
 0x43d   : > { %v8264_v61 = vpop.f32.mrb[46].mxu1 }
 0x43e   : > { %9762 = vst [vmem:[#allocation44_spill] sm:$0xff] %v8264_v61  ;;  %v8266_v21 = vpop.f32.mrb[47].mxu1 }
 0x43f   : > { %9763 = vst [vmem:[#allocation45_spill] sm:$0xff] %v8266_v21 }
 0x441   : > { %v8268_v57 = vpop.f32.mrb[48].mxu1 }
 0x442   : > { %2295 = vmax.xlane.f32.xlu1 %v8268_v57  ;;  %v8271_v11 = vpop.f32.mrb[49].mxu1 }
 0x443   : > { %2293 = vmax.xlane.f32.xlu0 %v8271_v11 }
 0x445   : > { %v8274_v2 = vpop.f32.mrb[50].mxu1 }
 0x446   : > { %2299 = vmax.xlane.f32.xlu1 %v8274_v2  ;;  %v8277_v6 = vpop.f32.mrb[51].mxu1 }
 0x447   : > { %2297 = vmax.xlane.f32.xlu0 %v8277_v6 }
 0x449   : > { %v8280_v5 = vpop.f32.mrb[52].mxu1 }
 0x44a   : > { %v8282_v27 = vpop.f32.mrb[53].mxu1 }
 0x44b   : > { %2303 = vmax.xlane.f32.xlu0 %v8280_v5 }
 0x44d   : > { %v8285_v61 = vpop.f32.mrb[54].mxu1 }
 0x44e   : > { %v8287_v38 = vpop.f32.mrb[55].mxu1 }
 0x44f   : > { %2301 = vmax.xlane.f32.xlu0 %v8282_v27 }
 0x451   : > { %v8290_v21 = vpop.f32.mrb[56].mxu1 }
 0x452   : > { %v8292_v62 = vpop.f32.mrb[57].mxu1 }
 0x453   : > { %2307 = vmax.xlane.f32.xlu0 %v8285_v61 }
 0x455   : > { %v8295_v51 = vpop.f32.mrb[58].mxu1 }
 0x456   : > { %2315 = vmax.xlane.f32.xlu1 %v8295_v51  ;;  %v8298_v63 = vpop.f32.mrb[59].mxu1 }
 0x457   : > { %2305 = vmax.xlane.f32.xlu0 %v8287_v38 }
 0x459   : > { %v8301_v47 = vpop.f32.mrb[60].mxu1 }
 0x45a   : > { %2319 = vmax.xlane.f32.xlu1 %v8301_v47  ;;  %v8304_v15 = vpop.f32.mrb[61].mxu1 }
 0x45b   : > { %2311 = vmax.xlane.f32.xlu0 %v8290_v21 }
 0x45d   : > { %v8307_v26 = vpop.f32.mrb[62].mxu1 }
 0x45e   : > { %v8309_v42 = vpop.f32.mrb[63].mxu1 }
 0x45f   : > { %2309 = vmax.xlane.f32.xlu0 %v8292_v62 }
 0x463   : > { %2313 = vmax.xlane.f32.xlu0 %v8298_v63 }
 0x467   : > { %2317 = vmax.xlane.f32.xlu0 %v8304_v15 }
 0x46b   : > { %6850 = vrot.lane.b32.xlu1 %v7790_v52, %s7300_s23  ;;  %2323 = vmax.xlane.f32.xlu0 %v8307_v26 }
 0x46f   : > { %6855 = vrot.lane.b32.xlu1 %v7804_v1, %s7300_s23 }
 0x473   : > { %2871 = vrot.lane.b32.xlu1 %v7718_v56, %s7300_s23 }
 0x481   : > { %6845 = vrot.lane.b32.xlu0 %v7780_v37, %s7300_s23 }
 0x485   : > { %2877 = vrot.lane.b32.xlu0 %v7852_v14, %s7300_s23 }
 0x489   : > { %2881 = vrot.lane.b32.xlu0 %v7870_v22, %s7300_s23 }
 0x48d   : > { %2885 = vrot.lane.b32.xlu0 %v7888_v29, %s7300_s23 }
 0x491   : > { %2889 = vrot.lane.b32.xlu0 %v7906_v36, %s7300_s23 }
 0x495   : > { %2893 = vrot.lane.b32.xlu0 %v7924_v44, %s7300_s23 }
 0x497   : > { %2321 = vmax.xlane.f32.xlu1 %v8309_v42 }
 0x499   : > { %2897 = vrot.lane.b32.xlu0 %v7933_v54, %s7300_s23 }
 0x49d   : > { %2901 = vrot.lane.b32.xlu0 %v7951_v0, %s7300_s23 }
 0x4a1   : > { %6865 = vrot.lane.b32.xlu0 %v8060_v40, %s7300_s23 }
 0x4a5   : > { %6875 = vrot.lane.b32.xlu0 %v8068_v8, %s7300_s23 }
 0x4a8   : > { %2873 = vrot.lane.b32.xlu1 %v7834_v9, %s7300_s23 }
 0x4a9   : > { %6885 = vrot.lane.b32.xlu0 %v8076_v16, %s7300_s23 }
 0x4ac   : > { %2875 = vrot.lane.b32.xlu1 %v7832_v7, %s7300_s23 }
 0x4ad   : > { %6895 = vrot.lane.b32.xlu0 %v8088_v31, %s7300_s23 }
 0x4b0   : > { %2879 = vrot.lane.b32.xlu1 %v7845_v45, %s7300_s23 }
 0x4b1   : > { %6915 = vrot.lane.b32.xlu0 %v7754_v17, %s7301_s15  ;;  %v8366_v17 = vpop.permute.xlu1 %6840 }
 0x4b4   : > { %2883 = vrot.lane.b32.xlu1 %v7863_v10, %s7300_s23 }
 0x4b8   : > { %2887 = vrot.lane.b32.xlu1 %v7881_v20, %s7300_s23 }
 0x4bc   : > { %2891 = vrot.lane.b32.xlu1 %v7899_v30, %s7300_s23 }
 0x4c0   : > { %2895 = vrot.lane.b32.xlu1 %v7917_v41, %s7300_s23 }
 0x4c4   : > { %2899 = vrot.lane.b32.xlu1 %v7938_v55, %s7300_s23 }
 0x4c8   : > { %6860 = vrot.lane.b32.xlu1 %v8080_v19, %s7300_s23 }
 0x4cc   : > { %6870 = vrot.lane.b32.xlu1 %v8092_v33, %s7300_s23 }
 0x4cf   : > { %v2296_v25 = vpop.xlane.xlu1 %2295 }
 0x4d0   : > { %v2326_v43 = vsub.f32 %v8268_v57, %v2296_v25  ;;  %v2294_v32 = vpop.xlane.xlu0 %2293  ;;  %6880 = vrot.lane.b32.xlu1 %v8101_v13, %s7300_s23 }
 0x4d1   : > { %v2325_v50 = vsub.f32 %v8271_v11, %v2294_v32  ;;  %v6827_v32 = vunpack.i.l.bf16 %v6826_v60 }
 0x4d2   : > { %v2343_v39 = vmul.f32 1.442695, %v2326_v43 }
 0x4d3   : > { %v2341_v49 = vmul.f32 1.442695, %v2325_v50  ;;  %v2300_v34 = vpop.xlane.xlu1 %2299 }
 0x4d4   : > { %v2328_v28 = vsub.f32 %v8274_v2, %v2300_v34  ;;  %v2298_v12 = vpop.xlane.xlu0 %2297  ;;  %6890 = vrot.lane.b32.xlu1 %v8111_v18, %s7300_s23  ;;  %v6828_v34 = vunpack.i.h.bf16 %v6826_v60 }
 0x4d5   : > { %7011 = vpow2.f32 %v2341_v49  ;;  %v2327_v53 = vsub.f32 %v8277_v6, %v2298_v12  ;;  %v6833_v6 = vunpack.i.h.bf16 %v6831_v4 }
 0x4d6   : > { %7013 = vpow2.f32 %v2343_v39  ;;  %v2347_v25 = vmul.f32 1.442695, %v2328_v28 }
 0x4d7   : > { %v2345_v57 = vmul.f32 1.442695, %v2327_v53 }
 0x4d8   : > { %v2304_v59 = vpop.xlane.xlu0 %2303  ;;  %6900 = vrot.lane.b32.xlu1 %v7707_v48, %s7301_s15 }
 0x4d9   : > { %7015 = vpow2.f32 %v2345_v57  ;;  %v2330_v50 = vsub.f32 %v8280_v5, %v2304_v59  ;;  %v6509_v59 = vpack.c.bf16 %v6828_v34, %v6827_v32  ;;  %v6832_v5 = vunpack.i.l.bf16 %v6831_v4 }
 0x4da   : > { %7017 = vpow2.f32 %v2347_v25  ;;  %v6837_v34 = vunpack.i.l.bf16 %v8368_v35 }
 0x4db   : > { %v2351_v12 = vmul.f32 1.442695, %v2330_v50  ;;  %v6515_v25 = vpack.c.bf16 %v6833_v6, %v6832_v5 }
 0x4dc   : > { %v2302_v43 = vpop.xlane.xlu0 %2301  ;;  %6905 = vrot.lane.b32.xlu1 %v7720_v58, %s7301_s15 }
 0x4dd   : > { %v2329_v49 = vsub.f32 %v8282_v27, %v2302_v43 }
 0x4df   : > { %v8386_v39 = vpop.eup %7011  ;;  %v2349_v53 = vmul.f32 1.442695, %v2329_v49 }
 0x4e0   : > { %v8388_v28 = vpop.eup %7013  ;;  %5943 = vmatprep.mubr.f32.mxu0 %v8386_v39  ;;  %v2308_v48 = vpop.xlane.xlu0 %2307  ;;  %6910 = vrot.lane.b32.xlu1 %v7735_v3, %s7301_s15 }
 0x4e1   : > { %7019 = vpow2.f32 %v2349_v53  ;;  %5944 = vmatmul.mubr.f32.vlgmr.msra.gmra.mrb[32].mxu0 %v8388_v28  ;;  %v2332_v58 = vsub.f32 %v8285_v61, %v2308_v48 }
 0x4e2   : > { %7021 = vpow2.f32 %v2351_v12  ;;  %6508 = vmatpush3.bf16.xpose.msk.msra.mxu0 %vm7701_vm1, %v8231_v24 }
 0x4e3   : > { %v8398_v60 = vpop.eup %7015  ;;  %6511 = vmatprep.subr.msk.bf16.mxu0 %vm7701_vm1, %v6509_v59  ;;  %v2355_v24 = vmul.f32 1.442695, %v2332_v58  ;;  %v2316_v57 = vpop.xlane.xlu1 %2315 }
 0x4e4   : > { %v8402_v27 = vpop.eup %7017  ;;  %5946 = vmatprep.mubr.f32.mxu0 %v8398_v60  ;;  %v2306_v3 = vpop.xlane.xlu0 %2305  ;;  %6920 = vrot.lane.b32.xlu1 %v7761_v23, %s7301_s15 }
 0x4e5   : > { %9764 = vst [vmem:[#allocation46_spill] sm:$0xff] %v8402_v27  ;;  %v2331_v61 = vsub.f32 %v8287_v38, %v2306_v3  ;;  %5947 = vmatmul.mubr.f32.gmra.mrb[34].mxu0 %v8402_v27  ;;  %v6838_v38 = vunpack.i.h.bf16 %v8368_v35 }
 0x4e7   : > { %v2353_v11 = vmul.f32 1.442695, %v2331_v61  ;;  %v2320_v12 = vpop.xlane.xlu1 %2319  ;;  %v6842_v61 = vunpack.i.l.bf16 %v8366_v17 }
 0x4e8   : > { %v2312_v2 = vpop.xlane.xlu0 %2311  ;;  %v2338_v6 = vsub.f32 %v8301_v47, %v2320_v12 }
 0x4e9   : > { %7023 = vpow2.f32 %v2353_v11  ;;  %v2334_v50 = vsub.f32 %v8290_v21, %v2312_v2  ;;  %v2336_v21 = vsub.f32 %v8295_v51, %v2316_v57 }
 0x4ea   : > { %7025 = vpow2.f32 %v2355_v24  ;;  %6514 = vmatpush3.bf16.xpose.msk.msra.mxu0 %vm7701_vm1, %v6509_v59  ;;  %v6521_v59 = vpack.c.bf16 %v6838_v38, %v6837_v34  ;;  %v2367_v24 = vmul.f32 1.442695, %v2338_v6 }
 0x4eb   : > { %v8412_v43 = vpop.eup %7019  ;;  %6517 = vmatprep.subr.msk.bf16.mxu0 %vm7701_vm1, %v6515_v25  ;;  %v2359_v49 = vmul.f32 1.442695, %v2334_v50  ;;  %v2363_v3 = vmul.f32 1.442695, %v2336_v21  ;;  %v6851_v21 = vpop.permute.xlu1 %6850 }
 0x4ec   : > { %v8416_v23 = vpop.eup %7021  ;;  %5949 = vmatprep.mubr.f32.mxu0 %v8412_v43  ;;  %v2310_v4 = vpop.xlane.xlu0 %2309 }
 0x4ed   : > { %9765 = vst [vmem:[#allocation47_spill] sm:$0xff] %v8416_v23  ;;  %v2333_v32 = vsub.f32 %v8292_v62, %v2310_v4  ;;  %5950 = vmatmul.mubr.f32.gmra.mrb[36].mxu0 %v8416_v23 }
 0x4ef   : > { %v2357_v53 = vmul.f32 1.442695, %v2333_v32 }
 0x4f0   : > { %v2314_v48 = vpop.xlane.xlu0 %2313 }
 0x4f1   : > { %7027 = vpow2.f32 %v2357_v53  ;;  %v2335_v58 = vsub.f32 %v8298_v63, %v2314_v48  ;;  %v6843_v63 = vunpack.i.h.bf16 %v8366_v17  ;;  %v6853_v53 = vunpack.i.h.bf16 %v6851_v21 }
 0x4f2   : > { %7029 = vpow2.f32 %v2359_v49  ;;  %6520 = vmatpush3.bf16.xpose.msk.msra.mxu0 %vm7701_vm1, %v6515_v25  ;;  %v6852_v48 = vunpack.i.l.bf16 %v6851_v21 }
 0x4f3   : > { %v8428_v35 = vpop.eup %7023  ;;  %v2361_v62 = vmul.f32 1.442695, %v2335_v58  ;;  %6523 = vmatprep.subr.msk.bf16.mxu0 %vm7701_vm1, %v6521_v59  ;;  %v6527_v25 = vpack.c.bf16 %v6843_v63, %v6842_v61  ;;  %v6856_v58 = vpop.permute.xlu1 %6855 }
 0x4f4   : > { %v8432_v51 = vpop.eup %7025  ;;  %5952 = vmatprep.mubr.f32.mxu0 %v8428_v35  ;;  %v2318_v5 = vpop.xlane.xlu0 %2317  ;;  %v6857_v6 = vunpack.i.l.bf16 %v6856_v58 }
 0x4f5   : > { %9766 = vst [vmem:[#allocation48_spill] sm:$0xff] %v8432_v51  ;;  %7031 = vpow2.f32 %v2361_v62  ;;  %v2337_v47 = vsub.f32 %v8304_v15, %v2318_v5  ;;  %5953 = vmatmul.mubr.f32.gmra.mrb[38].mxu0 %v8432_v51 }
 0x4f6   : > { %7033 = vpow2.f32 %v2363_v3  ;;  %v6858_v3 = vunpack.i.h.bf16 %v6856_v58 }
 0x4f7   : > { %v2365_v11 = vmul.f32 1.442695, %v2337_v47  ;;  %v2872_v63 = vpop.permute.xlu1 %2871 }
 0x4f8   : > { %v2324_v2 = vpop.xlane.xlu0 %2323  ;;  %v6545_v62 = vpack.c.bf16 %v6858_v3, %v6857_v6 }
 0x4f9   : > { %7035 = vpow2.f32 %v2365_v11  ;;  %v2340_v61 = vsub.f32 %v8307_v26, %v2324_v2 }
 0x4fa   : > { %7037 = vpow2.f32 %v2367_v24  ;;  %6526 = vmatpush3.bf16.xpose.msk.msra.mxu0 %vm7701_vm1, %v6521_v59  ;;  %v6539_v59 = vpack.c.bf16 %v6853_v53, %v6852_v48 }
 0x4fb   : > { %v8441_v57 = vpop.eup %7027  ;;  %6529 = vmatprep.subr.msk.bf16.mxu0 %vm7701_vm1, %v6527_v25 }
 0x4fc   : > { %v8445_v17 = vpop.eup %7029  ;;  %5955 = vmatprep.mubr.f32.mxu0 %v8441_v57  ;;  %v6846_v15 = vpop.permute.xlu0 %6845 }
 0x4fd   : > { %9767 = vst [vmem:[#allocation49_spill] sm:$0xff] %v8445_v17  ;;  %v6848_v50 = vunpack.i.h.bf16 %v6846_v15  ;;  %v6847_v4 = vunpack.i.l.bf16 %v6846_v15  ;;  %5956 = vmatmul.mubr.f32.gmra.mrb[40].mxu0 %v8445_v17 }
 0x4ff   : > { %v8449_v38 = vpop.eup %7031  ;;  %v6533_v34 = vpack.c.bf16 %v6848_v50, %v6847_v4 }
 0x500   : > { %9768 = vst [vmem:[#allocation50_spill] sm:$0xff] %v8449_v38  ;;  %v8451_v32 = vpop.eup %7033  ;;  %5958 = vmatprep.mubr.f32.mxu0 %v8449_v38  ;;  %v2878_v5 = vpop.permute.xlu0 %2877 }
 0x501   : > { %9769 = vst [vmem:[#allocation51_spill] sm:$0xff] %v8451_v32  ;;  %5959 = vmatmul.mubr.f32.gmra.mrb[42].mxu0 %v8451_v32 }
 0x502   : > { %6532 = vmatpush3.bf16.xpose.msk.msra.mxu0 %vm7701_vm1, %v6527_v25  ;;  %v2371_v25 = vmul.f32 1.442695, %v2340_v61 }
 0x503   : > { %v8457_v49 = vpop.eup %7035  ;;  %6535 = vmatprep.subr.msk.bf16.mxu0 %vm7701_vm1, %v6533_v34 }
 0x504   : > { %9770 = vst [vmem:[#allocation52_spill] sm:$0xff] %v8457_v49  ;;  %v8461_v12 = vpop.eup %7037  ;;  %5961 = vmatprep.mubr.f32.mxu0 %v8457_v49  ;;  %v2882_v47 = vpop.permute.xlu0 %2881 }
 0x505   : > { %9771 = vst [vmem:[#allocation53_spill] sm:$0xff] %v8461_v12  ;;  %5962 = vmatmul.mubr.f32.gmra.mrb[44].mxu0 %v8461_v12 }
 0x508   : > { %v2886_v50 = vpop.permute.xlu0 %2885 }
 0x50a   : > { %6538 = vmatpush3.bf16.xpose.msk.msra.mxu0 %vm7701_vm1, %v6533_v34 }
 0x50b   : > { %6541 = vmatprep.subr.msk.bf16.mxu0 %vm7701_vm1, %v6539_v59 }
 0x50c   : > { %v2890_v21 = vpop.permute.xlu0 %2889 }
 0x510   : > { %v2894_v58 = vpop.permute.xlu0 %2893 }
 0x512   : > { %6544 = vmatpush3.bf16.xpose.msk.msra.mxu0 %vm7701_vm1, %v6539_v59 }
 0x513   : > { %6547 = vmatprep.subr.msk.bf16.mxu0 %vm7701_vm1, %v6545_v62 }
 0x514   : > { %v2898_v2 = vpop.permute.xlu0 %2897 }
 0x518   : > { %v2902_v6 = vpop.permute.xlu0 %2901 }
 0x51a   : > { %6550 = vmatpush3.bf16.xpose.msk.msra.mxu0 %vm7701_vm1, %v6545_v62 }
 0x524   : > { %v2322_v24 = vpop.xlane.xlu1 %2321 }
 0x525   : > { %v2339_v11 = vsub.f32 %v8309_v42, %v2322_v24 }
 0x527   : > { %v2369_v15 = vmul.f32 1.442695, %v2339_v11 }
 0x528   : > { %v2874_v4 = vpop.permute.xlu1 %2873 }
 0x529   : > { %7039 = vpow2.f32 %v2369_v15 }
 0x52a   : > { %7041 = vpow2.f32 %v2371_v25 }
 0x52c   : > { %v2876_v34 = vpop.permute.xlu1 %2875 }
 0x530   : > { %v2880_v53 = vpop.permute.xlu1 %2879 }
 0x533   : > { %v8477_v48 = vpop.eup %7039 }
 0x534   : > { %9772 = vst [vmem:[#allocation54_spill] sm:$0xff] %v8477_v48  ;;  %v8479_v59 = vpop.eup %7041  ;;  %5964 = vmatprep.mubr.f32.mxu0 %v8477_v48  ;;  %v2884_v26 = vpop.permute.xlu1 %2883 }
 0x535   : > { %9773 = vst [vmem:[#allocation55_spill] sm:$0xff] %v8479_v59  ;;  %5965 = vmatmul.mubr.f32.gmra.mrb[46].mxu0 %v8479_v59 }
 0x536   : > { %5999 = vmatprep.mubr.msk.f32.mxu0 %vm1313_vm0, %v2872_v63  ;;  %v6866_v63 = vpop.permute.xlu0 %6865 }
 0x537   : > { %v6868_v11 = vunpack.i.h.bf16 %v6866_v63  ;;  %v6867_v25 = vunpack.i.l.bf16 %v6866_v63 }
 0x538   : > { %v2888_v42 = vpop.permute.xlu1 %2887 }
 0x539   : > { %6000 = vmatmul.mubr.msk.f32.vlgmr.msra.gmra.mrb[48].mxu0 %vm1313_vm0, %v2874_v4 }
 0x53a   : > { %6002 = vmatprep.mubr.msk.f32.mxu0 %vm1313_vm0, %v2876_v34 }
 0x53c   : > { %v2892_v3 = vpop.permute.xlu1 %2891 }
 0x53d   : > { %6003 = vmatmul.mubr.msk.f32.gmra.mrb[50].mxu0 %vm1313_vm0, %v2878_v5 }
 0x53e   : > { %6005 = vmatprep.mubr.msk.f32.mxu0 %vm1313_vm0, %v2880_v53 }
 0x540   : > { %v2896_v62 = vpop.permute.xlu1 %2895 }
 0x541   : > { %6006 = vmatmul.mubr.msk.f32.gmra.mrb[52].mxu0 %vm1313_vm0, %v2882_v47 }
 0x542   : > { %6008 = vmatprep.mubr.msk.f32.mxu0 %vm1313_vm0, %v2884_v26  ;;  %v6876_v26 = vpop.permute.xlu0 %6875 }
 0x543   : > { %v6877_v63 = vunpack.i.l.bf16 %v6876_v26 }
 0x544   : > { %v2900_v61 = vpop.permute.xlu1 %2899 }
 0x545   : > { %6009 = vmatmul.mubr.msk.f32.gmra.mrb[54].mxu0 %vm1313_vm0, %v2886_v50  ;;  %v6555_v50 = vpack.c.bf16 %v6868_v11, %v6867_v25 }
 0x546   : > { %6011 = vmatprep.mubr.msk.f32.mxu0 %vm1313_vm0, %v2888_v42  ;;  %v6878_v42 = vunpack.i.h.bf16 %v6876_v26  ;;  %v6886_v11 = vpop.permute.xlu0 %6885 }
 0x547   : > { %v6887_v25 = vunpack.i.l.bf16 %v6886_v11 }
 0x548   : > { %v6861_v24 = vpop.permute.xlu1 %6860 }
 0x549   : > { %v6863_v15 = vunpack.i.h.bf16 %v6861_v24  ;;  %v6862_v4 = vunpack.i.l.bf16 %v6861_v24  ;;  %6012 = vmatmul.mubr.msk.f32.gmra.mrb[56].mxu0 %vm1313_vm0, %v2890_v21 }
 0x54a   : > { %6014 = vmatprep.mubr.msk.f32.mxu0 %vm1313_vm0, %v2892_v3 }
 0x54b   : > { %v6551_v5 = vpack.c.bf16 %v6863_v15, %v6862_v4 }
 0x54c   : > { %v6871_v34 = vpop.permute.xlu1 %6870 }
 0x54d   : > { %v6873_v47 = vunpack.i.h.bf16 %v6871_v34  ;;  %v6872_v53 = vunpack.i.l.bf16 %v6871_v34  ;;  %6015 = vmatmul.mubr.msk.f32.gmra.mrb[58].mxu0 %vm1313_vm0, %v2894_v58  ;;  %6552 = vmatprep.subr.bf16.mxu1 %v6551_v5  ;;  %v6563_v58 = vpack.c.bf16 %v6878_v42, %v6877_v63 }
 0x54e   : > { %6017 = vmatprep.mubr.msk.f32.mxu0 %vm1313_vm0, %v2896_v62  ;;  %6554 = vmatpush3.bf16.msra.mxu1 %v6551_v5  ;;  %v6888_v62 = vunpack.i.h.bf16 %v6886_v11 }
 0x54f   : > { %6556 = vmatprep.subr.bf16.mxu1 %v6555_v50  ;;  %v6559_v21 = vpack.c.bf16 %v6873_v47, %v6872_v53 }
 0x550   : > { %v6881_v24 = vpop.permute.xlu1 %6880  ;;  %v6571_v47 = vpack.c.bf16 %v6888_v62, %v6887_v25 }
 0x551   : > { %6018 = vmatmul.mubr.msk.f32.gmra.mrb[60].mxu0 %vm1313_vm0, %v2898_v2  ;;  %v6883_v3 = vunpack.i.h.bf16 %v6881_v24  ;;  %v6882_v15 = vunpack.i.l.bf16 %v6881_v24 }
 0x552   : > { %6020 = vmatprep.mubr.msk.f32.mxu0 %vm1313_vm0, %v2900_v61  ;;  %6558 = vmatpush3.bf16.msra.mxu1 %v6555_v50  ;;  %v6896_v61 = vpop.permute.xlu0 %6895 }
 0x553   : > { %6560 = vmatprep.subr.bf16.mxu1 %v6559_v21  ;;  %v6567_v4 = vpack.c.bf16 %v6883_v3, %v6882_v15  ;;  %v6898_v53 = vunpack.i.h.bf16 %v6896_v61  ;;  %v6897_v50 = vunpack.i.l.bf16 %v6896_v61 }
 0x554   : > { %v6891_v5 = vpop.permute.xlu1 %6890 }
 0x555   : > { %6021 = vmatmul.mubr.msk.f32.gmra.mrb[62].mxu0 %vm1313_vm0, %v2902_v6  ;;  %v6893_v2 = vunpack.i.h.bf16 %v6891_v5  ;;  %v6892_v34 = vunpack.i.l.bf16 %v6891_v5 }
 0x556   : > { %6562 = vmatpush3.bf16.msra.mxu1 %v6559_v21  ;;  %v6579_v21 = vpack.c.bf16 %v6898_v53, %v6897_v50 }
 0x557   : > { %6564 = vmatprep.subr.bf16.mxu1 %v6563_v58  ;;  %v6575_v26 = vpack.c.bf16 %v6893_v2, %v6892_v34 }
 0x558   : > { %v6901_v6 = vpop.permute.xlu1 %6900 }
 0x559   : > { %v6903_v42 = vunpack.i.h.bf16 %v6901_v6  ;;  %v6902_v63 = vunpack.i.l.bf16 %v6901_v6 }
 0x55a   : > { %6566 = vmatpush3.bf16.msra.mxu1 %v6563_v58 }
 0x55b   : > { %6568 = vmatprep.subr.bf16.mxu1 %v6567_v4  ;;  %v8499_v24 = vpack.c.bf16 %v6903_v42, %v6902_v63 }
 0x55e   : > { %6570 = vmatpush3.bf16.msra.mxu1 %v6567_v4 }
 0x55f   : > { %6572 = vmatprep.subr.bf16.mxu1 %v6571_v47 }
 0x562   : > { %6574 = vmatpush3.bf16.msra.mxu1 %v6571_v47 }
 0x563   : > { %6576 = vmatprep.subr.bf16.mxu1 %v6575_v26 }
 0x566   : > { %6578 = vmatpush3.bf16.msra.mxu1 %v6575_v26 }
 0x567   : > { %6580 = vmatprep.subr.bf16.mxu1 %v6579_v21 }
 0x56a   : > { %6582 = vmatpush3.bf16.msra.mxu1 %v6579_v21 }
 0x56b   : > { %6585 = vmatprep.subr.msk.bf16.mxu1 %vm7701_vm1, %v8499_v24 }
 0x5b4   : > { %v8504_v3 = vpop.f32.mrb[32].mxu0 }
 0x5b5   : > { %v8506_v15 = vpop.f32.mrb[33].mxu0 }
 0x5b8   : > { %v8508_v58 = vpop.f32.mrb[34].mxu0 }
 0x5b9   : > { %9774 = vst [vmem:[#allocation56_spill] sm:$0xff] %v8508_v58  ;;  %v8510_v11 = vpop.f32.mrb[35].mxu0 }
 0x5c0   : > { %v8512_v62 = vpop.f32.mrb[36].mxu0 }
 0x5c1   : > { %9775 = vst [vmem:[#allocation57_spill] sm:$0xff] %v8512_v62  ;;  %v8514_v25 = vpop.f32.mrb[37].mxu0 }
 0x5c2   : > { %9776 = vst [vmem:[#allocation58_spill] sm:$0xff] %v8514_v25 }
 0x5c8   : > { %v8516_v4 = vpop.f32.mrb[38].mxu0 }
 0x5c9   : > { %9777 = vst [vmem:[#allocation59_spill] sm:$0xff] %v8516_v4  ;;  %v8518_v5 = vpop.f32.mrb[39].mxu0 }
 0x5ca   : > { %9778 = vst [vmem:[#allocation60_spill] sm:$0xff] %v8518_v5 }
 0x5d0   : > { %v8520_v2 = vpop.f32.mrb[40].mxu0 }
 0x5d1   : > { %9779 = vst [vmem:[#allocation61_spill] sm:$0xff] %v8520_v2  ;;  %v8522_v34 = vpop.f32.mrb[41].mxu0 }
 0x5d2   : > { %9780 = vst [vmem:[#allocation62_spill] sm:$0xff] %v8522_v34 }
 0x5d4   : > { %v8524_v47 = vpop.f32.mrb[42].mxu0 }
 0x5d5   : > { %9781 = vst [vmem:[#allocation63_spill] sm:$0xff] %v8524_v47  ;;  %v8526_v61 = vpop.f32.mrb[43].mxu0 }
 0x5d6   : > { %9782 = vst [vmem:[#allocation64_spill] sm:$0xff] %v8526_v61 }
 0x5d8   : > { %v8528_v53 = vpop.f32.mrb[44].mxu0 }
 0x5d9   : > { %9783 = vst [vmem:[#allocation65_spill] sm:$0xff] %v8528_v53  ;;  %v8530_v50 = vpop.f32.mrb[45].mxu0 }
 0x5da   : > { %9784 = vst [vmem:[#allocation66_spill] sm:$0xff] %v8530_v50 }
 0x608   : > { %v8532_v26 = vpop.f32.mrb[46].mxu0 }
 0x609   : > { %9785 = vst [vmem:[#allocation67_spill] sm:$0xff] %v8532_v26  ;;  %v8534_v6 = vpop.f32.mrb[47].mxu0 }
 0x60a   : > { %9786 = vst [vmem:[#allocation68_spill] sm:$0xff] %v8534_v6 }
 0x60c   : > { %v8536_v42 = vpop.f32.mrb[48].mxu0 }
 0x60d   : > { %3162 = vmax.xlane.f32.xlu1 %v8536_v42  ;;  %v8539_v63 = vpop.f32.mrb[49].mxu0 }
 0x60e   : > { %3160 = vmax.xlane.f32.xlu0 %v8539_v63 }
 0x610   : > { %v8542_v21 = vpop.f32.mrb[50].mxu0 }
 0x611   : > { %3166 = vmax.xlane.f32.xlu1 %v8542_v21  ;;  %v8545_v47 = vpop.f32.mrb[51].mxu0 }
 0x612   : > { %3164 = vmax.xlane.f32.xlu0 %v8545_v47 }
 0x614   : > { %v8548_v53 = vpop.f32.mrb[52].mxu0 }
 0x615   : > { %v8550_v26 = vpop.f32.mrb[53].mxu0 }
 0x616   : > { %3170 = vmax.xlane.f32.xlu0 %v8548_v53 }
 0x618   : > { %v8553_v6 = vpop.f32.mrb[54].mxu0 }
 0x619   : > { %v8555_v2 = vpop.f32.mrb[55].mxu0 }
 0x61a   : > { %3168 = vmax.xlane.f32.xlu0 %v8550_v26 }
 0x61c   : > { %v8558_v50 = vpop.f32.mrb[56].mxu0 }
 0x61d   : > { %v8560_v4 = vpop.f32.mrb[57].mxu0 }
 0x61e   : > { %3174 = vmax.xlane.f32.xlu0 %v8553_v6 }
 0x620   : > { %v8563_v61 = vpop.f32.mrb[58].mxu0 }
 0x621   : > { %3182 = vmax.xlane.f32.xlu1 %v8563_v61  ;;  %v8566_v62 = vpop.f32.mrb[59].mxu0 }
 0x622   : > { %3172 = vmax.xlane.f32.xlu0 %v8555_v2 }
 0x624   : > { %v8569_v34 = vpop.f32.mrb[60].mxu0 }
 0x625   : > { %3186 = vmax.xlane.f32.xlu1 %v8569_v34  ;;  %v8572_v58 = vpop.f32.mrb[61].mxu0 }
 0x626   : > { %3178 = vmax.xlane.f32.xlu0 %v8558_v50 }
 0x628   : > { %v8575_v5 = vpop.f32.mrb[62].mxu0 }
 0x629   : > { %v8577_v25 = vpop.f32.mrb[63].mxu0 }
 0x62a   : > { %3176 = vmax.xlane.f32.xlu0 %v8560_v4 }
 0x62e   : > { %3180 = vmax.xlane.f32.xlu0 %v8566_v62 }
 0x632   : > { %3184 = vmax.xlane.f32.xlu0 %v8572_v58 }
 0x636   : > { %6930 = vrot.lane.b32.xlu1 %v7790_v52, %s7301_s15  ;;  %3190 = vmax.xlane.f32.xlu0 %v8575_v5 }
 0x63a   : > { %6935 = vrot.lane.b32.xlu1 %v7804_v1, %s7301_s15  ;;  %v8632_v1 = vpop.permute.xlu0 %6915 }
 0x63e   : > { %3738 = vrot.lane.b32.xlu1 %v7718_v56, %s7301_s15  ;;  %v6906_v56 = vpop.permute.xlu1 %6905 }
 0x64c   : > { %6925 = vrot.lane.b32.xlu0 %v7780_v37, %s7301_s15  ;;  %v6911_v37 = vpop.permute.xlu1 %6910 }
 0x650   : > { %3744 = vrot.lane.b32.xlu0 %v7852_v14, %s7301_s15  ;;  %v8630_v52 = vpop.permute.xlu1 %6920 }
 0x654   : > { %3748 = vrot.lane.b32.xlu0 %v7870_v22, %s7301_s15 }
 0x658   : > { %3752 = vrot.lane.b32.xlu0 %v7888_v29, %s7301_s15 }
 0x65c   : > { %3756 = vrot.lane.b32.xlu0 %v7906_v36, %s7301_s15 }
 0x660   : > { %3760 = vrot.lane.b32.xlu0 %v7924_v44, %s7301_s15 }
 0x662   : > { %3188 = vmax.xlane.f32.xlu1 %v8577_v25 }
 0x664   : > { %3764 = vrot.lane.b32.xlu0 %v7933_v54, %s7301_s15 }
 0x668   : > { %3768 = vrot.lane.b32.xlu0 %v7951_v0, %s7301_s15 }
 0x66c   : > { %6950 = vrot.lane.b32.xlu0 %v8092_v33, %s7301_s15 }
 0x670   : > { %6960 = vrot.lane.b32.xlu0 %v8101_v13, %s7301_s15 }
 0x673   : > { %3740 = vrot.lane.b32.xlu1 %v7834_v9, %s7301_s15 }
 0x674   : > { %6965 = vrot.lane.b32.xlu0 %v8076_v16, %s7301_s15 }
 0x677   : > { %3742 = vrot.lane.b32.xlu1 %v7832_v7, %s7301_s15 }
 0x67b   : > { %3746 = vrot.lane.b32.xlu1 %v7845_v45, %s7301_s15 }
 0x67f   : > { %3750 = vrot.lane.b32.xlu1 %v7863_v10, %s7301_s15 }
 0x683   : > { %3754 = vrot.lane.b32.xlu1 %v7881_v20, %s7301_s15 }
 0x687   : > { %3758 = vrot.lane.b32.xlu1 %v7899_v30, %s7301_s15 }
 0x68b   : > { %3762 = vrot.lane.b32.xlu1 %v7917_v41, %s7301_s15 }
 0x68f   : > { %3766 = vrot.lane.b32.xlu1 %v7938_v55, %s7301_s15 }
 0x693   : > { %6940 = vrot.lane.b32.xlu1 %v8080_v19, %s7301_s15 }
 0x697   : > { %6945 = vrot.lane.b32.xlu1 %v8060_v40, %s7301_s15  ;;  %v6908_v40 = vunpack.i.h.bf16 %v6906_v56 }
 0x69a   : > { %v3163_v7 = vpop.xlane.xlu1 %3162 }
 0x69b   : > { %v3193_v9 = vsub.f32 %v8536_v42, %v3163_v7  ;;  %v3161_v45 = vpop.xlane.xlu0 %3160  ;;  %6955 = vrot.lane.b32.xlu1 %v8068_v8, %s7301_s15  ;;  %v6907_v8 = vunpack.i.l.bf16 %v6906_v56  ;;  %v6913_v56 = vunpack.i.h.bf16 %v6911_v37  ;;  %v6912_v7 = vunpack.i.l.bf16 %v6911_v37 }
 0x69c   : > { %v3192_v14 = vsub.f32 %v8539_v63, %v3161_v45 }
 0x69d   : > { %v3210_v10 = vmul.f32 1.442695, %v3193_v9  ;;  %v6589_v42 = vpack.c.bf16 %v6908_v40, %v6907_v8 }
 0x69e   : > { %v3208_v22 = vmul.f32 1.442695, %v3192_v14  ;;  %v3167_v20 = vpop.xlane.xlu1 %3166 }
 0x69f   : > { %v3195_v29 = vsub.f32 %v8542_v21, %v3167_v20  ;;  %v3165_v30 = vpop.xlane.xlu0 %3164  ;;  %6970 = vrot.lane.b32.xlu1 %v8111_v18, %s7301_s15 }
 0x6a0   : > { %7043 = vpow2.f32 %v3208_v22  ;;  %v3194_v36 = vsub.f32 %v8545_v47, %v3165_v30  ;;  %v6917_v30 = vunpack.i.l.bf16 %v8632_v1 }
 0x6a1   : > { %7045 = vpow2.f32 %v3210_v10  ;;  %v3214_v41 = vmul.f32 1.442695, %v3195_v29  ;;  %v6918_v29 = vunpack.i.h.bf16 %v8632_v1 }
 0x6a2   : > { %v3212_v44 = vmul.f32 1.442695, %v3194_v36 }
 0x6a3   : > { %v3171_v54 = vpop.xlane.xlu0 %3170 }
 0x6a4   : > { %7047 = vpow2.f32 %v3212_v44  ;;  %v3197_v55 = vsub.f32 %v8548_v53, %v3171_v54 }
 0x6a5   : > { %7049 = vpow2.f32 %v3214_v41 }
 0x6a6   : > { %v3218_v19 = vmul.f32 1.442695, %v3197_v55 }
 0x6a7   : > { %v3169_v0 = vpop.xlane.xlu0 %3168 }
 0x6a8   : > { %v3196_v16 = vsub.f32 %v8550_v26, %v3169_v0  ;;  %v6601_v0 = vpack.c.bf16 %v6918_v29, %v6917_v30 }
 0x6aa   : > { %v8646_v33 = vpop.eup %7043  ;;  %v3216_v13 = vmul.f32 1.442695, %v3196_v16 }
 0x6ab   : > { %v8648_v18 = vpop.eup %7045  ;;  %6055 = vmatprep.mubr.f32.mxu1 %v8646_v33  ;;  %v3175_v47 = vpop.xlane.xlu0 %3174 }
 0x6ac   : > { %9787 = vst [vmem:[#allocation69_spill] sm:$0xff] %v8648_v18  ;;  %7051 = vpow2.f32 %v3216_v13  ;;  %6056 = vmatmul.mubr.f32.vlgmr.msra.gmra.mrb[64].mxu1 %v8648_v18  ;;  %v3199_v53 = vsub.f32 %v8553_v6, %v3175_v47  ;;  %v6922_v13 = vunpack.i.l.bf16 %v8630_v52 }
 0x6ad   : > { %7053 = vpow2.f32 %v3218_v19  ;;  %6588 = vmatpush3.bf16.xpose.msk.msra.mxu1 %vm7701_vm1, %v8499_v24  ;;  %v6595_v24 = vpack.c.bf16 %v6913_v56, %v6912_v7 }
 0x6ae   : > { %v8656_v26 = vpop.eup %7047  ;;  %6591 = vmatprep.subr.msk.bf16.mxu1 %vm7701_vm1, %v6589_v42  ;;  %v3222_v6 = vmul.f32 1.442695, %v3199_v53  ;;  %v3183_v10 = vpop.xlane.xlu1 %3182 }
 0x6af   : > { %v8660_v63 = vpop.eup %7049  ;;  %v3173_v21 = vpop.xlane.xlu0 %3172  ;;  %6058 = vmatprep.mubr.f32.mxu1 %v8656_v26 }
 0x6b0   : > { %9788 = vst [vmem:[#allocation70_spill] sm:$0xff] %v8660_v63  ;;  %v3198_v9 = vsub.f32 %v8555_v2, %v3173_v21  ;;  %6059 = vmatmul.mubr.f32.gmra.mrb[66].mxu1 %v8660_v63 }
 0x6b2   : > { %v3220_v45 = vmul.f32 1.442695, %v3198_v9  ;;  %v3187_v44 = vpop.xlane.xlu1 %3186 }
 0x6b3   : > { %v3179_v14 = vpop.xlane.xlu0 %3178  ;;  %v3205_v16 = vsub.f32 %v8569_v34, %v3187_v44 }
 0x6b4   : > { %7055 = vpow2.f32 %v3220_v45  ;;  %v3201_v22 = vsub.f32 %v8558_v50, %v3179_v14  ;;  %v3203_v50 = vsub.f32 %v8563_v61, %v3183_v10 }
 0x6b5   : > { %7057 = vpow2.f32 %v3222_v6  ;;  %6594 = vmatpush3.bf16.xpose.msk.msra.mxu1 %vm7701_vm1, %v6589_v42  ;;  %v3234_v47 = vmul.f32 1.442695, %v3205_v16 }
 0x6b6   : > { %v8668_v20 = vpop.eup %7051  ;;  %6597 = vmatprep.subr.msk.bf16.mxu1 %vm7701_vm1, %v6595_v24  ;;  %v3226_v41 = vmul.f32 1.442695, %v3201_v22  ;;  %v3230_v8 = vmul.f32 1.442695, %v3203_v50 }
 0x6b7   : > { %v8672_v2 = vpop.eup %7053  ;;  %v3177_v37 = vpop.xlane.xlu0 %3176  ;;  %6061 = vmatprep.mubr.f32.mxu1 %v8668_v20 }
 0x6b8   : > { %9789 = vst [vmem:[#allocation71_spill] sm:$0xff] %v8672_v2  ;;  %v3200_v36 = vsub.f32 %v8560_v4, %v3177_v37  ;;  %6062 = vmatmul.mubr.f32.gmra.mrb[68].mxu1 %v8672_v2 }
 0x6ba   : > { %v3224_v54 = vmul.f32 1.442695, %v3200_v36 }
 0x6bb   : > { %v3181_v55 = vpop.xlane.xlu0 %3180 }
 0x6bc   : > { %7059 = vpow2.f32 %v3224_v54  ;;  %v3202_v40 = vsub.f32 %v8566_v62, %v3181_v55  ;;  %v6923_v62 = vunpack.i.h.bf16 %v8630_v52 }
 0x6bd   : > { %7061 = vpow2.f32 %v3226_v41  ;;  %6600 = vmatpush3.bf16.xpose.msk.msra.mxu1 %vm7701_vm1, %v6595_v24  ;;  %v6931_v24 = vpop.permute.xlu1 %6930 }
 0x6be   : > { %v8684_v4 = vpop.eup %7055  ;;  %v3228_v1 = vmul.f32 1.442695, %v3202_v40  ;;  %6603 = vmatprep.subr.msk.bf16.mxu1 %vm7701_vm1, %v6601_v0  ;;  %v6607_v21 = vpack.c.bf16 %v6923_v62, %v6922_v13  ;;  %v6933_v37 = vunpack.i.h.bf16 %v6931_v24  ;;  %v6932_v29 = vunpack.i.l.bf16 %v6931_v24 }
 0x6bf   : > { %v8688_v61 = vpop.eup %7057  ;;  %v3185_v19 = vpop.xlane.xlu0 %3184  ;;  %6064 = vmatprep.mubr.f32.mxu1 %v8684_v4 }
 0x6c0   : > { %9790 = vst [vmem:[#allocation72_spill] sm:$0xff] %v8688_v61  ;;  %7063 = vpow2.f32 %v3228_v1  ;;  %v3204_v34 = vsub.f32 %v8572_v58, %v3185_v19  ;;  %6065 = vmatmul.mubr.f32.gmra.mrb[70].mxu1 %v8688_v61  ;;  %v6619_v30 = vpack.c.bf16 %v6933_v37, %v6932_v29 }
 0x6c1   : > { %7065 = vpow2.f32 %v3230_v8  ;;  %v6936_v36 = vpop.permute.xlu1 %6935 }
 0x6c2   : > { %v3232_v42 = vmul.f32 1.442695, %v3204_v34  ;;  %v6938_v50 = vunpack.i.h.bf16 %v6936_v36  ;;  %v6937_v41 = vunpack.i.l.bf16 %v6936_v36 }
 0x6c3   : > { %v3191_v53 = vpop.xlane.xlu0 %3190 }
 0x6c4   : > { %7067 = vpow2.f32 %v3232_v42  ;;  %v6625_v44 = vpack.c.bf16 %v6938_v50, %v6937_v41 }
 0x6c5   : > { %7069 = vpow2.f32 %v3234_v47  ;;  %6606 = vmatpush3.bf16.xpose.msk.msra.mxu1 %vm7701_vm1, %v6601_v0  ;;  %v3739_v54 = vpop.permute.xlu1 %3738  ;;  %v3207_v0 = vsub.f32 %v8575_v5, %v3191_v53 }
 0x6c6   : > { %v8697_v56 = vpop.eup %7059  ;;  %6609 = vmatprep.subr.msk.bf16.mxu1 %vm7701_vm1, %v6607_v21 }
 0x6c7   : > { %v8701_v52 = vpop.eup %7061  ;;  %v6926_v58 = vpop.permute.xlu0 %6925  ;;  %6067 = vmatprep.mubr.f32.mxu1 %v8697_v56  ;;  %v3238_v16 = vmul.f32 1.442695, %v3207_v0 }
 0x6c8   : > { %9791 = vst [vmem:[#allocation73_spill] sm:$0xff] %v8701_v52  ;;  %v6928_v7 = vunpack.i.h.bf16 %v6926_v58  ;;  %v6927_v9 = vunpack.i.l.bf16 %v6926_v58  ;;  %6068 = vmatmul.mubr.f32.gmra.mrb[72].mxu1 %v8701_v52 }
 0x6ca   : > { %v8705_v6 = vpop.eup %7063  ;;  %v6613_v45 = vpack.c.bf16 %v6928_v7, %v6927_v9 }
 0x6cb   : > { %9792 = vst [vmem:[#allocation74_spill] sm:$0xff] %v8705_v6  ;;  %v8707_v14 = vpop.eup %7065  ;;  %6070 = vmatprep.mubr.f32.mxu1 %v8705_v6  ;;  %v3745_v55 = vpop.permute.xlu0 %3744 }
 0x6cc   : > { %9793 = vst [vmem:[#allocation75_spill] sm:$0xff] %v8707_v14  ;;  %6071 = vmatmul.mubr.f32.gmra.mrb[74].mxu1 %v8707_v14 }
 0x6cd   : > { %6612 = vmatpush3.bf16.xpose.msk.msra.mxu1 %vm7701_vm1, %v6607_v21 }
 0x6ce   : > { %v8713_v10 = vpop.eup %7067  ;;  %6615 = vmatprep.subr.msk.bf16.mxu1 %vm7701_vm1, %v6613_v45 }
 0x6cf   : > { %9794 = vst [vmem:[#allocation76_spill] sm:$0xff] %v8713_v10  ;;  %v8717_v22 = vpop.eup %7069  ;;  %6073 = vmatprep.mubr.f32.mxu1 %v8713_v10  ;;  %v3749_v1 = vpop.permute.xlu0 %3748 }
 0x6d0   : > { %9795 = vst [vmem:[#allocation77_spill] sm:$0xff] %v8717_v22  ;;  %6074 = vmatmul.mubr.f32.gmra.mrb[76].mxu1 %v8717_v22 }
 0x6d3   : > { %v3753_v13 = vpop.permute.xlu0 %3752 }
 0x6d5   : > { %6618 = vmatpush3.bf16.xpose.msk.msra.mxu1 %vm7701_vm1, %v6613_v45 }
 0x6d6   : > { %6621 = vmatprep.subr.msk.bf16.mxu1 %vm7701_vm1, %v6619_v30 }
 0x6d7   : > { %v3757_v42 = vpop.permute.xlu0 %3756 }
 0x6dd   : > { %6624 = vmatpush3.bf16.xpose.msk.msra.mxu1 %vm7701_vm1, %v6619_v30 }
 0x6de   : > { %6627 = vmatprep.subr.msk.bf16.mxu1 %vm7701_vm1, %v6625_v44 }
 0x6e5   : > { %6630 = vmatpush3.bf16.xpose.msk.msra.mxu1 %vm7701_vm1, %v6625_v44 }
 0x6ef   : > { %v3189_v40 = vpop.xlane.xlu1 %3188 }
 0x6f0   : > { %v3206_v8 = vsub.f32 %v8577_v25, %v3189_v40  ;;  %v3761_v25 = vpop.permute.xlu0 %3760 }
 0x6f2   : > { %v3236_v19 = vmul.f32 1.442695, %v3206_v8 }
 0x6f3   : > { %v3741_v62 = vpop.permute.xlu1 %3740 }
 0x6f4   : > { %7071 = vpow2.f32 %v3236_v19  ;;  %v3765_v7 = vpop.permute.xlu0 %3764 }
 0x6f5   : > { %7073 = vpow2.f32 %v3238_v16 }
 0x6f7   : > { %v3743_v34 = vpop.permute.xlu1 %3742 }
 0x6f8   : > { %v3769_v45 = vpop.permute.xlu0 %3768 }
 0x6fb   : > { %v3747_v47 = vpop.permute.xlu1 %3746 }
 0x6fc   : > { %v6951_v36 = vpop.permute.xlu0 %6950 }
 0x6fd   : > { %v6953_v44 = vunpack.i.h.bf16 %v6951_v36 }
 0x6fe   : > { %v8733_v21 = vpop.eup %7071 }
 0x6ff   : > { %9796 = vst [vmem:[#allocation78_spill] sm:$0xff] %v8733_v21  ;;  %v8735_v46 = vpop.eup %7073  ;;  %v3751_v58 = vpop.permute.xlu1 %3750  ;;  %6076 = vmatprep.mubr.f32.mxu1 %v8733_v21 }
 0x700   : > { %9797 = vst [vmem:[#allocation79_spill] sm:$0xff] %v8735_v46  ;;  %6077 = vmatmul.mubr.f32.gmra.mrb[78].mxu1 %v8735_v46  ;;  %v6961_v8 = vpop.permute.xlu0 %6960 }
 0x701   : > { %6111 = vmatprep.mubr.msk.f32.mxu1 %vm1313_vm0, %v3739_v54  ;;  %v6952_v54 = vunpack.i.l.bf16 %v6951_v36 }
 0x703   : > { %v3755_v5 = vpop.permute.xlu1 %3754 }
 0x704   : > { %6112 = vmatmul.mubr.msk.f32.vlgmr.msra.gmra.mrb[80].mxu1 %vm1313_vm0, %v3741_v62  ;;  %v6639_v62 = vpack.c.bf16 %v6953_v44, %v6952_v54 }
 0x705   : > { %6114 = vmatprep.mubr.msk.f32.mxu1 %vm1313_vm0, %v3743_v34  ;;  %v6962_v34 = vunpack.i.l.bf16 %v6961_v8 }
 0x707   : > { %v3759_v53 = vpop.permute.xlu1 %3758 }
 0x708   : > { %6115 = vmatmul.mubr.msk.f32.gmra.mrb[82].mxu1 %vm1313_vm0, %v3745_v55 }
 0x709   : > { %6117 = vmatprep.mubr.msk.f32.mxu1 %vm1313_vm0, %v3747_v47 }
 0x70b   : > { %v3763_v9 = vpop.permute.xlu1 %3762 }
 0x70c   : > { %6118 = vmatmul.mubr.msk.f32.gmra.mrb[84].mxu1 %vm1313_vm0, %v3749_v1 }
 0x70d   : > { %6120 = vmatprep.mubr.msk.f32.mxu1 %vm1313_vm0, %v3751_v58 }
 0x70f   : > { %v3767_v24 = vpop.permute.xlu1 %3766 }
 0x710   : > { %6121 = vmatmul.mubr.msk.f32.gmra.mrb[86].mxu1 %vm1313_vm0, %v3753_v13  ;;  %v6963_v13 = vunpack.i.h.bf16 %v6961_v8 }
 0x711   : > { %6123 = vmatprep.mubr.msk.f32.mxu1 %vm1313_vm0, %v3755_v5 }
 0x712   : > { %v6647_v5 = vpack.c.bf16 %v6963_v13, %v6962_v34 }
 0x713   : > { %v6941_v37 = vpop.permute.xlu1 %6940 }
 0x714   : > { %v6943_v29 = vunpack.i.h.bf16 %v6941_v37  ;;  %v6942_v30 = vunpack.i.l.bf16 %v6941_v37  ;;  %6124 = vmatmul.mubr.msk.f32.gmra.mrb[88].mxu1 %vm1313_vm0, %v3757_v42  ;;  %v6966_v42 = vpop.permute.xlu0 %6965 }
 0x715   : > { %6126 = vmatprep.mubr.msk.f32.mxu1 %vm1313_vm0, %v3759_v53  ;;  %v6968_v58 = vunpack.i.h.bf16 %v6966_v42 }
 0x716   : > { %v6631_v50 = vpack.c.bf16 %v6943_v29, %v6942_v30 }
 0x717   : > { %v6946_v41 = vpop.permute.xlu1 %6945 }
 0x718   : > { %v6948_v55 = vunpack.i.h.bf16 %v6946_v41  ;;  %v6947_v0 = vunpack.i.l.bf16 %v6946_v41  ;;  %6127 = vmatmul.mubr.msk.f32.gmra.mrb[90].mxu1 %vm1313_vm0, %v3761_v25  ;;  %6632 = vmatprep.subr.bf16.mxu0 %v6631_v50  ;;  %v6967_v25 = vunpack.i.l.bf16 %v6966_v42 }
 0x719   : > { %6129 = vmatprep.mubr.msk.f32.mxu1 %vm1313_vm0, %v3763_v9  ;;  %6634 = vmatpush3.bf16.msra.mxu0 %v6631_v50 }
 0x71a   : > { %v6635_v40 = vpack.c.bf16 %v6948_v55, %v6947_v0  ;;  %v6651_v37 = vpack.c.bf16 %v6968_v58, %v6967_v25 }
 0x71b   : > { %v6956_v16 = vpop.permute.xlu1 %6955 }
 0x71c   : > { %v6958_v1 = vunpack.i.h.bf16 %v6956_v16  ;;  %v6957_v19 = vunpack.i.l.bf16 %v6956_v16  ;;  %6130 = vmatmul.mubr.msk.f32.gmra.mrb[92].mxu1 %vm1313_vm0, %v3765_v7  ;;  %6636 = vmatprep.subr.bf16.mxu0 %v6635_v40 }
 0x71d   : > { %6132 = vmatprep.mubr.msk.f32.mxu1 %vm1313_vm0, %v3767_v24  ;;  %6638 = vmatpush3.bf16.msra.mxu0 %v6635_v40 }
 0x71e   : > { %6640 = vmatprep.subr.bf16.mxu0 %v6639_v62  ;;  %v6643_v47 = vpack.c.bf16 %v6958_v1, %v6957_v19 }
 0x71f   : > { %v6971_v53 = vpop.permute.xlu1 %6970 }
 0x720   : > { %6133 = vmatmul.mubr.msk.f32.gmra.mrb[94].mxu1 %vm1313_vm0, %v3769_v45  ;;  %v6973_v7 = vunpack.i.h.bf16 %v6971_v53  ;;  %v6972_v9 = vunpack.i.l.bf16 %v6971_v53 }
 0x721   : > { %6642 = vmatpush3.bf16.msra.mxu0 %v6639_v62 }
 0x722   : > { %6644 = vmatprep.subr.bf16.mxu0 %v6643_v47  ;;  %v6655_v24 = vpack.c.bf16 %v6973_v7, %v6972_v9 }
 0x725   : > { %6646 = vmatpush3.bf16.msra.mxu0 %v6643_v47 }
 0x726   : > { %6648 = vmatprep.subr.bf16.mxu0 %v6647_v5 }
 0x729   : > { %6650 = vmatpush3.bf16.msra.mxu0 %v6647_v5 }
 0x72a   : > { %6652 = vmatprep.subr.bf16.mxu0 %v6651_v37 }
 0x72d   : > { %6654 = vmatpush3.bf16.msra.mxu0 %v6651_v37 }
 0x72e   : > { %6656 = vmatprep.subr.bf16.mxu0 %v6655_v24 }
 0x731   : > { %6658 = vmatpush3.bf16.msra.mxu0 %v6655_v24 }
 0x77f   : > { %v8755_v45 = vpop.f32.mrb[64].mxu1 }
 0x780   : > { %v8757_v29 = vpop.f32.mrb[65].mxu1 }
 0x783   : > { %v8759_v30 = vpop.f32.mrb[66].mxu1 }
 0x784   : > { %v8761_v36 = vpop.f32.mrb[67].mxu1 }
 0x78b   : > { %v8763_v50 = vpop.f32.mrb[68].mxu1 }
 0x78c   : > { %v8765_v41 = vpop.f32.mrb[69].mxu1 }
 0x793   : > { %v8767_v44 = vpop.f32.mrb[70].mxu1 }
 0x794   : > { %v8769_v54 = vpop.f32.mrb[71].mxu1 }
 0x79b   : > { %v8771_v55 = vpop.f32.mrb[72].mxu1 }
 0x79c   : > { %v8773_v0 = vpop.f32.mrb[73].mxu1 }
 0x79f   : > { %v8775_v40 = vpop.f32.mrb[74].mxu1 }
 0x7a0   : > { %9798 = vst [vmem:[#allocation80_spill] sm:$0xff] %v8775_v40  ;;  %v8777_v8 = vpop.f32.mrb[75].mxu1 }
 0x7a3   : > { %v8779_v16 = vpop.f32.mrb[76].mxu1 }
 0x7a4   : > { %9799 = vst [vmem:[#allocation81_spill] sm:$0xff] %v8779_v16  ;;  %v8781_v1 = vpop.f32.mrb[77].mxu1 }
 0x7d3   : > { %v8783_v19 = vpop.f32.mrb[78].mxu1 }
 0x7d4   : > { %9800 = vst [vmem:[#allocation82_spill] sm:$0xff] %v8783_v19  ;;  %v8785_v62 = vpop.f32.mrb[79].mxu1 }
 0x7d5   : > { %9801 = vst [vmem:[#allocation83_spill] sm:$0xff] %v8785_v62 }
 0x7d7   : > { %v8787_v13 = vpop.f32.mrb[80].mxu1 }
 0x7d8   : > { %4029 = vmax.xlane.f32.xlu1 %v8787_v13  ;;  %v8790_v34 = vpop.f32.mrb[81].mxu1 }
 0x7d9   : > { %4027 = vmax.xlane.f32.xlu0 %v8790_v34 }
 0x7db   : > { %v8793_v47 = vpop.f32.mrb[82].mxu1 }
 0x7dc   : > { %4033 = vmax.xlane.f32.xlu1 %v8793_v47  ;;  %v8796_v42 = vpop.f32.mrb[83].mxu1 }
 0x7dd   : > { %4031 = vmax.xlane.f32.xlu0 %v8796_v42 }
 0x7df   : > { %v8799_v58 = vpop.f32.mrb[84].mxu1 }
 0x7e0   : > { %v8801_v25 = vpop.f32.mrb[85].mxu1 }
 0x7e1   : > { %4037 = vmax.xlane.f32.xlu0 %v8799_v58  ;;  %4035 = vmax.xlane.f32.xlu1 %v8801_v25 }
 0x7e3   : > { %v8805_v5 = vpop.f32.mrb[86].mxu1 }
 0x7e4   : > { %v8807_v53 = vpop.f32.mrb[87].mxu1 }
 0x7e5   : > { %4041 = vmax.xlane.f32.xlu1 %v8805_v5 }
 0x7e7   : > { %v8810_v7 = vpop.f32.mrb[88].mxu1 }
 0x7e8   : > { %v8812_v9 = vpop.f32.mrb[89].mxu1 }
 0x7e9   : > { %4039 = vmax.xlane.f32.xlu1 %v8807_v53 }
 0x7eb   : > { %v8815_v37 = vpop.f32.mrb[90].mxu1 }
 0x7ec   : > { %v8817_v24 = vpop.f32.mrb[91].mxu1 }
 0x7ed   : > { %4045 = vmax.xlane.f32.xlu1 %v8810_v7 }
 0x7ef   : > { %v8820_v19 = vpop.f32.mrb[92].mxu1 }
 0x7f0   : > { %v8822_v16 = vpop.f32.mrb[93].mxu1 }
 0x7f1   : > { %4043 = vmax.xlane.f32.xlu1 %v8812_v9 }
 0x7f3   : > { %v8825_v40 = vpop.f32.mrb[94].mxu1 }
 0x7f4   : > { %v8827_v62 = vpop.f32.mrb[95].mxu1 }
 0x7f5   : > { %4049 = vmax.xlane.f32.xlu1 %v8815_v37 }
 0x7f7   : > { %6975 = vrot.lane.b32.xlu0 %v8088_v31, %s7301_s15  ;;  %v9802_v31 = vld [vmem:[#allocation15_spill] sm:$0xff] }
 0x7f9   : > { %4053 = vmax.xlane.f32.xlu1 %v8820_v19 }
 0x7fd   : > { %4057 = vmax.xlane.f32.xlu1 %v8825_v40 }
 0x801   : > { %2373 = vadd.xlane.f32.xlu1 %v8386_v39 }
 0x805   : > { %2375 = vadd.xlane.f32.xlu1 %v8388_v28 }
 0x809   : > { %3240 = vadd.xlane.f32.xlu1 %v8646_v33 }
 0x80d   : > { %3242 = vadd.xlane.f32.xlu1 %v8648_v18  ;;  %v9816_v18 = vld [vmem:[#allocation25_spill] sm:$0xff] }
 0x811   : > { %2377 = vadd.xlane.f32.xlu1 %v8398_v60 }
 0x815   : > { %3244 = vadd.xlane.f32.xlu1 %v8656_v26 }
 0x816   : > { %4047 = vmax.xlane.f32.xlu0 %v8817_v24 }
 0x819   : > { %2381 = vadd.xlane.f32.xlu1 %v8412_v43 }
 0x81a   : > { %4051 = vmax.xlane.f32.xlu0 %v8822_v16 }
 0x81d   : > { %3248 = vadd.xlane.f32.xlu1 %v8668_v20 }
 0x81e   : > { %4055 = vmax.xlane.f32.xlu0 %v8827_v62 }
 0x821   : > { %2385 = vadd.xlane.f32.xlu1 %v8428_v35 }
 0x822   : > { %2379 = vadd.xlane.f32.xlu0 %v8402_v27 }
 0x825   : > { %3252 = vadd.xlane.f32.xlu1 %v8684_v4 }
 0x826   : > { %3246 = vadd.xlane.f32.xlu0 %v8660_v63 }
 0x829   : > { %2389 = vadd.xlane.f32.xlu1 %v8441_v57 }
 0x82a   : > { %2383 = vadd.xlane.f32.xlu0 %v8416_v23 }
 0x82d   : > { %3256 = vadd.xlane.f32.xlu1 %v8697_v56 }
 0x82e   : > { %3250 = vadd.xlane.f32.xlu0 %v8672_v2  ;;  %v9812_v2 = vld [vmem:[#allocation28_spill] sm:$0xff] }
 0x831   : > { %2393 = vadd.xlane.f32.xlu1 %v8449_v38 }
 0x832   : > { %2387 = vadd.xlane.f32.xlu0 %v8432_v51  ;;  %v9809_v51 = vld [vmem:[#allocation17_spill] sm:$0xff] }
 0x835   : > { %3260 = vadd.xlane.f32.xlu1 %v8705_v6  ;;  %v9814_v6 = vld [vmem:[#allocation29_spill] sm:$0xff] }
 0x836   : > { %3254 = vadd.xlane.f32.xlu0 %v8688_v61  ;;  %v9803_v61 = vld [vmem:[#allocation16_spill] sm:$0xff] }
 0x839   : > { %2397 = vadd.xlane.f32.xlu1 %v8457_v49 }
 0x83a   : > { %2391 = vadd.xlane.f32.xlu0 %v8445_v17  ;;  %v9804_v17 = vld [vmem:[#allocation18_spill] sm:$0xff] }
 0x83d   : > { %3264 = vadd.xlane.f32.xlu1 %v8713_v10  ;;  %v9813_v10 = vld [vmem:[#allocation21_spill] sm:$0xff] }
 0x83e   : > { %3258 = vadd.xlane.f32.xlu0 %v8701_v52  ;;  %v9805_v52 = vld [vmem:[#allocation20_spill] sm:$0xff] }
 0x841   : > { %2401 = vadd.xlane.f32.xlu1 %v8477_v48  ;;  %v9811_v48 = vld [vmem:[#allocation19_spill] sm:$0xff] }
 0x842   : > { %2395 = vadd.xlane.f32.xlu0 %v8451_v32  ;;  %v9806_v32 = vld [vmem:[#allocation22_spill] sm:$0xff] }
 0x845   : > { %3268 = vadd.xlane.f32.xlu1 %v8733_v21  ;;  %v9807_v21 = vld [vmem:[#allocation14_spill] sm:$0xff] }
 0x846   : > { %3262 = vadd.xlane.f32.xlu0 %v8707_v14  ;;  %v9808_v14 = vld [vmem:[#allocation24_spill] sm:$0xff] }
 0x849   : > { %1635 = vadd.xlane.f32.xlu1 %v9802_v31 }
 0x84a   : > { %2399 = vadd.xlane.f32.xlu0 %v8461_v12  ;;  %v9810_v12 = vld [vmem:[#allocation26_spill] sm:$0xff] }
 0x84d   : > { %1639 = vadd.xlane.f32.xlu1 %v9803_v61 }
 0x84e   : > { %3266 = vadd.xlane.f32.xlu0 %v8717_v22 }
 0x851   : > { %1643 = vadd.xlane.f32.xlu1 %v9804_v17 }
 0x852   : > { %2403 = vadd.xlane.f32.xlu0 %v8479_v59 }
 0x855   : > { %1647 = vadd.xlane.f32.xlu1 %v9805_v52 }
 0x856   : > { %3270 = vadd.xlane.f32.xlu0 %v8735_v46 }
 0x859   : > { %1651 = vadd.xlane.f32.xlu1 %v9806_v32 }
 0x85a   : > { %1637 = vadd.xlane.f32.xlu0 %v9807_v21 }
 0x85d   : > { %1655 = vadd.xlane.f32.xlu1 %v9808_v14 }
 0x85e   : > { %1641 = vadd.xlane.f32.xlu0 %v9809_v51  ;;  %v9815_v51 = vld [vmem:[#allocation23_spill] sm:$0xff] }
 0x861   : > { %1659 = vadd.xlane.f32.xlu1 %v9810_v12 }
 0x862   : > { %1645 = vadd.xlane.f32.xlu0 %v9811_v48 }
 0x865   : > { %v4030_v22 = vpop.xlane.xlu1 %4029  ;;  %1663 = vadd.xlane.f32.xlu1 %v9812_v2 }
 0x866   : > { %v4028_v59 = vpop.xlane.xlu0 %4027  ;;  %1649 = vadd.xlane.f32.xlu0 %v9813_v10  ;;  %v4060_v23 = vsub.f32 %v8787_v13, %v4030_v22 }
 0x867   : > { %v4059_v46 = vsub.f32 %v8790_v34, %v4028_v59 }
 0x868   : > { %v4077_v12 = vmul.f32 1.442695, %v4060_v23 }
 0x869   : > { %v4075_v49 = vmul.f32 1.442695, %v4059_v46  ;;  %v4034_v63 = vpop.xlane.xlu1 %4033  ;;  %1665 = vadd.xlane.f32.xlu1 %v9814_v6 }
 0x86a   : > { %v4032_v14 = vpop.xlane.xlu0 %4031  ;;  %1653 = vadd.xlane.f32.xlu0 %v9815_v51  ;;  %v4062_v2 = vsub.f32 %v8793_v47, %v4034_v63  ;;  %v9817_v51 = vld [vmem:[#allocation27_spill] sm:$0xff] }
 0x86b   : > { %7075 = vpow2.f32 %v4075_v49  ;;  %v4061_v48 = vsub.f32 %v8796_v42, %v4032_v14 }
 0x86c   : > { %7077 = vpow2.f32 %v4077_v12  ;;  %v4081_v22 = vmul.f32 1.442695, %v4062_v2 }
 0x86d   : > { %v4079_v38 = vmul.f32 1.442695, %v4061_v48 }
 0x86e   : > { %v4038_v27 = vpop.xlane.xlu0 %4037  ;;  %v4036_v10 = vpop.xlane.xlu1 %4035  ;;  %1657 = vadd.xlane.f32.xlu0 %v9816_v18  ;;  %v9844_v18 = vld [vmem:[#allocation68_spill] sm:$0xff] }
 0x86f   : > { %v4063_v59 = vsub.f32 %v8801_v25, %v4036_v10  ;;  %v4064_v46 = vsub.f32 %v8799_v58, %v4038_v27  ;;  %7079 = vpow2.f32 %v4079_v38 }
 0x870   : > { %7081 = vpow2.f32 %v4081_v22 }
 0x871   : > { %v4083_v13 = vmul.f32 1.442695, %v4063_v59  ;;  %v4085_v48 = vmul.f32 1.442695, %v4064_v46 }
 0x872   : > { %v6976_v34 = vpop.permute.xlu0 %6975  ;;  %v4042_v49 = vpop.xlane.xlu1 %4041  ;;  %1661 = vadd.xlane.f32.xlu0 %v9817_v51 }
 0x873   : > { %v6978_v23 = vunpack.i.h.bf16 %v6976_v34  ;;  %v6977_v14 = vunpack.i.l.bf16 %v6976_v34  ;;  %v4066_v63 = vsub.f32 %v8805_v5, %v4042_v49  ;;  %7083 = vpow2.f32 %v4083_v13 }
 0x874   : > { %7085 = vpow2.f32 %v4085_v48 }
 0x875   : > { %v8892_v47 = vpop.eup %7075  ;;  %v6659_v10 = vpack.c.bf16 %v6978_v23, %v6977_v14  ;;  %v4089_v38 = vmul.f32 1.442695, %v4066_v63 }
 0x876   : > { %6167 = vmatprep.mubr.f32.mxu0 %v8892_v47  ;;  %v4040_v12 = vpop.xlane.xlu1 %4039  ;;  %v8896_v42 = vpop.eup %7077 }
 0x877   : > { %v4065_v27 = vsub.f32 %v8807_v53, %v4040_v12  ;;  %6660 = vmatprep.subr.bf16.mxu0 %v6659_v10 }
 0x878   : > { %6662 = vmatpush3.bf16.msra.mxu0 %v6659_v10 }
 0x879   : > { %v4087_v2 = vmul.f32 1.442695, %v4065_v27  ;;  %v8898_v25 = vpop.eup %7079 }
 0x87a   : > { %v4046_v58 = vpop.xlane.xlu1 %4045  ;;  %9818 = vst [vmem:[#allocation15_spill] sm:$0xff] %v8898_v25  ;;  %v8903_v59 = vpop.eup %7081 }
 0x87b   : > { %7087 = vpow2.f32 %v4087_v2  ;;  %6168 = vmatmul.mubr.f32.vlgmr.msra.gmra.mrb[64].mxu0 %v8896_v42  ;;  %v4068_v5 = vsub.f32 %v8810_v7, %v4046_v58  ;;  %9819 = vst [vmem:[#allocation16_spill] sm:$0xff] %v8903_v59 }
 0x87c   : > { %7089 = vpow2.f32 %v4089_v38  ;;  %6170 = vmatprep.mubr.f32.mxu0 %v8898_v25  ;;  %v9851_v25 = vld [vmem:[#allocation31_spill] sm:$0xff] }
 0x87d   : > { %v8905_v22 = vpop.eup %7083  ;;  %v4093_v13 = vmul.f32 1.442695, %v4068_v5 }
 0x87e   : > { %v4044_v53 = vpop.xlane.xlu1 %4043  ;;  %9820 = vst [vmem:[#allocation18_spill] sm:$0xff] %v8905_v22  ;;  %v8910_v49 = vpop.eup %7085 }
 0x87f   : > { %v4067_v46 = vsub.f32 %v8812_v9, %v4044_v53  ;;  %6171 = vmatmul.mubr.f32.gmra.mrb[66].mxu0 %v8903_v59 }
 0x880   : > { %6173 = vmatprep.mubr.f32.mxu0 %v8905_v22 }
 0x881   : > { %v4091_v34 = vmul.f32 1.442695, %v4067_v46 }
 0x882   : > { %v4050_v23 = vpop.xlane.xlu1 %4049 }
 0x883   : > { %7091 = vpow2.f32 %v4091_v34  ;;  %6174 = vmatmul.mubr.f32.gmra.mrb[68].mxu0 %v8910_v49 }
 0x884   : > { %7093 = vpow2.f32 %v4093_v13 }
 0x885   : > { %v8913_v7 = vpop.eup %7087 }
 0x886   : > { %9821 = vst [vmem:[#allocation20_spill] sm:$0xff] %v8913_v7  ;;  %v8915_v14 = vpop.eup %7089  ;;  %6176 = vmatprep.mubr.f32.mxu0 %v8913_v7  ;;  %v4054_v9 = vpop.xlane.xlu1 %4053 }
 0x887   : > { %6177 = vmatmul.mubr.f32.gmra.mrb[70].mxu0 %v8915_v14 }
 0x88a   : > { %v4058_v48 = vpop.xlane.xlu1 %4057 }
 0x88d   : > { %v8919_v63 = vpop.eup %7091 }
 0x88e   : > { %9822 = vst [vmem:[#allocation22_spill] sm:$0xff] %v8919_v63  ;;  %v8921_v10 = vpop.eup %7093  ;;  %6179 = vmatprep.mubr.f32.mxu0 %v8919_v63  ;;  %v2374_v12 = vpop.xlane.xlu1 %2373 }
 0x88f   : > { %6180 = vmatmul.mubr.f32.gmra.mrb[72].mxu0 %v8921_v10  ;;  %7095 = vrcp.f32 %v2374_v12  ;;  %v4070_v12 = vsub.f32 %v8815_v37, %v4050_v23 }
 0x892   : > { %v2376_v27 = vpop.xlane.xlu1 %2375 }
 0x893   : > { %7097 = vrcp.f32 %v2376_v27 }
 0x896   : > { %v3241_v38 = vpop.xlane.xlu1 %3240 }
 0x897   : > { %7099 = vrcp.f32 %v3241_v38 }
 0x899   : > { %v8925_v2 = vpop.eup %7095 }
 0x89a   : > { %v3243_v58 = vpop.xlane.xlu1 %3242  ;;  %v2646_v5 = vmul.f32 %v8925_v2, %v8506_v15 }
 0x89b   : > { %7101 = vrcp.f32 %v3243_v58 }
 0x89c   : > { %2678 = vrot.lane.b32.xlu0 %v2646_v5, %s7301_s15 }
 0x89d   : > { %v8929_v53 = vpop.eup %7097 }
 0x89e   : > { %v2378_v46 = vpop.xlane.xlu1 %2377  ;;  %v2647_v13 = vmul.f32 %v8929_v53, %v8504_v3  ;;  %v4097_v3 = vmul.f32 1.442695, %v4070_v12 }
 0x89f   : > { %7103 = vrcp.f32 %v2378_v46  ;;  %v4072_v46 = vsub.f32 %v8820_v19, %v4054_v9 }
 0x8a0   : > { %2680 = vrot.lane.b32.xlu1 %v2647_v13, %s7301_s15  ;;  %v4074_v13 = vsub.f32 %v8825_v40, %v4058_v48 }
 0x8a1   : > { %v8935_v34 = vpop.eup %7099  ;;  %v4101_v12 = vmul.f32 1.442695, %v4072_v46 }
 0x8a2   : > { %v3245_v27 = vpop.xlane.xlu1 %3244  ;;  %v3513_v38 = vmul.f32 %v8935_v34, %v8757_v29 }
 0x8a3   : > { %7105 = vrcp.f32 %v3245_v27  ;;  %v4048_v15 = vpop.xlane.xlu0 %4047  ;;  %v4105_v27 = vmul.f32 1.442695, %v4074_v13 }
 0x8a4   : > { %v4069_v58 = vsub.f32 %v8817_v24, %v4048_v15  ;;  %3545 = vrot.lane.b32.xlu0 %v3513_v38, %s7300_s23 }
 0x8a5   : > { %v8942_v5 = vpop.eup %7101 }
 0x8a6   : > { %v4095_v63 = vmul.f32 1.442695, %v4069_v58  ;;  %v2382_v51 = vpop.xlane.xlu1 %2381  ;;  %v3514_v37 = vmul.f32 %v8942_v5, %v8755_v45 }
 0x8a7   : > { %7107 = vrcp.f32 %v2382_v51  ;;  %v4052_v29 = vpop.xlane.xlu0 %4051 }
 0x8a8   : > { %7109 = vpow2.f32 %v4095_v63  ;;  %v4071_v23 = vsub.f32 %v8822_v16, %v4052_v29  ;;  %3547 = vrot.lane.b32.xlu1 %v3514_v37, %s7300_s23 }
 0x8a9   : > { %v8950_v24 = vpop.eup %7103  ;;  %7111 = vpow2.f32 %v4097_v3  ;;  %v9824_v3 = vld [vmem:[#allocation58_spill] sm:$0xff] }
 0x8aa   : > { %v4099_v19 = vmul.f32 1.442695, %v4071_v23  ;;  %v3249_v9 = vpop.xlane.xlu1 %3248  ;;  %v2648_v40 = vmul.f32 %v8950_v24, %v8510_v11 }
 0x8ab   : > { %7113 = vrcp.f32 %v3249_v9  ;;  %v4056_v48 = vpop.xlane.xlu0 %4055 }
 0x8ac   : > { %7115 = vpow2.f32 %v4099_v19  ;;  %v4073_v51 = vsub.f32 %v8827_v62, %v4056_v48  ;;  %2682 = vrot.lane.b32.xlu0 %v2648_v40, %s7301_s15 }
 0x8ad   : > { %v8956_v45 = vpop.eup %7105  ;;  %7117 = vpow2.f32 %v4101_v12 }
 0x8ae   : > { %7119 = vpow2.f32 %v4105_v27  ;;  %v4103_v16 = vmul.f32 1.442695, %v4073_v51  ;;  %v2386_v63 = vpop.xlane.xlu1 %2385  ;;  %v3515_v38 = vmul.f32 %v8956_v45, %v8761_v36 }
 0x8af   : > { %7121 = vrcp.f32 %v2386_v63  ;;  %v2380_v15 = vpop.xlane.xlu0 %2379 }
 0x8b0   : > { %7123 = vpow2.f32 %v4103_v16  ;;  %3549 = vrot.lane.b32.xlu0 %v3515_v38, %s7300_s23  ;;  %v9827_v16 = vld [vmem:[#allocation60_spill] sm:$0xff] }
 0x8b1   : > { %v8961_v11 = vpop.eup %7107  ;;  %7125 = vrcp.f32 %v2380_v15  ;;  %v9828_v15 = vld [vmem:[#allocation56_spill] sm:$0xff] }
 0x8b2   : > { %v8963_v62 = vpop.eup %7109  ;;  %v3253_v58 = vpop.xlane.xlu1 %3252  ;;  %v2650_v46 = vmul.f32 %v8961_v11, %v9824_v3 }
 0x8b3   : > { %9823 = vst [vmem:[#allocation14_spill] sm:$0xff] %v8963_v62  ;;  %v8967_v13 = vpop.eup %7111  ;;  %7127 = vrcp.f32 %v3253_v58  ;;  %6182 = vmatprep.mubr.f32.mxu0 %v8963_v62  ;;  %v3247_v36 = vpop.xlane.xlu0 %3246 }
 0x8b4   : > { %7129 = vrcp.f32 %v3247_v36  ;;  %6183 = vmatmul.mubr.f32.gmra.mrb[74].mxu0 %v8967_v13  ;;  %2686 = vrot.lane.b32.xlu0 %v2650_v46, %s7301_s15 }
 0x8b5   : > { %v8972_v37 = vpop.eup %7113 }
 0x8b6   : > { %v8974_v29 = vpop.eup %7115  ;;  %v2390_v23 = vpop.xlane.xlu1 %2389  ;;  %v3517_v12 = vmul.f32 %v8972_v37, %v8765_v41 }
 0x8b7   : > { %9825 = vst [vmem:[#allocation58_spill] sm:$0xff] %v8974_v29  ;;  %v8978_v27 = vpop.eup %7117  ;;  %7131 = vrcp.f32 %v2390_v23  ;;  %6185 = vmatprep.mubr.f32.mxu0 %v8974_v29  ;;  %v2384_v19 = vpop.xlane.xlu0 %2383  ;;  %v9834_v29 = vld [vmem:[#allocation59_spill] sm:$0xff] }
 0x8b8   : > { %v8981_v9 = vpop.eup %7119  ;;  %7133 = vrcp.f32 %v2384_v19  ;;  %6186 = vmatmul.mubr.f32.gmra.mrb[76].mxu0 %v8978_v27  ;;  %3553 = vrot.lane.b32.xlu0 %v3517_v12, %s7300_s23 }
 0x8b9   : > { %v8985_v40 = vpop.eup %7121 }
 0x8ba   : > { %v8987_v48 = vpop.eup %7123  ;;  %v3257_v51 = vpop.xlane.xlu1 %3256  ;;  %v2652_v41 = vmul.f32 %v8985_v40, %v9827_v16 }
 0x8bb   : > { %9826 = vst [vmem:[#allocation84_spill] sm:$0xff] %v8987_v48  ;;  %v8991_v63 = vpop.eup %7125  ;;  %7135 = vrcp.f32 %v3257_v51  ;;  %6188 = vmatprep.mubr.f32.mxu0 %v8987_v48  ;;  %v3251_v38 = vpop.xlane.xlu0 %3250  ;;  %v9832_v48 = vld [vmem:[#allocation64_spill] sm:$0xff] }
 0x8bc   : > { %7137 = vrcp.f32 %v3251_v38  ;;  %2690 = vrot.lane.b32.xlu0 %v2652_v41, %s7301_s15  ;;  %6189 = vmatmul.mubr.f32.gmra.mrb[78].mxu0 %v8981_v9  ;;  %v2649_v58 = vmul.f32 %v8991_v63, %v9828_v15  ;;  %v9829_v38 = vld [vmem:[#allocation62_spill] sm:$0xff] }
 0x8bd   : > { %v8998_v3 = vpop.eup %7127 }
 0x8be   : > { %v9000_v46 = vpop.eup %7129  ;;  %2684 = vrot.lane.b32.xlu1 %v2649_v58, %s7301_s15  ;;  %v2394_v36 = vpop.xlane.xlu1 %2393  ;;  %v3519_v23 = vmul.f32 %v8998_v3, %v8769_v54  ;;  %v9830_v58 = vld [vmem:[#allocation57_spill] sm:$0xff] }
 0x8bf   : > { %7139 = vrcp.f32 %v2394_v36  ;;  %v2388_v12 = vpop.xlane.xlu0 %2387  ;;  %v3516_v19 = vmul.f32 %v9000_v46, %v8759_v30 }
 0x8c0   : > { %7141 = vrcp.f32 %v2388_v12  ;;  %3557 = vrot.lane.b32.xlu0 %v3519_v23, %s7300_s23 }
 0x8c1   : > { %v9008_v51 = vpop.eup %7131 }
 0x8c2   : > { %v9010_v16 = vpop.eup %7133  ;;  %3551 = vrot.lane.b32.xlu1 %v3516_v19, %s7300_s23  ;;  %v3261_v41 = vpop.xlane.xlu1 %3260  ;;  %v2654_v15 = vmul.f32 %v9008_v51, %v9829_v38 }
 0x8c3   : > { %7143 = vrcp.f32 %v3261_v41  ;;  %v3255_v54 = vpop.xlane.xlu0 %3254  ;;  %v2651_v36 = vmul.f32 %v9010_v16, %v9830_v58 }
 0x8c4   : > { %7145 = vrcp.f32 %v3255_v54  ;;  %2694 = vrot.lane.b32.xlu0 %v2654_v15, %s7301_s15 }
 0x8c5   : > { %v9018_v30 = vpop.eup %7135 }
 0x8c6   : > { %v9020_v23 = vpop.eup %7137  ;;  %2688 = vrot.lane.b32.xlu1 %v2651_v36, %s7301_s15  ;;  %v2398_v12 = vpop.xlane.xlu1 %2397  ;;  %v9025_v19 = vmul.f32 %v9018_v30, %v8773_v0 }
 0x8c7   : > { %7147 = vrcp.f32 %v2398_v12  ;;  %v2392_v41 = vpop.xlane.xlu0 %2391  ;;  %v3518_v38 = vmul.f32 %v9020_v23, %v8763_v50 }
 0x8c8   : > { %9831 = vst [vmem:[#allocation60_spill] sm:$0xff] %v9025_v19  ;;  %7149 = vrcp.f32 %v2392_v41  ;;  %v9837_v19 = vld [vmem:[#allocation66_spill] sm:$0xff] }
 0x8c9   : > { %v9029_v54 = vpop.eup %7139 }
 0x8ca   : > { %v9031_v15 = vpop.eup %7141  ;;  %3555 = vrot.lane.b32.xlu1 %v3518_v38, %s7300_s23  ;;  %v3265_v58 = vpop.xlane.xlu1 %3264  ;;  %v9036_v36 = vmul.f32 %v9029_v54, %v9832_v48 }
 0x8cb   : > { %7151 = vrcp.f32 %v3265_v58  ;;  %v3259_v0 = vpop.xlane.xlu0 %3258  ;;  %v2653_v12 = vmul.f32 %v9031_v15, %v9834_v29 }
 0x8cc   : > { %9833 = vst [vmem:[#allocation56_spill] sm:$0xff] %v9036_v36  ;;  %7153 = vrcp.f32 %v3259_v0 }
 0x8cd   : > { %v9040_v62 = vpop.eup %7143 }
 0x8ce   : > { %v9042_v50 = vpop.eup %7145  ;;  %2692 = vrot.lane.b32.xlu1 %v2653_v12, %s7301_s15  ;;  %v2402_v41 = vpop.xlane.xlu1 %2401  ;;  %v9047_v38 = vmul.f32 %v9040_v62, %v8777_v8 }
 0x8cf   : > { %7155 = vrcp.f32 %v2402_v41  ;;  %v2396_v48 = vpop.xlane.xlu0 %2395  ;;  %v3520_v58 = vmul.f32 %v9042_v50, %v8767_v44 }
 0x8d0   : > { %9835 = vst [vmem:[#allocation62_spill] sm:$0xff] %v9047_v38  ;;  %7157 = vrcp.f32 %v2396_v48  ;;  %v9839_v38 = vld [vmem:[#allocation61_spill] sm:$0xff] }
 0x8d1   : > { %v9051_v36 = vpop.eup %7147 }
 0x8d2   : > { %v9053_v29 = vpop.eup %7149  ;;  %3559 = vrot.lane.b32.xlu1 %v3520_v58, %s7300_s23  ;;  %v3269_v0 = vpop.xlane.xlu1 %3268  ;;  %v9058_v12 = vmul.f32 %v9051_v36, %v9837_v19 }
 0x8d3   : > { %9836 = vst [vmem:[#allocation57_spill] sm:$0xff] %v9053_v29  ;;  %7159 = vrcp.f32 %v3269_v0  ;;  %v3263_v8 = vpop.xlane.xlu0 %3262  ;;  %v2655_v41 = vmul.f32 %v9053_v29, %v9839_v38 }
 0x8d4   : > { %9838 = vst [vmem:[#allocation64_spill] sm:$0xff] %v9058_v12  ;;  %7161 = vrcp.f32 %v3263_v8 }
 0x8d5   : > { %v9062_v7 = vpop.eup %7151 }
 0x8d6   : > { %v9064_v44 = vpop.eup %7153  ;;  %2696 = vrot.lane.b32.xlu1 %v2655_v41, %s7301_s15  ;;  %v1636_v48 = vpop.xlane.xlu1 %1635  ;;  %v9069_v58 = vmul.f32 %v9062_v7, %v8781_v1  ;;  %v9846_v1 = vld [vmem:[#allocation63_spill] sm:$0xff] }
 0x8d7   : > { %9840 = vst [vmem:[#allocation59_spill] sm:$0xff] %v9064_v44  ;;  %7163 = vrcp.f32 %v1636_v48  ;;  %v2400_v19 = vpop.xlane.xlu0 %2399  ;;  %v9073_v0 = vmul.f32 %v9064_v44, %v8771_v55 }
 0x8d8   : > { %9841 = vst [vmem:[#allocation66_spill] sm:$0xff] %v9069_v58  ;;  %7165 = vrcp.f32 %v2400_v19 }
 0x8d9   : > { %9842 = vst [vmem:[#allocation61_spill] sm:$0xff] %v9073_v0  ;;  %v9075_v38 = vpop.eup %7155  ;;  %v9848_v0 = vld [vmem:[#allocation83_spill] sm:$0xff] }
 0x8da   : > { %v9077_v8 = vpop.eup %7157  ;;  %v1640_v12 = vpop.xlane.xlu1 %1639  ;;  %v9081_v41 = vmul.f32 %v9075_v38, %v9844_v18  ;;  %v9849_v18 = vld [vmem:[#allocation80_spill] sm:$0xff] }
 0x8db   : > { %9843 = vst [vmem:[#allocation85_spill] sm:$0xff] %v9077_v8  ;;  %7167 = vrcp.f32 %v1640_v12  ;;  %v3267_v22 = vpop.xlane.xlu0 %3266  ;;  %v9085_v48 = vmul.f32 %v9077_v8, %v9846_v1 }
 0x8dc   : > { %9845 = vst [vmem:[#allocation68_spill] sm:$0xff] %v9081_v41  ;;  %7169 = vrcp.f32 %v3267_v22  ;;  %v2759_v22 = vmul.f32 %v8925_v2, %v8386_v39 }
 0x8dd   : > { %9847 = vst [vmem:[#allocation63_spill] sm:$0xff] %v9085_v48  ;;  %v9087_v58 = vpop.eup %7159 }
 0x8de   : > { %v9089_v55 = vpop.eup %7161  ;;  %v1644_v19 = vpop.xlane.xlu1 %1643  ;;  %v9093_v44 = vmul.f32 %v9087_v58, %v9848_v0 }
 0x8df   : > { %7171 = vrcp.f32 %v1644_v19  ;;  %v2404_v29 = vpop.xlane.xlu0 %2403  ;;  %v9097_v12 = vmul.f32 %v9089_v55, %v9849_v18  ;;  %v9852_v19 = vld [vmem:[#allocation65_spill] sm:$0xff] }
 0x8e0   : > { %7173 = vrcp.f32 %v2404_v29  ;;  %v3626_v29 = vmul.f32 %v8935_v34, %v8646_v33  ;;  %v9854_v34 = vld [vmem:[#allocation81_spill] sm:$0xff] }
 0x8e1   : > { %9850 = vst [vmem:[#allocation83_spill] sm:$0xff] %v9097_v12  ;;  %v7164_v41 = vpop.eup %7163 }
 0x8e2   : > { %v9099_v1 = vpop.eup %7165  ;;  %v1892_v48 = vmul.f32 %v7164_v41, %v9802_v31  ;;  %v1648_v8 = vpop.xlane.xlu1 %1647  ;;  %v1844_v6 = vmul.f32 %v7164_v41, %v9851_v25  ;;  %v2761_v25 = vmul.f32 %v8950_v24, %v8398_v60  ;;  %v9853_v41 = vld [vmem:[#allocation33_spill] sm:$0xff]  ;;  %v2763_v24 = vmul.f32 %v8961_v11, %v8412_v43 }
 0x8e3   : > { %7175 = vrcp.f32 %v1648_v8  ;;  %4113 = vadd.xlane.f32.xlu0 %v8903_v59  ;;  %v3271_v0 = vpop.xlane.xlu0 %3270  ;;  %v9108_v18 = vmul.f32 %v9099_v1, %v9852_v19  ;;  %v2765_v11 = vmul.f32 %v8985_v40, %v8428_v35  ;;  %v2767_v40 = vmul.f32 %v9008_v51, %v8441_v57 }
 0x8e4   : > { %v2775_v12 = vadd.f32 %v2759_v22, %v1892_v48  ;;  %7177 = vrcp.f32 %v3271_v0  ;;  %1860 = vst.msk [vmem:[#allocation5] sm:$0xff] %vm1313_vm0, %v1844_v6  ;;  %v3628_v48 = vmul.f32 %v8956_v45, %v8656_v26  ;;  %v9856_v45 = vld [vmem:[#allocation67_spill] sm:$0xff]  ;;  %v3634_v57 = vmul.f32 %v9018_v30, %v8697_v56 }
 0x8e5   : > { %v7168_v39 = vpop.eup %7167 }
 0x8e6   : > { %v9113_v31 = vpop.eup %7169  ;;  %v1894_v2 = vmul.f32 %v7168_v39, %v9803_v61  ;;  %v1652_v8 = vpop.xlane.xlu1 %1651  ;;  %v1846_v59 = vmul.f32 %v7168_v39, %v9853_v41  ;;  %v9119_v19 = vadd.f32 %v3626_v29, %v2775_v12  ;;  %v9855_v29 = vld [vmem:[#allocation35_spill] sm:$0xff] }
 0x8e7   : > { %7179 = vrcp.f32 %v1652_v8  ;;  %4117 = vadd.xlane.f32.xlu0 %v8910_v49  ;;  %v1638_v33 = vpop.xlane.xlu0 %1637  ;;  %v9124_v6 = vmul.f32 %v9113_v31, %v9854_v34  ;;  %v9857_v34 = vld [vmem:[#allocation37_spill] sm:$0xff] }
 0x8e8   : > { %v2777_v22 = vadd.f32 %v2761_v25, %v1894_v2  ;;  %7181 = vrcp.f32 %v1638_v33  ;;  %1862 = vst.msk [vmem:[#allocation5 + $0x10] sm:$0xff] %vm1313_vm0, %v1846_v59  ;;  %v3630_v25 = vmul.f32 %v8972_v37, %v8668_v20  ;;  %v9858_v37 = vld [vmem:[#allocation82_spill] sm:$0xff] }
 0x8e9   : > { %v7172_v60 = vpop.eup %7171 }
 0x8ea   : > { %v9129_v61 = vpop.eup %7173  ;;  %v1896_v12 = vmul.f32 %v7172_v60, %v9804_v17  ;;  %v1656_v0 = vpop.xlane.xlu1 %1655  ;;  %v1848_v39 = vmul.f32 %v7172_v60, %v9855_v29  ;;  %v9135_v8 = vadd.f32 %v3628_v48, %v2777_v22 }
 0x8eb   : > { %7183 = vrcp.f32 %v1656_v0  ;;  %4121 = vadd.xlane.f32.xlu0 %v8915_v14  ;;  %v1642_v26 = vpop.xlane.xlu0 %1641  ;;  %v9140_v59 = vmul.f32 %v9129_v61, %v9856_v45 }
 0x8ec   : > { %v2779_v2 = vadd.f32 %v2763_v24, %v1896_v12  ;;  %7185 = vrcp.f32 %v1642_v26  ;;  %1864 = vst.msk [vmem:[#allocation5 + $0x20] sm:$0xff] %vm1313_vm0, %v1848_v39  ;;  %v3632_v24 = vmul.f32 %v8998_v3, %v8684_v4  ;;  %v9859_v39 = vld [vmem:[#allocation39_spill] sm:$0xff] }
 0x8ed   : > { %v7176_v43 = vpop.eup %7175 }
 0x8ee   : > { %v9145_v17 = vpop.eup %7177  ;;  %v1898_v41 = vmul.f32 %v7176_v43, %v9805_v52  ;;  %v1660_v33 = vpop.xlane.xlu1 %1659  ;;  %v1850_v48 = vmul.f32 %v7176_v43, %v9857_v34  ;;  %v9151_v22 = vadd.f32 %v3630_v25, %v2779_v2  ;;  %v2760_v25 = vmul.f32 %v8929_v53, %v8388_v28  ;;  %v9860_v2 = vld [vmem:[#allocation30_spill] sm:$0xff] }
 0x8ef   : > { %7187 = vrcp.f32 %v1660_v33  ;;  %4125 = vadd.xlane.f32.xlu0 %v8921_v10  ;;  %v1646_v20 = vpop.xlane.xlu0 %1645  ;;  %v9156_v60 = vmul.f32 %v9145_v17, %v9858_v37  ;;  %v9862_v28 = vld [vmem:[#allocation46_spill] sm:$0xff]  ;;  %v9865_v37 = vld [vmem:[#allocation41_spill] sm:$0xff] }
 0x8f0   : > { %v2781_v12 = vadd.f32 %v2765_v11, %v1898_v41  ;;  %7189 = vrcp.f32 %v1646_v20  ;;  %1866 = vst.msk [vmem:[#allocation5 + $0x30] sm:$0xff] %vm1313_vm0, %v1850_v48  ;;  %v9861_v11 = vld [vmem:[#allocation69_spill] sm:$0xff]  ;;  %v9863_v34 = vld [vmem:[#allocation50_spill] sm:$0xff]  ;;  %v9864_v20 = vld [vmem:[#allocation24_spill] sm:$0xff] }
 0x8f1   : > { %v7180_v35 = vpop.eup %7179  ;;  %v3627_v41 = vmul.f32 %v8942_v5, %v9861_v11  ;;  %v2769_v48 = vmul.f32 %v9029_v54, %v9863_v34  ;;  %v9875_v34 = vld [vmem:[#allocation34_spill] sm:$0xff] }
 0x8f2   : > { %v7182_v52 = vpop.eup %7181  ;;  %v1900_v0 = vmul.f32 %v7180_v35, %v9806_v32  ;;  %v1664_v29 = vpop.xlane.xlu1 %1663  ;;  %v1852_v26 = vmul.f32 %v7180_v35, %v9859_v39  ;;  %v9165_v45 = vadd.f32 %v3632_v24, %v2781_v12  ;;  %v9866_v35 = vld [vmem:[#allocation17_spill] sm:$0xff] }
 0x8f3   : > { %v1893_v4 = vmul.f32 %v7182_v52, %v9807_v21  ;;  %7191 = vrcp.f32 %v1664_v29  ;;  %4129 = vadd.xlane.f32.xlu0 %v8967_v13  ;;  %v1650_v3 = vpop.xlane.xlu0 %1649  ;;  %v1845_v43 = vmul.f32 %v7182_v52, %v9860_v2  ;;  %v2762_v21 = vmul.f32 %v8991_v63, %v9862_v28  ;;  %v9867_v63 = vld [vmem:[#allocation32_spill] sm:$0xff]  ;;  %v9868_v29 = vld [vmem:[#allocation74_spill] sm:$0xff]  ;;  %v9873_v28 = vld [vmem:[#allocation47_spill] sm:$0xff] }
 0x8f4   : > { %v2783_v32 = vadd.f32 %v2767_v40, %v1900_v0  ;;  %7193 = vrcp.f32 %v1650_v3  ;;  %1868 = vst.msk [vmem:[#allocation5 + $0x40] sm:$0xff] %vm1313_vm0, %v1852_v26  ;;  %v3636_v54 = vmul.f32 %v9040_v62, %v9868_v29  ;;  %v9872_v62 = vld [vmem:[#allocation43_spill] sm:$0xff] }
 0x8f5   : > { %v7184_v51 = vpop.eup %7183  ;;  %v2776_v53 = vadd.f32 %v2760_v25, %v1893_v4  ;;  %1861 = vst.msk [vmem:[#allocation5 + $0x8] sm:$0xff] %vm1313_vm0, %v1845_v43  ;;  %v9869_v25 = vld [vmem:[#allocation70_spill] sm:$0xff]  ;;  %v9870_v43 = vld [vmem:[#allocation52_spill] sm:$0xff] }
 0x8f6   : > { %v7186_v33 = vpop.eup %7185  ;;  %v1902_v56 = vmul.f32 %v7184_v51, %v9864_v20  ;;  %v1666_v30 = vpop.xlane.xlu1 %1665  ;;  %v1854_v24 = vmul.f32 %v7184_v51, %v9865_v37  ;;  %v9184_v12 = vadd.f32 %v3634_v57, %v2783_v32  ;;  %v3629_v4 = vmul.f32 %v9000_v46, %v9869_v25  ;;  %v9871_v32 = vld [vmem:[#allocation26_spill] sm:$0xff] }
 0x8f7   : > { %v1895_v52 = vmul.f32 %v7186_v33, %v9866_v35  ;;  %7195 = vrcp.f32 %v1666_v30  ;;  %4133 = vadd.xlane.f32.xlu0 %v8978_v27  ;;  %v1654_v5 = vpop.xlane.xlu0 %1653  ;;  %v1847_v40 = vmul.f32 %v7186_v33, %v9867_v63  ;;  %v9189_v0 = vadd.f32 %v3627_v41, %v2776_v53  ;;  %v9874_v33 = vld [vmem:[#allocation19_spill] sm:$0xff] }
 0x8f8   : > { %v2785_v39 = vadd.f32 %v2769_v48, %v1902_v56  ;;  %7197 = vrcp.f32 %v1654_v5  ;;  %1870 = vst.msk [vmem:[#allocation5 + $0x50] sm:$0xff] %vm1313_vm0, %v1854_v24  ;;  %v2771_v57 = vmul.f32 %v9051_v36, %v9870_v43  ;;  %v2764_v53 = vmul.f32 %v9010_v16, %v9873_v28  ;;  %v9876_v36 = vld [vmem:[#allocation76_spill] sm:$0xff]  ;;  %v9877_v24 = vld [vmem:[#allocation71_spill] sm:$0xff]  ;;  %v9878_v5 = vld [vmem:[#allocation54_spill] sm:$0xff] }
 0x8f9   : > { %v7188_v26 = vpop.eup %7187  ;;  %v2778_v3 = vadd.f32 %v2762_v21, %v1895_v52  ;;  %1863 = vst.msk [vmem:[#allocation5 + $0x18] sm:$0xff] %vm1313_vm0, %v1847_v40  ;;  %v3638_v56 = vmul.f32 %v9062_v7, %v9876_v36  ;;  %v3631_v16 = vmul.f32 %v9020_v23, %v9877_v24  ;;  %v2773_v63 = vmul.f32 %v9075_v38, %v9878_v5  ;;  %v9879_v40 = vld [vmem:[#allocation28_spill] sm:$0xff]  ;;  %v9880_v7 = vld [vmem:[#allocation45_spill] sm:$0xff] }
 0x8fa   : > { %v7190_v2 = vpop.eup %7189  ;;  %v1904_v51 = vmul.f32 %v7188_v26, %v9871_v32  ;;  %4109 = vadd.xlane.f32.xlu1 %v8896_v42  ;;  %v1856_v11 = vmul.f32 %v7188_v26, %v9872_v62  ;;  %v9202_v41 = vadd.f32 %v3636_v54, %v2785_v39  ;;  %v9881_v26 = vld [vmem:[#allocation48_spill] sm:$0xff]  ;;  %v9884_v32 = vld [vmem:[#allocation78_spill] sm:$0xff] }
 0x8fb   : > { %v1897_v46 = vmul.f32 %v7190_v2, %v9874_v33  ;;  %4137 = vadd.xlane.f32.xlu0 %v8981_v9  ;;  %v1658_v21 = vpop.xlane.xlu0 %1657  ;;  %v1849_v48 = vmul.f32 %v7190_v2, %v9875_v34  ;;  %v9209_v20 = vadd.f32 %v3629_v4, %v2778_v3  ;;  %v2766_v25 = vmul.f32 %v9031_v15, %v9881_v26  ;;  %v9882_v4 = vld [vmem:[#allocation21_spill] sm:$0xff]  ;;  %v9883_v2 = vld [vmem:[#allocation36_spill] sm:$0xff]  ;;  %v9886_v33 = vld [vmem:[#allocation55_spill] sm:$0xff] }
 0x8fc   : > { %v2787_v30 = vadd.f32 %v2771_v57, %v1904_v51  ;;  %7199 = vrcp.f32 %v1658_v21  ;;  %1872 = vst.msk [vmem:[#allocation5 + $0x60] sm:$0xff] %vm1313_vm0, %v1856_v11  ;;  %v3640_v38 = vmul.f32 %v9087_v58, %v9884_v32  ;;  %v9885_v11 = vld [vmem:[#allocation72_spill] sm:$0xff]  ;;  %v9887_v21 = vld [vmem:[#allocation29_spill] sm:$0xff] }
 0x8fd   : > { %v7192_v37 = vpop.eup %7191  ;;  %v2780_v35 = vadd.f32 %v2764_v53, %v1897_v46  ;;  %1865 = vst.msk [vmem:[#allocation5 + $0x28] sm:$0xff] %vm1313_vm0, %v1849_v48  ;;  %v3633_v28 = vmul.f32 %v9042_v50, %v9885_v11  ;;  %v2774_v46 = vmul.f32 %v9129_v61, %v9886_v33  ;;  %v9888_v48 = vld [vmem:[#allocation15_spill] sm:$0xff]  ;;  %v9889_v36 = vld [vmem:[#allocation44_spill] sm:$0xff]  ;;  %v9900_v32 = vld [vmem:[#allocation25_spill] sm:$0xff] }
 0x8fe   : > { %v7194_v52 = vpop.eup %7193  ;;  %v1906_v29 = vmul.f32 %v7192_v37, %v9879_v40  ;;  %4107 = vadd.xlane.f32.xlu1 %v8892_v47  ;;  %v1858_v54 = vmul.f32 %v7192_v37, %v9880_v7  ;;  %v9222_v39 = vadd.f32 %v3638_v56, %v2787_v30  ;;  %v9890_v30 = vld [vmem:[#allocation49_spill] sm:$0xff]  ;;  %v9896_v7 = vld [vmem:[#allocation59_spill] sm:$0xff]  ;;  %v9903_v33 = vld [vmem:[#allocation20_spill] sm:$0xff] }
 0x8ff   : > { %v1899_v23 = vmul.f32 %v7194_v52, %v9882_v4  ;;  %v1662_v3 = vpop.xlane.xlu0 %1661  ;;  %v1851_v43 = vmul.f32 %v7194_v52, %v9883_v2  ;;  %v9228_v57 = vadd.f32 %v3631_v16, %v2780_v35  ;;  %v9891_v37 = vld [vmem:[#allocation57_spill] sm:$0xff]  ;;  %v9892_v16 = vld [vmem:[#allocation23_spill] sm:$0xff]  ;;  %v9893_v35 = vld [vmem:[#allocation38_spill] sm:$0xff] }
 0x900   : > { %v2789_v51 = vadd.f32 %v2773_v63, %v1906_v29  ;;  %7201 = vrcp.f32 %v1662_v3  ;;  %1874 = vst.msk [vmem:[#allocation5 + $0x70] sm:$0xff] %vm1313_vm0, %v1858_v54  ;;  %v2768_v24 = vmul.f32 %v9891_v37, %v9890_v30  ;;  %v9894_v63 = vld [vmem:[#allocation79_spill] sm:$0xff]  ;;  %v9895_v29 = vld [vmem:[#allocation73_spill] sm:$0xff]  ;;  %v9897_v4 = vld [vmem:[#allocation18_spill] sm:$0xff] }
 0x901   : > { %v7196_v62 = vpop.eup %7195  ;;  %v2782_v53 = vadd.f32 %v2766_v25, %v1899_v23  ;;  %1867 = vst.msk [vmem:[#allocation5 + $0x38] sm:$0xff] %vm1313_vm0, %v1851_v43  ;;  %v3641_v61 = vmul.f32 %v9145_v17, %v9894_v63  ;;  %v3635_v54 = vmul.f32 %v9896_v7, %v9895_v29  ;;  %v9898_v3 = vld [vmem:[#allocation51_spill] sm:$0xff]  ;;  %v9899_v2 = vld [vmem:[#allocation85_spill] sm:$0xff]  ;;  %v9906_v30 = vld [vmem:[#allocation42_spill] sm:$0xff] }
 0x902   : > { %v7198_v15 = vpop.eup %7197  ;;  %v1907_v34 = vmul.f32 %v7196_v62, %v9887_v21  ;;  %4111 = vadd.xlane.f32.xlu1 %v9888_v48  ;;  %v9240_v58 = vadd.f32 %v3640_v38, %v2789_v51  ;;  %v1859_v56 = vmul.f32 %v7196_v62, %v9889_v36  ;;  %v2770_v43 = vmul.f32 %v9899_v2, %v9898_v3  ;;  %v9901_v51 = vld [vmem:[#allocation40_spill] sm:$0xff]  ;;  %v9902_v11 = vld [vmem:[#allocation75_spill] sm:$0xff]  ;;  %v9910_v63 = vld [vmem:[#allocation14_spill] sm:$0xff] }
 0x903   : > { %v1901_v50 = vmul.f32 %v7198_v15, %v9892_v16  ;;  %v1853_v52 = vmul.f32 %v7198_v15, %v9893_v35  ;;  %v9247_v5 = vadd.f32 %v3633_v28, %v2782_v53  ;;  %v3637_v28 = vmul.f32 %v9089_v55, %v9902_v11  ;;  %v9908_v55 = vld [vmem:[#allocation22_spill] sm:$0xff] }
 0x904   : > { %v2790_v40 = vadd.f32 %v2774_v46, %v1907_v34  ;;  %1875 = vst.msk [vmem:[#allocation5 + $0x78] sm:$0xff] %vm1313_vm0, %v1859_v56  ;;  %v9904_v46 = vld [vmem:[#allocation53_spill] sm:$0xff]  ;;  %v9905_v34 = vld [vmem:[#allocation27_spill] sm:$0xff]  ;;  %v9913_v7 = vld [vmem:[#allocation62_spill] sm:$0xff] }
 0x905   : > { %v2784_v26 = vadd.f32 %v2768_v24, %v1901_v50  ;;  %1869 = vst.msk [vmem:[#allocation5 + $0x48] sm:$0xff] %vm1313_vm0, %v1853_v52  ;;  %v2772_v21 = vmul.f32 %v9099_v1, %v9904_v46  ;;  %v9907_v24 = vld [vmem:[#allocation77_spill] sm:$0xff]  ;;  %v9909_v1 = vld [vmem:[#allocation60_spill] sm:$0xff]  ;;  %v9915_v3 = vld [vmem:[#allocation66_spill] sm:$0xff] }
 0x906   : > { %v7200_v25 = vpop.eup %7199  ;;  %4115 = vadd.xlane.f32.xlu1 %v9897_v4  ;;  %v9256_v23 = vadd.f32 %v3641_v61, %v2790_v40  ;;  %v3639_v16 = vmul.f32 %v9113_v31, %v9907_v24  ;;  %v9911_v31 = vld [vmem:[#allocation56_spill] sm:$0xff]  ;;  %v9912_v40 = vld [vmem:[#allocation58_spill] sm:$0xff] }
 0x907   : > { %v1903_v38 = vmul.f32 %v7200_v25, %v9900_v32  ;;  %v9261_v17 = vadd.f32 %v3635_v54, %v2784_v26  ;;  %v1855_v62 = vmul.f32 %v7200_v25, %v9901_v51  ;;  %v9914_v26 = vld [vmem:[#allocation64_spill] sm:$0xff] }
 0x909   : > { %v2786_v53 = vadd.f32 %v2770_v43, %v1903_v38  ;;  %1871 = vst.msk [vmem:[#allocation5 + $0x58] sm:$0xff] %vm1313_vm0, %v1855_v62  ;;  %v9916_v43 = vld [vmem:[#allocation68_spill] sm:$0xff]  ;;  %v9917_v38 = vld [vmem:[#allocation61_spill] sm:$0xff] }
 0x90a   : > { %v7202_v15 = vpop.eup %7201  ;;  %4119 = vadd.xlane.f32.xlu1 %v9903_v33 }
 0x90b   : > { %v1905_v36 = vmul.f32 %v7202_v15, %v9905_v34  ;;  %v9271_v56 = vadd.f32 %v3637_v28, %v2786_v53  ;;  %v1857_v37 = vmul.f32 %v7202_v15, %v9906_v30  ;;  %v4557_v15 = vld [vmem:[%s9652_s5] sm:$0xff] }
 0x90d   : > { %v2788_v50 = vadd.f32 %v2772_v21, %v1905_v36  ;;  %1873 = vst.msk [vmem:[#allocation5 + $0x68] sm:$0xff] %vm1313_vm0, %v1857_v37 }
 0x90e   : > { %4123 = vadd.xlane.f32.xlu1 %v9908_v55  ;;  %v2679_v35 = vpop.permute.xlu0 %2678 }
 0x90f   : > { %v9278_v52 = vadd.f32 %v3639_v16, %v2788_v50  ;;  %2727 = vst.msk [vmem:[#allocation5] sm:$0xff] %vm2726_vm2, %v2679_v35  ;;  %v9918_v16 = vld [vmem:[#allocation84_spill] sm:$0xff] }
 0x911   : > { %3561 = vrot.lane.b32.xlu0 %v9909_v1, %s7300_s23 }
 0x912   : > { %4127 = vadd.xlane.f32.xlu1 %v9910_v63  ;;  %v2681_v61 = vpop.permute.xlu1 %2680 }
 0x913   : > { %2728 = vst.msk [vmem:[#allocation5 + $0x8] sm:$0xff] %vm2726_vm2, %v2681_v61 }
 0x915   : > { %2698 = vrot.lane.b32.xlu0 %v9911_v31, %s7301_s15 }
 0x916   : > { %4131 = vadd.xlane.f32.xlu1 %v9912_v40  ;;  %v3546_v29 = vpop.permute.xlu0 %3545 }
 0x917   : > { %3594 = vst.msk [vmem:[#allocation5] sm:$0xff] %vm3593_vm3, %v3546_v29 }
 0x919   : > { %3565 = vrot.lane.b32.xlu0 %v9913_v7, %s7300_s23 }
 0x91a   : > { %v3548_v54 = vpop.permute.xlu1 %3547 }
 0x91b   : > { %3595 = vst.msk [vmem:[#allocation5 + $0x8] sm:$0xff] %vm3593_vm3, %v3548_v54  ;;  %v4559_v54 = vld [vmem:[%s9652_s5 + $0x10] sm:$0xff] }
 0x91d   : > { %2702 = vrot.lane.b32.xlu0 %v9914_v26, %s7301_s15  ;;  %v4560_v26 = vld [vmem:[%s9652_s5 + $0x18] sm:$0xff] }
 0x91e   : > { %v2683_v25 = vpop.permute.xlu0 %2682 }
 0x91f   : > { %2729 = vst.msk [vmem:[#allocation5 + $0x10] sm:$0xff] %vm2726_vm2, %v2683_v25 }
 0x921   : > { %3569 = vrot.lane.b32.xlu0 %v9915_v3, %s7300_s23  ;;  %v6667_v3 = vpack.c.bf16 %v4560_v26, %v4559_v54  ;;  %v9921_v26 = vld [vmem:[#allocation16_spill] sm:$0xff] }
 0x922   : > { %v3550_v2 = vpop.permute.xlu0 %3549 }
 0x923   : > { %3596 = vst.msk [vmem:[#allocation5 + $0x10] sm:$0xff] %vm3593_vm3, %v3550_v2  ;;  %v9919_v2 = vld [vmem:[#allocation63_spill] sm:$0xff] }
 0x925   : > { %2706 = vrot.lane.b32.xlu0 %v9916_v43, %s7301_s15  ;;  %v9920_v43 = vld [vmem:[#allocation83_spill] sm:$0xff] }
 0x926   : > { %v2687_v32 = vpop.permute.xlu0 %2686 }
 0x927   : > { %3563 = vrot.lane.b32.xlu1 %v9917_v38, %s7300_s23  ;;  %2731 = vst.msk [vmem:[#allocation5 + $0x20] sm:$0xff] %vm2726_vm2, %v2687_v32  ;;  %v4561_v38 = vld [vmem:[%s9652_s5 + $0x20] sm:$0xff] }
 0x929   : > { %3573 = vrot.lane.b32.xlu0 %v9093_v44, %s7300_s23  ;;  %v4558_v44 = vld [vmem:[%s9652_s5 + $0x8] sm:$0xff] }
 0x92a   : > { %v3554_v51 = vpop.permute.xlu0 %3553  ;;  %v6663_v21 = vpack.c.bf16 %v4558_v44, %v4557_v15  ;;  %v4566_v44 = vld [vmem:[%s9652_s5 + $0x48] sm:$0xff] }
 0x92b   : > { %3598 = vst.msk [vmem:[#allocation5 + $0x20] sm:$0xff] %vm3593_vm3, %v3554_v51  ;;  %v4562_v51 = vld [vmem:[%s9652_s5 + $0x28] sm:$0xff] }
 0x92c   : > { %6664 = vmatprep.subr.bf16.mxu0 %v6663_v21 }
 0x92d   : > { %6666 = vmatpush3.bf16.xpose.msra.mxu0 %v6663_v21  ;;  %v4568_v21 = vld [vmem:[%s9652_s5 + $0x58] sm:$0xff] }
 0x92e   : > { %v2691_v62 = vpop.permute.xlu0 %2690  ;;  %6668 = vmatprep.subr.bf16.mxu0 %v6667_v3 }
 0x92f   : > { %2733 = vst.msk [vmem:[#allocation5 + $0x30] sm:$0xff] %vm2726_vm2, %v2691_v62 }
 0x930   : > { %v2685_v11 = vpop.permute.xlu1 %2684 }
 0x931   : > { %2730 = vst.msk [vmem:[#allocation5 + $0x18] sm:$0xff] %vm2726_vm2, %v2685_v11  ;;  %v6671_v11 = vpack.c.bf16 %v4562_v51, %v4561_v38 }
 0x932   : > { %v3558_v28 = vpop.permute.xlu0 %3557 }
 0x933   : > { %3600 = vst.msk [vmem:[#allocation5 + $0x30] sm:$0xff] %vm3593_vm3, %v3558_v28  ;;  %v4563_v28 = vld [vmem:[%s9652_s5 + $0x30] sm:$0xff] }
 0x934   : > { %v3552_v53 = vpop.permute.xlu1 %3551 }
 0x935   : > { %3597 = vst.msk [vmem:[#allocation5 + $0x18] sm:$0xff] %vm3593_vm3, %v3552_v53  ;;  %6670 = vmatpush3.bf16.xpose.msra.mxu0 %v6667_v3  ;;  %v4564_v53 = vld [vmem:[%s9652_s5 + $0x38] sm:$0xff] }
 0x936   : > { %v2695_v46 = vpop.permute.xlu0 %2694  ;;  %6672 = vmatprep.subr.bf16.mxu0 %v6671_v11  ;;  %v6675_v15 = vpack.c.bf16 %v4564_v53, %v4563_v28 }
 0x937   : > { %2735 = vst.msk [vmem:[#allocation5 + $0x40] sm:$0xff] %vm2726_vm2, %v2695_v46  ;;  %v4567_v46 = vld [vmem:[%s9652_s5 + $0x50] sm:$0xff] }
 0x938   : > { %v2689_v34 = vpop.permute.xlu1 %2688 }
 0x939   : > { %2732 = vst.msk [vmem:[#allocation5 + $0x28] sm:$0xff] %vm2726_vm2, %v2689_v34 }
 0x93c   : > { %v3556_v36 = vpop.permute.xlu1 %3555 }
 0x93d   : > { %3599 = vst.msk [vmem:[#allocation5 + $0x28] sm:$0xff] %vm3593_vm3, %v3556_v36  ;;  %6674 = vmatpush3.bf16.xpose.msra.mxu0 %v6671_v11 }
 0x93e   : > { %6676 = vmatprep.subr.bf16.mxu0 %v6675_v15 }
 0x940   : > { %v2693_v30 = vpop.permute.xlu1 %2692 }
 0x941   : > { %2734 = vst.msk [vmem:[#allocation5 + $0x38] sm:$0xff] %vm2726_vm2, %v2693_v30  ;;  %v4569_v30 = vld [vmem:[%s9652_s5 + $0x60] sm:$0xff] }
 0x944   : > { %v3560_v37 = vpop.permute.xlu1 %3559 }
 0x945   : > { %3601 = vst.msk [vmem:[#allocation5 + $0x38] sm:$0xff] %vm3593_vm3, %v3560_v37  ;;  %6678 = vmatpush3.bf16.xpose.msra.mxu0 %v6675_v15  ;;  %v4570_v37 = vld [vmem:[%s9652_s5 + $0x68] sm:$0xff] }
 0x946   : > { %v6687_v54 = vpack.c.bf16 %v4570_v37, %v4569_v30 }
 0x948   : > { %v2697_v24 = vpop.permute.xlu1 %2696 }
 0x949   : > { %2736 = vst.msk [vmem:[#allocation5 + $0x48] sm:$0xff] %vm2726_vm2, %v2697_v24 }
 0x94b   : > { %4135 = vadd.xlane.f32.xlu1 %v9918_v16 }
 0x94e   : > { %v9323_v50 = vpop.f32.mrb[64].mxu0 }
 0x94f   : > { %v9325_v35 = vpop.f32.mrb[65].mxu0 }
 0x952   : > { %v9327_v1 = vpop.f32.mrb[66].mxu0 }
 0x953   : > { %v9329_v61 = vpop.f32.mrb[67].mxu0 }
 0x956   : > { %v9331_v31 = vpop.f32.mrb[68].mxu0 }
 0x957   : > { %v9333_v29 = vpop.f32.mrb[69].mxu0 }
 0x95a   : > { %v9335_v7 = vpop.f32.mrb[70].mxu0 }
 0x95b   : > { %v9343_v25 = vpop.f32.mrb[71].mxu0 }
 0x95c   : > { %2700 = vrot.lane.b32.xlu1 %v9919_v2, %s7301_s15 }
 0x960   : > { %3567 = vrot.lane.b32.xlu1 %v9920_v43, %s7300_s23 }
 0x962   : > { %v9349_v32 = vpop.f32.mrb[72].mxu0 }
 0x963   : > { %v9357_v62 = vpop.f32.mrb[73].mxu0 }
 0x964   : > { %2704 = vrot.lane.b32.xlu1 %v9108_v18, %s7301_s15 }
 0x968   : > { %3571 = vrot.lane.b32.xlu1 %v9124_v6, %s7300_s23  ;;  %v4565_v6 = vld [vmem:[%s9652_s5 + $0x40] sm:$0xff] }
 0x96c   : > { %2708 = vrot.lane.b32.xlu1 %v9140_v59, %s7301_s15  ;;  %v6679_v59 = vpack.c.bf16 %v4566_v44, %v4565_v6 }
 0x96e   : > { %6680 = vmatprep.subr.bf16.mxu0 %v6679_v59 }
 0x96f   : > { %6682 = vmatpush3.bf16.xpose.msra.mxu0 %v6679_v59 }
 0x970   : > { %3575 = vrot.lane.b32.xlu1 %v9156_v60, %s7300_s23  ;;  %v4114_v18 = vpop.xlane.xlu0 %4113  ;;  %v6683_v60 = vpack.c.bf16 %v4568_v21, %v4567_v46  ;;  %s9554_s23 = scalar_lea.vmem [#allocation10], %s7499_s25  ;;  %s9574_s25 = scalar_lea.sflag [#allocation12], %s574_s20 }
 0x971   : > { %7203 = vrcp.f32 %v4114_v18 }
 0x972   : > { %6684 = vmatprep.subr.bf16.mxu0 %v6683_v60 }
 0x974   : > { %v4118_v34 = vpop.xlane.xlu0 %4117 }
 0x975   : > { %7205 = vrcp.f32 %v4118_v34 }
 0x977   : > { %6686 = vmatpush3.bf16.xpose.msra.mxu0 %v6683_v60 }
 0x978   : > { %v4122_v36 = vpop.xlane.xlu0 %4121  ;;  %6688 = vmatprep.subr.bf16.mxu0 %v6687_v54 }
 0x979   : > { %7207 = vrcp.f32 %v4122_v36  ;;  %v4572_v36 = vld [vmem:[%s9652_s5 + $0x78] sm:$0xff] }
 0x97b   : > { %v9391_v24 = vpop.eup %7203 }
 0x97c   : > { %v4496_v3 = vmul.f32 %v9391_v24, %v9921_v26  ;;  %v4126_v2 = vpop.xlane.xlu0 %4125 }
 0x97d   : > { %7209 = vrcp.f32 %v4126_v2 }
 0x97e   : > { %v4512_v43 = vadd.f32 %v4496_v3, %v9209_v20 }
 0x97f   : > { %v9396_v38 = vpop.eup %7205  ;;  %6690 = vmatpush3.bf16.xpose.msra.mxu0 %v6687_v54 }
 0x980   : > { %v4760_v51 = vmul.f32 0.25, %v4512_v43  ;;  %v4498_v11 = vmul.f32 %v9396_v38, %v8910_v49  ;;  %v4130_v28 = vpop.xlane.xlu0 %4129 }
 0x981   : > { %7211 = vrcp.f32 %v4130_v28 }
 0x982   : > { %4776 = vst [vmem:[%s9401_s18 + $0x18] sm:$0xff] %v4760_v51  ;;  %v4514_v53 = vadd.f32 %v4498_v11, %v9228_v57 }
 0x983   : > { %v9405_v15 = vpop.eup %7207 }
 0x984   : > { %v4762_v20 = vmul.f32 0.25, %v4514_v53  ;;  %v4500_v18 = vmul.f32 %v9405_v15, %v8915_v14  ;;  %v4134_v6 = vpop.xlane.xlu0 %4133 }
 0x985   : > { %7213 = vrcp.f32 %v4134_v6 }
 0x986   : > { %4778 = vst [vmem:[%s9401_s18 + $0x28] sm:$0xff] %v4762_v20  ;;  %v4516_v49 = vadd.f32 %v4500_v18, %v9247_v5  ;;  %v4571_v5 = vld [vmem:[%s9652_s5 + $0x70] sm:$0xff] }
 0x987   : > { %v9411_v44 = vpop.eup %7209  ;;  %v4110_v46 = vpop.xlane.xlu1 %4109  ;;  %v6691_v54 = vpack.c.bf16 %v4572_v36, %v4571_v5 }
 0x988   : > { %v9413_v59 = vpop.f32.mrb[74].mxu0  ;;  %v4764_v21 = vmul.f32 0.25, %v4516_v49  ;;  %v4502_v57 = vmul.f32 %v9411_v44, %v8921_v10  ;;  %7215 = vrcp.f32 %v4110_v46  ;;  %v4138_v34 = vpop.xlane.xlu0 %4137 }
 0x989   : > { %v9417_v60 = vpop.f32.mrb[75].mxu0  ;;  %7217 = vrcp.f32 %v4138_v34  ;;  %6692 = vmatprep.subr.bf16.mxu0 %v6691_v54 }
 0x98a   : > { %4780 = vst [vmem:[%s9401_s18 + $0x38] sm:$0xff] %v4764_v21  ;;  %v4518_v14 = vadd.f32 %v4502_v57, %v9261_v17  ;;  %6694 = vmatpush3.bf16.xpose.msra.mxu0 %v6691_v54  ;;  %v4383_v54 = vmul.f32 %v9391_v24, %v9327_v1  ;;  %v4385_v24 = vmul.f32 %v9396_v38, %v9331_v31 }
 0x98b   : > { %v9427_v30 = vpop.eup %7211  ;;  %v4108_v10 = vpop.xlane.xlu1 %4107  ;;  %v4387_v31 = vmul.f32 %v9405_v15, %v9335_v7  ;;  %v4389_v7 = vmul.f32 %v9411_v44, %v9349_v32 }
 0x98c   : > { %v9429_v37 = vpop.f32.mrb[76].mxu0  ;;  %v4766_v26 = vmul.f32 0.25, %v4518_v14  ;;  %v4504_v3 = vmul.f32 %v9427_v30, %v8967_v13  ;;  %7219 = vrcp.f32 %v4108_v10  ;;  %v3562_v2 = vpop.permute.xlu0 %3561 }
 0x98d   : > { %v9433_v17 = vpop.f32.mrb[77].mxu0  ;;  %3602 = vst.msk [vmem:[#allocation5 + $0x40] sm:$0xff] %vm3593_vm3, %v3562_v2 }
 0x98e   : > { %4782 = vst [vmem:[%s9401_s18 + $0x48] sm:$0xff] %v4766_v26  ;;  %v4520_v43 = vadd.f32 %v4504_v3, %v9271_v56 }
 0x98f   : > { %v9438_v51 = vpop.eup %7213  ;;  %v4112_v11 = vpop.xlane.xlu1 %4111 }
 0x990   : > { %v9440_v28 = vpop.f32.mrb[78].mxu0  ;;  %v4768_v53 = vmul.f32 0.25, %v4520_v43  ;;  %v4506_v13 = vmul.f32 %v9438_v51, %v8978_v27  ;;  %7221 = vrcp.f32 %v4112_v11  ;;  %v2699_v18 = vpop.permute.xlu0 %2698 }
 0x991   : > { %v9444_v20 = vpop.f32.mrb[79].mxu0  ;;  %2737 = vst.msk [vmem:[#allocation5 + $0x50] sm:$0xff] %vm2726_vm2, %v2699_v18 }
 0x992   : > { %v7216_v6 = vpop.eup %7215  ;;  %4784 = vst [vmem:[%s9401_s18 + $0x58] sm:$0xff] %v4768_v53  ;;  %v4522_v56 = vadd.f32 %v4506_v13, %v9278_v52 }
 0x993   : > { %v9449_v49 = vpop.eup %7217  ;;  %v4494_v46 = vmul.f32 %v7216_v6, %v8896_v42  ;;  %v4116_v21 = vpop.xlane.xlu1 %4115  ;;  %v4381_v57 = vmul.f32 %v7216_v6, %v9323_v50 }
 0x994   : > { %v4770_v34 = vmul.f32 0.25, %v4522_v56  ;;  %v4508_v27 = vmul.f32 %v9449_v49, %v8981_v9  ;;  %7223 = vrcp.f32 %v4116_v21  ;;  %v3566_v14 = vpop.permute.xlu0 %3565 }
 0x995   : > { %v4510_v5 = vadd.f32 %v4494_v46, %v9189_v0  ;;  %4414 = vrot.lane.b32.xlu1 %v4381_v57, %s7299_s26  ;;  %3604 = vst.msk [vmem:[#allocation5 + $0x50] sm:$0xff] %vm3593_vm3, %v3566_v14 }
 0x996   : > { %v7220_v52 = vpop.eup %7219  ;;  %4786 = vst [vmem:[%s9401_s18 + $0x68] sm:$0xff] %v4770_v34  ;;  %v4524_v42 = vadd.f32 %v4508_v27, %v9256_v23  ;;  %v4395_v27 = vmul.f32 %v9449_v49, %v9440_v28 }
 0x997   : > { %v4758_v36 = vmul.f32 0.25, %v4510_v5  ;;  %v4493_v50 = vmul.f32 %v7220_v52, %v8892_v47  ;;  %v4120_v10 = vpop.xlane.xlu1 %4119  ;;  %v4380_v9 = vmul.f32 %v7220_v52, %v9325_v35 }
 0x998   : > { %v4772_v26 = vmul.f32 0.25, %v4524_v42  ;;  %7225 = vrcp.f32 %v4120_v10  ;;  %v2703_v0 = vpop.permute.xlu0 %2702 }
 0x999   : > { %4774 = vst [vmem:[%s9401_s18 + $0x8] sm:$0xff] %v4758_v36  ;;  %v4509_v3 = vadd.f32 %v4493_v50, %v9119_v19  ;;  %4412 = vrot.lane.b32.xlu0 %v4380_v9, %s7299_s26  ;;  %4418 = vrot.lane.b32.xlu1 %v4383_v54, %s7299_s26  ;;  %2739 = vst.msk [vmem:[#allocation5 + $0x60] sm:$0xff] %vm2726_vm2, %v2703_v0 }
 0x99a   : > { %v7222_v47 = vpop.eup %7221  ;;  %4788 = vst [vmem:[%s9401_s18 + $0x78] sm:$0xff] %v4772_v26 }
 0x99b   : > { %v4757_v23 = vmul.f32 0.25, %v4509_v3  ;;  %v4495_v35 = vmul.f32 %v7222_v47, %v9888_v48  ;;  %v4124_v2 = vpop.xlane.xlu1 %4123  ;;  %v4382_v1 = vmul.f32 %v7222_v47, %v9329_v61 }
 0x99c   : > { %7227 = vrcp.f32 %v4124_v2  ;;  %v3570_v19 = vpop.permute.xlu0 %3569 }
 0x99d   : > { %4773 = vst [vmem:[%s9401_s18] sm:$0xff] %v4757_v23  ;;  %v4511_v43 = vadd.f32 %v4495_v35, %v9135_v8  ;;  %4416 = vrot.lane.b32.xlu0 %v4382_v1, %s7299_s26  ;;  %4422 = vrot.lane.b32.xlu1 %v4385_v24, %s7299_s26  ;;  %3606 = vst.msk [vmem:[#allocation5 + $0x60] sm:$0xff] %vm3593_vm3, %v3570_v19 }
 0x99e   : > { %v7224_v11 = vpop.eup %7223 }
 0x99f   : > { %v4759_v48 = vmul.f32 0.25, %v4511_v43  ;;  %v4497_v53 = vmul.f32 %v7224_v11, %v9897_v4  ;;  %v4128_v61 = vpop.xlane.xlu1 %4127  ;;  %v4384_v13 = vmul.f32 %v7224_v11, %v9333_v29 }
 0x9a0   : > { %7229 = vrcp.f32 %v4128_v61  ;;  %v2707_v38 = vpop.permute.xlu0 %2706 }
 0x9a1   : > { %4775 = vst [vmem:[%s9401_s18 + $0x10] sm:$0xff] %v4759_v48  ;;  %v4513_v8 = vadd.f32 %v4497_v53, %v9151_v22  ;;  %4420 = vrot.lane.b32.xlu0 %v4384_v13, %s7299_s26  ;;  %4426 = vrot.lane.b32.xlu1 %v4387_v31, %s7299_s26  ;;  %2741 = vst.msk [vmem:[#allocation5 + $0x70] sm:$0xff] %vm2726_vm2, %v2707_v38 }
 0x9a2   : > { %v7226_v18 = vpop.eup %7225 }
 0x9a3   : > { %v4761_v4 = vmul.f32 0.25, %v4513_v8  ;;  %v4499_v6 = vmul.f32 %v7226_v18, %v9903_v33  ;;  %v4132_v29 = vpop.xlane.xlu1 %4131  ;;  %v4386_v56 = vmul.f32 %v7226_v18, %v9343_v25  ;;  %v4391_v33 = vmul.f32 %v9427_v30, %v9413_v59 }
 0x9a4   : > { %7231 = vrcp.f32 %v4132_v29  ;;  %v3574_v15 = vpop.permute.xlu0 %3573  ;;  %v4393_v59 = vmul.f32 %v9438_v51, %v9429_v37 }
 0x9a5   : > { %4777 = vst [vmem:[%s9401_s18 + $0x20] sm:$0xff] %v4761_v4  ;;  %v4515_v22 = vadd.f32 %v4499_v6, %v9165_v45  ;;  %4424 = vrot.lane.b32.xlu0 %v4386_v56, %s7299_s26  ;;  %4430 = vrot.lane.b32.xlu1 %v4389_v7, %s7299_s26  ;;  %3608 = vst.msk [vmem:[#allocation5 + $0x70] sm:$0xff] %vm3593_vm3, %v3574_v15 }
 0x9a6   : > { %v7228_v46 = vpop.eup %7227 }
 0x9a7   : > { %v4763_v25 = vmul.f32 0.25, %v4515_v22  ;;  %v4501_v21 = vmul.f32 %v7228_v46, %v9908_v55  ;;  %v3564_v32 = vpop.permute.xlu1 %3563  ;;  %v4388_v44 = vmul.f32 %v7228_v46, %v9357_v62  ;;  %v5182_v46 = vld [vmem:[%s9653_s6] ss:$0 sm:$0xff] }
 0x9a8   : > { %3603 = vst.msk [vmem:[#allocation5 + $0x48] sm:$0xff] %vm3593_vm3, %v3564_v32 }
 0x9a9   : > { %4779 = vst [vmem:[%s9401_s18 + $0x30] sm:$0xff] %v4763_v25  ;;  %v4517_v45 = vadd.f32 %v4501_v21, %v9184_v12  ;;  %4428 = vrot.lane.b32.xlu0 %v4388_v44, %s7299_s26  ;;  %4434 = vrot.lane.b32.xlu1 %v4391_v33, %s7299_s26 }
 0x9aa   : > { %v7230_v57 = vpop.eup %7229 }
 0x9ab   : > { %v4765_v30 = vmul.f32 0.25, %v4517_v45  ;;  %v4503_v55 = vmul.f32 %v7230_v57, %v9910_v63  ;;  %v4390_v62 = vmul.f32 %v7230_v57, %v9417_v60 }
 0x9ad   : > { %4781 = vst [vmem:[%s9401_s18 + $0x40] sm:$0xff] %v4765_v30  ;;  %v4519_v34 = vadd.f32 %v4503_v55, %v9202_v41  ;;  %4432 = vrot.lane.b32.xlu0 %v4390_v62, %s7299_s26  ;;  %4438 = vrot.lane.b32.xlu1 %v4393_v59, %s7299_s26 }
 0x9ae   : > { %v7232_v12 = vpop.eup %7231 }
 0x9af   : > { %v4767_v14 = vmul.f32 0.25, %v4519_v34  ;;  %v4505_v37 = vmul.f32 %v7232_v12, %v9912_v40  ;;  %v4392_v51 = vmul.f32 %v7232_v12, %v9433_v17 }
 0x9b1   : > { %4783 = vst [vmem:[%s9401_s18 + $0x50] sm:$0xff] %v4767_v14  ;;  %v4521_v63 = vadd.f32 %v4505_v37, %v9222_v39  ;;  %4436 = vrot.lane.b32.xlu0 %v4392_v51, %s7299_s26  ;;  %4442 = vrot.lane.b32.xlu1 %v4395_v27, %s7299_s26 }
 0x9b3   : > { %v4769_v41 = vmul.f32 0.25, %v4521_v63 }
 0x9b5   : > { %4785 = vst [vmem:[%s9401_s18 + $0x60] sm:$0xff] %v4769_v41 }
 0x9d8   : > { %v4136_v60 = vpop.xlane.xlu1 %4135 }
 0x9d9   : > { %7233 = vrcp.f32 %v4136_v60 }
 0x9dc   : > { %v2701_v5 = vpop.permute.xlu1 %2700 }
 0x9dd   : > { %2738 = vst.msk [vmem:[#allocation5 + $0x58] sm:$0xff] %vm2726_vm2, %v2701_v5 }
 0x9e0   : > { %v3568_v28 = vpop.permute.xlu1 %3567 }
 0x9e1   : > { %3605 = vst.msk [vmem:[#allocation5 + $0x58] sm:$0xff] %vm3593_vm3, %v3568_v28 }
 0x9e3   : > { %v7234_v40 = vpop.eup %7233 }
 0x9e4   : > { %v4507_v17 = vmul.f32 %v7234_v40, %v9918_v16  ;;  %v2705_v49 = vpop.permute.xlu1 %2704  ;;  %v4394_v39 = vmul.f32 %v7234_v40, %v9444_v20 }
 0x9e5   : > { %2740 = vst.msk [vmem:[#allocation5 + $0x68] sm:$0xff] %vm2726_vm2, %v2705_v49 }
 0x9e6   : > { %v4523_v52 = vadd.f32 %v4507_v17, %v9240_v58  ;;  %4440 = vrot.lane.b32.xlu0 %v4394_v39, %s7299_s26 }
 0x9e8   : > { %v4771_v42 = vmul.f32 0.25, %v4523_v52  ;;  %v3572_v36 = vpop.permute.xlu1 %3571 }
 0x9e9   : > { %3607 = vst.msk [vmem:[#allocation5 + $0x68] sm:$0xff] %vm3593_vm3, %v3572_v36 }
 0x9ea   : > { %4787 = vst [vmem:[%s9401_s18 + $0x70] sm:$0xff] %v4771_v42 }
 0x9ec   : > { %v2709_v50 = vpop.permute.xlu1 %2708 }
 0x9ed   : > { %2742 = vst.msk [vmem:[#allocation5 + $0x78] sm:$0xff] %vm2726_vm2, %v2709_v50 }
 0x9f0   : > { %v3576_v10 = vpop.permute.xlu1 %3575 }
 0x9f1   : > { %3609 = vst.msk [vmem:[#allocation5 + $0x78] sm:$0xff] %vm3593_vm3, %v3576_v10 }
 0xa07   : > { %v4415_v16 = vpop.permute.xlu1 %4414 }
 0xa08   : > { %4462 = vst.msk [vmem:[#allocation5 + $0x8] sm:$0xff] %vm4460_vm4, %v4415_v16 }
 0xa0b   : > { %v4419_v20 = vpop.permute.xlu1 %4418  ;;  %v4413_v9 = vpop.permute.xlu0 %4412 }
 0xa0c   : > { %4464 = vst.msk [vmem:[#allocation5 + $0x18] sm:$0xff] %vm4460_vm4, %v4419_v20  ;;  %4461 = vst.msk [vmem:[#allocation5] sm:$0xff] %vm4460_vm4, %v4413_v9 }
 0xa0f   : > { %v4423_v58 = vpop.permute.xlu1 %4422  ;;  %v4417_v54 = vpop.permute.xlu0 %4416  ;;  %v4542_v47 = vld [vmem:[#allocation5 + $0x8] sm:$0xff] }
 0xa10   : > { %4466 = vst.msk [vmem:[#allocation5 + $0x28] sm:$0xff] %vm4460_vm4, %v4423_v58  ;;  %4463 = vst.msk [vmem:[#allocation5 + $0x10] sm:$0xff] %vm4460_vm4, %v4417_v54 }
 0xa13   : > { %v4427_v26 = vpop.permute.xlu1 %4426  ;;  %v4421_v0 = vpop.permute.xlu0 %4420  ;;  %v4541_v3 = vld [vmem:[#allocation5] sm:$0xff]  ;;  %v4544_v1 = vld [vmem:[#allocation5 + $0x18] sm:$0xff] }
 0xa14   : > { %4468 = vst.msk [vmem:[#allocation5 + $0x38] sm:$0xff] %vm4460_vm4, %v4427_v26  ;;  %4465 = vst.msk [vmem:[#allocation5 + $0x20] sm:$0xff] %vm4460_vm4, %v4421_v0  ;;  %6223 = vmatprep.mubr.f32.mxu0 %v4541_v3 }
 0xa15   : > { %6224 = vmatmul.mubr.f32.vlgmr.msra.gmra.mrb[80].mxu0 %v4542_v47 }
 0xa17   : > { %v4431_v23 = vpop.permute.xlu1 %4430  ;;  %v4425_v35 = vpop.permute.xlu0 %4424  ;;  %v4543_v2 = vld [vmem:[#allocation5 + $0x10] sm:$0xff]  ;;  %v4546_v11 = vld [vmem:[#allocation5 + $0x28] sm:$0xff] }
 0xa18   : > { %4470 = vst.msk [vmem:[#allocation5 + $0x48] sm:$0xff] %vm4460_vm4, %v4431_v23  ;;  %4467 = vst.msk [vmem:[#allocation5 + $0x30] sm:$0xff] %vm4460_vm4, %v4425_v35  ;;  %6226 = vmatprep.mubr.f32.mxu0 %v4543_v2 }
 0xa19   : > { %6227 = vmatmul.mubr.f32.gmra.mrb[82].mxu0 %v4544_v1 }
 0xa1b   : > { %v4435_v24 = vpop.permute.xlu1 %4434  ;;  %v4429_v19 = vpop.permute.xlu0 %4428  ;;  %v4545_v43 = vld [vmem:[#allocation5 + $0x20] sm:$0xff]  ;;  %v4548_v13 = vld [vmem:[#allocation5 + $0x38] sm:$0xff] }
 0xa1c   : > { %4472 = vst.msk [vmem:[#allocation5 + $0x58] sm:$0xff] %vm4460_vm4, %v4435_v24  ;;  %4469 = vst.msk [vmem:[#allocation5 + $0x40] sm:$0xff] %vm4460_vm4, %v4429_v19  ;;  %6229 = vmatprep.mubr.f32.mxu0 %v4545_v43 }
 0xa1d   : > { %6230 = vmatmul.mubr.f32.gmra.mrb[84].mxu0 %v4546_v11 }
 0xa1f   : > { %v4439_v48 = vpop.permute.xlu1 %4438  ;;  %v4433_v53 = vpop.permute.xlu0 %4432  ;;  %v4547_v61 = vld [vmem:[#allocation5 + $0x30] sm:$0xff]  ;;  %v4550_v18 = vld [vmem:[#allocation5 + $0x48] sm:$0xff] }
 0xa20   : > { %4474 = vst.msk [vmem:[#allocation5 + $0x68] sm:$0xff] %vm4460_vm4, %v4439_v48  ;;  %4471 = vst.msk [vmem:[#allocation5 + $0x50] sm:$0xff] %vm4460_vm4, %v4433_v53  ;;  %6232 = vmatprep.mubr.f32.mxu0 %v4547_v61 }
 0xa21   : > { %6233 = vmatmul.mubr.f32.gmra.mrb[86].mxu0 %v4548_v13 }
 0xa23   : > { %v4443_v31 = vpop.permute.xlu1 %4442  ;;  %v4437_v38 = vpop.permute.xlu0 %4436  ;;  %v4549_v8 = vld [vmem:[#allocation5 + $0x40] sm:$0xff]  ;;  %v4552_v6 = vld [vmem:[#allocation5 + $0x58] sm:$0xff] }
 0xa24   : > { %4476 = vst.msk [vmem:[#allocation5 + $0x78] sm:$0xff] %vm4460_vm4, %v4443_v31  ;;  %4473 = vst.msk [vmem:[#allocation5 + $0x60] sm:$0xff] %vm4460_vm4, %v4437_v38  ;;  %6235 = vmatprep.mubr.f32.mxu0 %v4549_v8 }
 0xa25   : > { %6236 = vmatmul.mubr.f32.gmra.mrb[88].mxu0 %v4550_v18 }
 0xa27   : > { %v4551_v4 = vld [vmem:[#allocation5 + $0x50] sm:$0xff]  ;;  %v4554_v56 = vld [vmem:[#allocation5 + $0x68] sm:$0xff] }
 0xa28   : > { %6238 = vmatprep.mubr.f32.mxu0 %v4551_v4 }
 0xa29   : > { %6239 = vmatmul.mubr.f32.gmra.mrb[90].mxu0 %v4552_v6 }
 0xa2b   : > { %v4553_v29 = vld [vmem:[#allocation5 + $0x60] sm:$0xff]  ;;  %v4556_v22 = vld [vmem:[#allocation5 + $0x78] sm:$0xff] }
 0xa2c   : > { %6241 = vmatprep.mubr.f32.mxu0 %v4553_v29 }
 0xa2d   : > { %6242 = vmatmul.mubr.f32.gmra.mrb[92].mxu0 %v4554_v56 }
 0xa58   : > { %v4441_v7 = vpop.permute.xlu0 %4440 }
 0xa59   : > { %4475 = vst.msk [vmem:[#allocation5 + $0x70] sm:$0xff] %vm4460_vm4, %v4441_v7 }
 0xa60   : > { %v4555_v15 = vld [vmem:[#allocation5 + $0x70] sm:$0xff] }
 0xa61   : > { %6244 = vmatprep.mubr.f32.mxu0 %v4555_v15 }
 0xa62   : > { %6245 = vmatmul.mubr.f32.gmra.mrb[94].mxu0 %v4556_v22 }
 0xae8   : > { %v6225_v33 = vpop.f32.mrb[80].mxu0 }
 0xae9   : > { %v4652_v25 = vadd.f32 %v6225_v33, %v5182_v46  ;;  %v4646_v21 = vpop.f32.mrb[81].mxu0 }
 0xaea   : > { %v4647_v32 = vadd.f32 %v5182_v46, %v4646_v21 }
 0xaeb   : > { %4726 = vst [vmem:[%s9554_s23 + $0x8] sm:$0xff] %v4652_v25 }
 0xaec   : > { %4725 = vst [vmem:[%s9554_s23] sm:$0xff] %v4647_v32  ;;  %v6228_v44 = vpop.f32.mrb[82].mxu0 }
 0xaed   : > { %v4662_v45 = vadd.f32 %v6228_v44, %v5182_v46  ;;  %v4656_v57 = vpop.f32.mrb[83].mxu0 }
 0xaee   : > { %v4657_v59 = vadd.f32 %v5182_v46, %v4656_v57 }
 0xaef   : > { %4728 = vst [vmem:[%s9554_s23 + $0x18] sm:$0xff] %v4662_v45 }
 0xaf0   : > { %4727 = vst [vmem:[%s9554_s23 + $0x10] sm:$0xff] %v4657_v59  ;;  %v6231_v30 = vpop.f32.mrb[84].mxu0 }
 0xaf1   : > { %v4672_v55 = vadd.f32 %v6231_v30, %v5182_v46  ;;  %v4666_v62 = vpop.f32.mrb[85].mxu0 }
 0xaf2   : > { %v4667_v34 = vadd.f32 %v5182_v46, %v4666_v62  ;;  %v4862_v9 = vld [vmem:[%s9554_s23 + $0x8] sm:$0xff] (%p7393_p6) }
 0xaf3   : > { %4730 = vst [vmem:[%s9554_s23 + $0x28] sm:$0xff] %v4672_v55  ;;  %v4860_v20 = vld [vmem:[%s9554_s23] sm:$0xff] (%p7393_p6)  ;;  %4863 = vst [vmem:[%s4802_s12 + $0x10] sm:$0xff] (%p7393_p6), %v4862_v9 }
 0xaf4   : > { %4729 = vst [vmem:[%s9554_s23 + $0x20] sm:$0xff] %v4667_v34  ;;  %v6234_v12 = vpop.f32.mrb[86].mxu0  ;;  %4861 = vst [vmem:[%s4802_s12] sm:$0xff] (%p7393_p6), %v4860_v20 }
 0xaf5   : > { %v4682_v27 = vadd.f32 %v6234_v12, %v5182_v46  ;;  %v4676_v14 = vpop.f32.mrb[87].mxu0 }
 0xaf6   : > { %v4677_v37 = vadd.f32 %v5182_v46, %v4676_v14  ;;  %v4866_v54 = vld [vmem:[%s9554_s23 + $0x18] sm:$0xff] (%p7393_p6) }
 0xaf7   : > { %4732 = vst [vmem:[%s9554_s23 + $0x38] sm:$0xff] %v4682_v27  ;;  %v4864_v58 = vld [vmem:[%s9554_s23 + $0x10] sm:$0xff] (%p7393_p6)  ;;  %4867 = vst [vmem:[%s4802_s12 + $0x30] sm:$0xff] (%p7393_p6), %v4866_v54 }
 0xaf8   : > { %4731 = vst [vmem:[%s9554_s23 + $0x30] sm:$0xff] %v4677_v37  ;;  %v6237_v51 = vpop.f32.mrb[88].mxu0  ;;  %4865 = vst [vmem:[%s4802_s12 + $0x20] sm:$0xff] (%p7393_p6), %v4864_v58 }
 0xaf9   : > { %v4692_v63 = vadd.f32 %v6237_v51, %v5182_v46  ;;  %v4686_v41 = vpop.f32.mrb[89].mxu0 }
 0xafa   : > { %v4687_v60 = vadd.f32 %v5182_v46, %v4686_v41  ;;  %v4870_v0 = vld [vmem:[%s9554_s23 + $0x28] sm:$0xff] (%p7393_p6) }
 0xafb   : > { %4734 = vst [vmem:[%s9554_s23 + $0x48] sm:$0xff] %v4692_v63  ;;  %v4868_v26 = vld [vmem:[%s9554_s23 + $0x20] sm:$0xff] (%p7393_p6)  ;;  %4871 = vst [vmem:[%s4802_s12 + $0x50] sm:$0xff] (%p7393_p6), %v4870_v0 }
 0xafc   : > { %4733 = vst [vmem:[%s9554_s23 + $0x40] sm:$0xff] %v4687_v60  ;;  %v6240_v5 = vpop.f32.mrb[90].mxu0  ;;  %4869 = vst [vmem:[%s4802_s12 + $0x40] sm:$0xff] (%p7393_p6), %v4868_v26 }
 0xafd   : > { %v4702_v28 = vadd.f32 %v6240_v5, %v5182_v46  ;;  %v4696_v40 = vpop.f32.mrb[91].mxu0 }
 0xafe   : > { %v4697_v17 = vadd.f32 %v5182_v46, %v4696_v40  ;;  %v4874_v47 = vld [vmem:[%s9554_s23 + $0x38] sm:$0xff] (%p7393_p6) }
 0xaff   : > { %4736 = vst [vmem:[%s9554_s23 + $0x58] sm:$0xff] %v4702_v28  ;;  %v4872_v3 = vld [vmem:[%s9554_s23 + $0x30] sm:$0xff] (%p7393_p6)  ;;  %4875 = vst [vmem:[%s4802_s12 + $0x70] sm:$0xff] (%p7393_p6), %v4874_v47 }
 0xb00   : > { %4735 = vst [vmem:[%s9554_s23 + $0x50] sm:$0xff] %v4697_v17  ;;  %v6243_v49 = vpop.f32.mrb[92].mxu0  ;;  %4873 = vst [vmem:[%s4802_s12 + $0x60] sm:$0xff] (%p7393_p6), %v4872_v3 }
 0xb01   : > { %v4712_v39 = vadd.f32 %v6243_v49, %v5182_v46  ;;  %v4706_v52 = vpop.f32.mrb[93].mxu0 }
 0xb02   : > { %v4707_v42 = vadd.f32 %v5182_v46, %v4706_v52  ;;  %v4878_v35 = vld [vmem:[%s9554_s23 + $0x48] sm:$0xff] (%p7393_p6) }
 0xb03   : > { %4738 = vst [vmem:[%s9554_s23 + $0x68] sm:$0xff] %v4712_v39  ;;  %v4876_v23 = vld [vmem:[%s9554_s23 + $0x40] sm:$0xff] (%p7393_p6)  ;;  %4879 = vst [vmem:[%s4802_s12 + $0x90] sm:$0xff] (%p7393_p6), %v4878_v35 }
 0xb04   : > { %4737 = vst [vmem:[%s9554_s23 + $0x60] sm:$0xff] %v4707_v42  ;;  %4877 = vst [vmem:[%s4802_s12 + $0x80] sm:$0xff] (%p7393_p6), %v4876_v23 }
 0xb06   : > { %v4882_v1 = vld [vmem:[%s9554_s23 + $0x58] sm:$0xff] (%p7393_p6) }
 0xb07   : > { %v4880_v2 = vld [vmem:[%s9554_s23 + $0x50] sm:$0xff] (%p7393_p6)  ;;  %4883 = vst [vmem:[%s4802_s12 + $0xb0] sm:$0xff] (%p7393_p6), %v4882_v1 }
 0xb08   : > { %4881 = vst [vmem:[%s4802_s12 + $0xa0] sm:$0xff] (%p7393_p6), %v4880_v2 }
 0xb0a   : > { %v4886_v19 = vld [vmem:[%s9554_s23 + $0x68] sm:$0xff] (%p7393_p6) }
 0xb0b   : > { %v4884_v24 = vld [vmem:[%s9554_s23 + $0x60] sm:$0xff] (%p7393_p6)  ;;  %4887 = vst [vmem:[%s4802_s12 + $0xd0] sm:$0xff] (%p7393_p6), %v4886_v19 }
 0xb0c   : > { %4885 = vst [vmem:[%s4802_s12 + $0xc0] sm:$0xff] (%p7393_p6), %v4884_v24 }
 0xb33   : > { %4800 = sbr.rel (!%p7393_p6) target bundleno = 2882 (0xb42), region = 166 }
 0xb35   : > { %v6246_v36 = vpop.f32.mrb[94].mxu0 }
 0xb36   : > { %v4722_v50 = vadd.f32 %v6246_v36, %v5182_v46  ;;  %v4716_v10 = vpop.f32.mrb[95].mxu0 }
 0xb37   : > { %v4717_v16 = vadd.f32 %v5182_v46, %v4716_v10 }
 0xb38   : > { %4740 = vst [vmem:[%s9554_s23 + $0x78] sm:$0xff] %v4722_v50 }
 0xb39   : > { %4739 = vst [vmem:[%s9554_s23 + $0x70] sm:$0xff] %v4717_v16 }
 0xb3f   : > { %v4890_v11 = vld [vmem:[%s9554_s23 + $0x78] sm:$0xff] }
 0xb40   : > { %v4888_v43 = vld [vmem:[%s9554_s23 + $0x70] sm:$0xff]  ;;  %4891 = vst [vmem:[%s4802_s12 + $0xf0] sm:$0xff] %v4890_v11 }
 0xb41   : > { %4889 = vst [vmem:[%s4802_s12 + $0xe0] sm:$0xff] %v4888_v43 }
 0xb42 PF: > { %s5190_s19 = sshll.u32 %s7371_s9, 11  ;;  %s4904_s24 = sshll.u32 %s9401_s18, 4  ;;  %s9605_s24 = int_to_ptr.vmem [resolvable:$true] %s4904_s24 }
 0xb43   : > { %s9603_s26 = scalar_lea.hbm %s9655_s8, %s5190_s19  ;;  %s7235_s21 = scalar_lea.vmem %s9605_s24, 2048 }
 0xb44   : > { %p7236_p13 = scmp.ne.s32.totalorder %s9605_s24, %s7235_s21  ;;  %s7302_s23 = smov [#allocation11]  }
 0xb45   : > { %s7239_s22 = sshll.u32 %s7302_s23, 4  ;;  %s7240_s22 = int_to_ptr.vmem [resolvable:$false] %s7239_s22 }
 0xb46   : > { %p7237_p0 = pnand %p7236_p13, %p7393_p6  ;;  %s7241_s9 = scalar_lea.vmem %s7240_s22, 4096 }
 0xb47   : > { %p7242_p2 = scmp.lt.s32.totalorder %s9605_s24, %s7240_s22  ;;  %p7243_p3 = scmp.lt.s32.totalorder %s7241_s9, %s7235_s21 }
 0xb48   : > { %p7238_p1 = pneg %p7237_p0 }
 0xb49   : > { %p7244_p4 = por %p7243_p3, %p7242_p2 }
 0xb4b   : > { %p7245_p5 = pnand %p7244_p4, %p7238_p1 }
 0xb4d   : > { %7248 = shalt.err (!%p7245_p5)
}
 0xb4e   : > { %s7249_s18 = scalar_lea.hbm %s9603_s26, 2048  ;;  %s7253_s12 = scalar_lea.hbm %s9655_s8, 4096 }
 0xb4f   : > { %p7250_p7 = scmp.ne.s32.totalorder %s9603_s26, %s7249_s18  ;;  %p7254_p12 = scmp.lt.u32.totalorder %s9603_s26, %s9655_s8 }
 0xb50   : > { %p7255_p13 = scmp.lt.u32.totalorder %s7253_s12, %s7249_s18  ;;  %p7257_p1 = scmp.lt.u32.totalorder %s7249_s18, %s9603_s26 }
 0xb51   : > { %p7251_p10 = pnand %p7250_p7, %p7393_p6 }
 0xb52   : > { %p7256_p0 = por %p7255_p13, %p7254_p12 }
 0xb53   : > { %p7252_p11 = pneg %p7251_p10 }
 0xb54   : > { %p7258_p2 = por %p7257_p1, %p7256_p0 }
 0xb56   : > { %p7259_p3 = pnand %p7258_p2, %p7252_p11 }
 0xb58   : > { %7262 = shalt.err (!%p7259_p3)
}
 0xb59   : > { %s7303_s15 = smov 128   ;;  %s7304_s21 = smov 8  }
 0xb5a   : > { %6695 = dma.vmem_to_hbm [thread:$0]  (%p7393_p6), %s9605_s24, 2048, %s9603_s26, %s9574_s25, %s7303_s15, %s7303_s15, %s7304_s21  }
 0xb5b PF: > { %s4926_s23 = sand.u32 1, %s7285_s27   ;;  %p6698_p4 = pnand %p5038_p9, %p7397_p8 }
 0xb5c   : > { %s4927_s22 = scalar_lea.sflag [#allocation12], %s4926_s23 }
 0xb5d   : > { %7280 = dma.done.wait (!%p6698_p4), %s4927_s22, 2048  }
 0xb5e   : > { %7282 = vsyncadd (!%p6698_p4), %s4927_s22, 4294965248  ;;  %p19_p5 = scmp.ge.s32.totalorder %s7375_s11, 4   ;;  %s9922_s27 = smov %s7289_s28 }
 0xb5f   : > { %s9923_s28 = smov %s7293_s29  ;;  %s9924_s29 = smov %s7387_s14 }
 0xb60   : > { %s9925_s30 = smov %s7375_s11  ;;  %21 = sbr.rel (!%p19_p5) target bundleno = 3 (0x3), region = 268 }
 0xb67   :  { %4932 = vsyncpa [#allocation12], 1 }
 0xb68   :  { %4934 = vsyncpa [#allocation12 + $0x1], 1 }

</bundles_post_ra>
